<compile_context>
chip_gen: v5e
topology: v5e:2x2
jax: 0.10.0
libtpu: 0.0.40
codegen_flags: <defaults>
</compile_context>

<pallas_src>
import numpy as np
import jax
import jax.numpy as jnp
from jax import lax
from jax.experimental import pallas as pl
from jax.experimental.pallas import tpu as pltpu

# ----------------------- model hyper-parameters -----------------------------
FC_DIM = 32                 # par.fc_dim
CONV_EMB = 8                # par.conv_embedding (forced by fc_map in = 13*13*8)
MAP_IN_EMB = 4              # map_in_embedding
MAP_ORIENT = 4              # map_orient
TVEC_DIM = 8
N_ACTIONS = 5
STATE_ITEMS = 3             # use_ego_obsv = False
HIDDEN = FC_DIM * STATE_ITEMS + 1   # 97
HPAD = 128                  # padded hidden (lane-aligned)
GPAD = 4 * HPAD             # 512, padded gate width
MAP_HW = 28                 # spatial size forced by 13*13*8 flatten
FEAT = 13 * 13 * CONV_EMB   # 1352
KIN = (MAP_IN_EMB + MAP_ORIENT) * 9   # 72 merged im2col rows (map | p)
COUT = 2 * CONV_EMB                   # 16 merged conv output channels
BN_EPS = 1e-5


def _round_up(x, m):
    return ((x + m - 1) // m) * m


# =========================== Pallas kernels =================================
def _conv_pool_kernel(p_ref, w_ref, b_ref, o_ref):
    # p_ref: (4, 72, TNP) bf16  im2col patches^T (both branches merged on K)
    # w_ref: (16, 72)     bf16  block-diagonal folded conv+BN weights
    # b_ref: (16, 1)      f32   folded bias
    # o_ref: (16, TNP)    f32   relu(maxpool(bn(conv(x)))) for both branches
    w = w_ref[...]
    m = jnp.dot(w, p_ref[0], preferred_element_type=jnp.float32)
    for k in range(1, p_ref.shape[0]):                 # 4 pool taps
        m = jnp.maximum(m, jnp.dot(w, p_ref[k],
                                   preferred_element_type=jnp.float32))
    # bias hoisted out of the tap loop; relu(max+b) == max(relu(.+b)) (shared b)
    o_ref[...] = jnp.maximum(m + b_ref[...], 0.0)


def conv_pool(patches, w, b, tnp):
    # patches: (4, KIN, NP_pad) bf16  ->  (COUT, NP_pad) f32
    _, K, NPP = patches.shape
    return pl.pallas_call(
        _conv_pool_kernel,
        out_shape=jax.ShapeDtypeStruct((COUT, NPP), jnp.float32),
        grid=(NPP // tnp,),
        in_specs=[
            pl.BlockSpec((4, K, tnp), lambda j: (0, 0, j)),
            pl.BlockSpec((COUT, K), lambda j: (0, 0)),
            pl.BlockSpec((COUT, 1), lambda j: (0, 0)),
        ],
        out_specs=pl.BlockSpec((COUT, tnp), lambda j: (0, j)),
        compiler_params=pltpu.CompilerParams(
            dimension_semantics=("parallel",),
            vmem_limit_bytes=32 * 1024 * 1024),
    )(patches, w, b)


def _feature_kernel(x_ref, col_ref, w1_ref, b1_ref, wih_ref, bl_ref, o_ref):
    # x_ref : (TN, 2712)  concat(map_feat, p_feat, t_vec)
    # col_ref:(TN, 1)     collision scalar
    # w1_ref: (2712, 128) block-diagonal [fc_map | fc_p | fc_t | 0-pad]
    # wih_ref:(128, 512)  padded LSTM input weights (gate-major, 128/gate)
    # o_ref : (TN, 512)   precomputed LSTM input projection (incl. both biases)
    h = jnp.dot(x_ref[...], w1_ref[...], preferred_element_type=jnp.float32)
    h = jnp.maximum(h + b1_ref[...], 0.0)              # (TN,128): [map|p|t|0]
    # inject the raw collision scalar into lane HIDDEN-1 (=96); w1/b1 are zero
    # there so this reproduces torch.cat((..., collision), 2) exactly.
    lane = lax.broadcasted_iota(jnp.int32, h.shape, 1)
    h = jnp.where(lane == HIDDEN - 1, col_ref[...], h)
    xp = jnp.dot(h, wih_ref[...], preferred_element_type=jnp.float32)
    o_ref[...] = xp + bl_ref[...]


def feature_lstm_input(feat, col, w1, b1, wih, bl, tn):
    NPAD, D = feat.shape
    return pl.pallas_call(
        _feature_kernel,
        out_shape=jax.ShapeDtypeStruct((NPAD, GPAD), jnp.float32),
        grid=(NPAD // tn,),
        in_specs=[
            pl.BlockSpec((tn, D), lambda i: (i, 0)),
            pl.BlockSpec((tn, 1), lambda i: (i, 0)),
            pl.BlockSpec(w1.shape, lambda i: (0, 0)),   # weights stay resident
            pl.BlockSpec(b1.shape, lambda i: (0, 0)),
            pl.BlockSpec(wih.shape, lambda i: (0, 0)),
            pl.BlockSpec(bl.shape, lambda i: (0, 0)),
        ],
        out_specs=pl.BlockSpec((tn, GPAD), lambda i: (i, 0)),
        compiler_params=pltpu.CompilerParams(
            dimension_semantics=("parallel",),
            vmem_limit_bytes=32 * 1024 * 1024),
    )(feat, col, w1, b1, wih, bl)


def _sigmoid(z):
    # divide-free sigmoid: tanh goes to the EUP slot (nearly free)
    return 0.5 * (jnp.tanh(0.5 * z) + 1.0)


def _lstm_kernel(xp_ref, whh_ref, o_ref):
    # xp_ref : (T, B, 512) precomputed x@W_ih + b (gate-padded, 128 per gate)
    # whh_ref: (128, 512)  fused, padded recurrent weights (gate order i,f,g,o)
    # o_ref  : (T, B, 128) hidden states (padded lanes stay exactly 0)
    T, B = xp_ref.shape[0], xp_ref.shape[1]
    whh = whh_ref[...]

    def step(t, carry):
        h, c = carry
        g = xp_ref[t] + jnp.dot(h, whh, preferred_element_type=jnp.float32)
        i_g = _sigmoid(g[:, 0 * HPAD:1 * HPAD])
        f_g = _sigmoid(g[:, 1 * HPAD:2 * HPAD])
        g_g = jnp.tanh(g[:, 2 * HPAD:3 * HPAD])
        o_g = _sigmoid(g[:, 3 * HPAD:4 * HPAD])
        c_new = f_g * c + i_g * g_g     # padded lanes stay 0 (c0=0, g_g=0 there)
        h_new = o_g * jnp.tanh(c_new)
        o_ref[t] = h_new
        return (h_new, c_new)

    z = jnp.zeros((B, HPAD), jnp.float32)
    lax.fori_loop(0, T, step, (z, z))


def lstm_forward(xproj, whh):
    # xproj: (T, B, 512) time-major precomputed input projection
    T, B, G = xproj.shape
    # Whole sequence resident in VMEM; recurrence runs as one in-kernel loop.
    # TODO(synk): chunk T across grid steps (carrying h/c in scratch) if
    # T*B*512*4 bytes ever exceeds the VMEM budget.
    return pl.pallas_call(
        _lstm_kernel,
        out_shape=jax.ShapeDtypeStruct((T, B, HPAD), jnp.float32),
        grid=(1,),
        in_specs=[pl.BlockSpec((T, B, G), lambda i: (0, 0, 0)),
                  pl.BlockSpec((HPAD, G), lambda i: (0, 0))],
        out_specs=pl.BlockSpec((T, B, HPAD), lambda i: (0, 0, 0)),
        compiler_params=pltpu.CompilerParams(
            dimension_semantics=("arbitrary",)),
    )(xproj, whh)


# ============================ glue (plain JAX) ===============================
def _im2col_pool_patches_T(x):
    # x: (N, C, 28, 28) -> (4, C*9, N*169)
    # tap k = di*2+dj of the 2x2 max-pool window; column = n*169 + (i*13+j);
    # row q = c*9 + ki*3 + kj matches the PyTorch conv-weight flatten.
    # TODO(synk): building taps in-kernel from raw (C,28,28) tiles would remove
    # the ~7.8x im2col HBM expansion entirely; kept in XLA (bf16) for now.
    N, C = x.shape[0], x.shape[1]
    cols = [x[:, :, ki:ki + 26, kj:kj + 26] for ki in range(3) for kj in range(3)]
    p = jnp.stack(cols, axis=2)                                    # (N, C, 9, 26, 26)
    p = p.reshape(N, C * 9, 26, 26).transpose(0, 2, 3, 1)          # (N, 26, 26, C*9)
    p = p.reshape(N, 13, 2, 13, 2, C * 9)
    p = p.transpose(0, 2, 4, 1, 3, 5)                              # (N, 2, 2, 13, 13, C*9)
    p = p.reshape(N, 4, 169, C * 9)                                # (n, k, pos, q)
    return p.transpose(1, 3, 0, 2).reshape(4, C * 9, N * 169)


def prepare_params(params):
    """One-time weight folding / transposition / padding (outside jit)."""
    def fold(cw, cb, g, bt, mu, var):
        s = g / jnp.sqrt(var + BN_EPS)
        w = (cw * s[:, None, None, None]).reshape(CONV_EMB, -1)    # (8, C*9)
        return w, s * (cb - mu) + bt

    wm, bm = fold(params['map_conv_w'], params['map_conv_b'], params['map_bn_g'],
                  params['map_bn_b'], params['map_bn_m'], params['map_bn_v'])
    wp, bp = fold(params['p_conv_w'], params['p_conv_b'], params['p_bn_g'],
                  params['p_bn_b'], params['p_bn_m'], params['p_bn_v'])

    # merged block-diagonal conv weight (map rows 0:8 / K 0:36, p rows 8:16 / K 36:72)
    W = jnp.zeros((COUT, KIN), jnp.float32)
    W = W.at[0:CONV_EMB, 0:MAP_IN_EMB * 9].set(wm)
    W = W.at[CONV_EMB:COUT, MAP_IN_EMB * 9:KIN].set(wp)
    conv_b = jnp.concatenate([bm, bp]).reshape(COUT, 1)

    # fused feature-head weight: block diagonal [fc_map | fc_p | fc_t | 0-pad]
    w1 = jnp.zeros((2 * FEAT + TVEC_DIM, HPAD), jnp.float32)
    w1 = w1.at[0:FEAT, 0:FC_DIM].set(params['fc_map_w'].T)
    w1 = w1.at[FEAT:2 * FEAT, FC_DIM:2 * FC_DIM].set(params['fc_p_w'].T)
    w1 = w1.at[2 * FEAT:2 * FEAT + TVEC_DIM, 2 * FC_DIM:3 * FC_DIM].set(
        params['fc_t_w'].T)
    b1 = jnp.zeros((1, HPAD), jnp.float32)
    b1 = b1.at[0, 0:FC_DIM].set(params['fc_map_b'])
    b1 = b1.at[0, FC_DIM:2 * FC_DIM].set(params['fc_p_b'])
    b1 = b1.at[0, 2 * FC_DIM:3 * FC_DIM].set(params['fc_t_b'])

    def pad_gates(w):          # (4H, H) PyTorch layout -> (HPAD, 4*HPAD), (K,N)
        out = jnp.zeros((HPAD, GPAD), jnp.float32)
        for g in range(4):     # gate order i, f, g, o
            out = out.at[:HIDDEN, g * HPAD:g * HPAD + HIDDEN].set(
                w[g * HIDDEN:(g + 1) * HIDDEN, :].T)
        return out

    wih_pad = pad_gates(params['lstm_w_ih'])
    whh_pad = pad_gates(params['lstm_w_hh'])
    bl = jnp.zeros((1, GPAD), jnp.float32)
    bsum = params['lstm_b_ih'] + params['lstm_b_hh']
    for g in range(4):
        bl = bl.at[0, g * HPAD:g * HPAD + HIDDEN].set(
            bsum[g * HIDDEN:(g + 1) * HIDDEN])

    wa = jnp.zeros((HPAD, N_ACTIONS), jnp.float32)
    wa = wa.at[:HIDDEN, :].set(params['fc_action_w'].T)

    return {
        'conv_w': W.astype(jnp.bfloat16),                            # (16, 72) bf16
        'conv_b': conv_b,                                            # (16, 1)  f32
        'w1': w1, 'b1': b1,
        'wih': wih_pad,                                              # (128, 512)
        'whh': whh_pad,
        'lstm_b': bl,
        'fc_action_w': wa,
        'fc_action_b': params['fc_action_b'],
    }


def ilnet_forward(prep, map_pred, p_pred, t_vec, collision):
    # map_pred/p_pred: (B, T, C, 28, 28); t_vec: (B, TVEC_DIM); collision: (B, T)
    B, T = map_pred.shape[0], map_pred.shape[1]
    N = B * T
    NP = N * 169

    # ---- single bf16 im2col over both branches (channels concatenated) ------
    x_cat = jnp.concatenate(
        [map_pred.reshape(N, MAP_IN_EMB, MAP_HW, MAP_HW),
         p_pred.reshape(N, MAP_ORIENT, MAP_HW, MAP_HW)], axis=1)
    x_cat = x_cat.astype(jnp.bfloat16)
    patches = _im2col_pool_patches_T(x_cat)                 # (4, 72, NP) bf16

    np128 = _round_up(NP, 128)
    tnp = min(2048, np128)                                  # lane tile (mult of 128)
    np_pad = _round_up(NP, tnp)
    patches = jnp.pad(patches, ((0, 0), (0, 0), (0, np_pad - NP)))

    # ---- conv + BN + ReLU + maxpool, both branches in one pallas_call -------
    conv_out = conv_pool(patches, prep['conv_w'], prep['conv_b'], tnp)  # (16, NP_pad)

    def to_feat(co):   # (8, NP_pad) -> (N, 1352) in PyTorch c*169 + i*13 + j order
        return co[:, :NP].reshape(CONV_EMB, N, 169).transpose(1, 0, 2).reshape(N, FEAT)

    t_rep = jnp.broadcast_to(t_vec[:, None, :], (B, T, TVEC_DIM)).reshape(N, TVEC_DIM)
    feat = jnp.concatenate([to_feat(conv_out[0:CONV_EMB]),
                            to_feat(conv_out[CONV_EMB:COUT]), t_rep], axis=1)
    col = collision.reshape(N, 1)

    # ---- fused fc_map/fc_p/fc_t + collision + LSTM input projection ---------
    # TODO(synk): nn.Dropout after the FCs is identity here (eval-mode).
    n8 = _round_up(N, 8)
    tn = min(256, n8)
    n_pad = _round_up(N, tn)
    feat = jnp.pad(feat, ((0, n_pad - N), (0, 0)))
    col = jnp.pad(col, ((0, n_pad - N), (0, 0)))
    xproj = feature_lstm_input(feat, col, prep['w1'], prep['b1'],
                               prep['wih'], prep['lstm_b'], tn)     # (N_pad, 512)
    xproj = xproj[:N].reshape(B, T, GPAD).transpose(1, 0, 2)        # (T, B, 512)

    # ---- LSTM recurrence (padded 97->128), whole sequence in one kernel -----
    h_seq = lstm_forward(xproj, prep['whh'])                        # (T, B, 128)
    lstm_bt = h_seq.transpose(1, 0, 2).reshape(N, HPAD)

    # ---- action head: microscopic matmul, leave to XLA -----------------------
    act = lstm_bt @ prep['fc_action_w'] + prep['fc_action_b']       # (N, 5)
    return act.reshape(B, T, N_ACTIONS)


# ======================= pure-JAX reference (check) ==========================
def ref_forward(params, map_pred, p_pred, t_vec, collision):
    B, T = map_pred.shape[0], map_pred.shape[1]
    N = B * T

    def cnn_ref(x, cw, cb, g, bt, mu, var, fw, fb):
        z = lax.conv_general_dilated(x, cw, window_strides=(1, 1), padding='VALID',
                                     dimension_numbers=('NCHW', 'OIHW', 'NCHW'))
        z = z + cb[None, :, None, None]
        s = g / jnp.sqrt(var + BN_EPS)
        z = z * s[None, :, None, None] + (bt - mu * s)[None, :, None, None]
        z = jnp.maximum(z, 0.0)
        z = z.reshape(z.shape[0], z.shape[1], 13, 2, 13, 2).max(axis=(3, 5))
        z = z.reshape(z.shape[0], -1)
        return jnp.maximum(z @ fw.T + fb, 0.0)

    m = map_pred.reshape(N, MAP_IN_EMB, MAP_HW, MAP_HW)
    p = p_pred.reshape(N, MAP_ORIENT, MAP_HW, MAP_HW)
    map_out = cnn_ref(m, params['map_conv_w'], params['map_conv_b'],
                      params['map_bn_g'], params['map_bn_b'],
                      params['map_bn_m'], params['map_bn_v'],
                      params['fc_map_w'], params['fc_map_b']).reshape(B, T, FC_DIM)
    p_out = cnn_ref(p, params['p_conv_w'], params['p_conv_b'],
                    params['p_bn_g'], params['p_bn_b'],
                    params['p_bn_m'], params['p_bn_v'],
                    params['fc_p_w'], params['fc_p_b']).reshape(B, T, FC_DIM)
    t_out = jnp.maximum(t_vec @ params['fc_t_w'].T + params['fc_t_b'], 0.0)
    t_out = jnp.broadcast_to(t_out[:, None, :], (B, T, FC_DIM))
    x = jnp.concatenate([map_out, p_out, t_out, collision.reshape(B, T, 1)], 2)
    x = x.transpose(1, 0, 2)

    H = HIDDEN
    w_ih, w_hh = params['lstm_w_ih'], params['lstm_w_hh']
    b = params['lstm_b_ih'] + params['lstm_b_hh']

    def step(carry, xt):
        h, c = carry
        gates = xt @ w_ih.T + h @ w_hh.T + b
        i = jax.nn.sigmoid(gates[:, 0:H])
        f = jax.nn.sigmoid(gates[:, H:2 * H])
        g = jnp.tanh(gates[:, 2 * H:3 * H])
        o = jax.nn.sigmoid(gates[:, 3 * H:4 * H])
        c = f * c + i * g
        h = o * jnp.tanh(c)
        return (h, c), h

    h0 = jnp.zeros((B, H), jnp.float32)
    c0 = jnp.zeros((B, H), jnp.float32)
    _, hs = lax.scan(step, (h0, c0), x)
    lstm_out = hs.transpose(1, 0, 2).reshape(N, H)
    act = lstm_out @ params['fc_action_w'].T + params['fc_action_b']
    return act.reshape(B, T, N_ACTIONS)


# ============================ parameter init =================================
def init_params(key):
    ks = jax.random.split(key, 24)

    def nrm(k, shape, scale):
        return (scale * jax.random.normal(k, shape)).astype(jnp.float32)

    return {
        'map_conv_w': nrm(ks[0], (CONV_EMB, MAP_IN_EMB, 3, 3), 0.1),
        'map_conv_b': nrm(ks[1], (CONV_EMB,), 0.1),
        'map_bn_g': 1.0 + nrm(ks[2], (CONV_EMB,), 0.1),
        'map_bn_b': nrm(ks[3], (CONV_EMB,), 0.1),
        'map_bn_m': nrm(ks[4], (CONV_EMB,), 0.1),
        'map_bn_v': 1.0 + jnp.abs(nrm(ks[5], (CONV_EMB,), 0.1)),
        'p_conv_w': nrm(ks[6], (CONV_EMB, MAP_ORIENT, 3, 3), 0.1),
        'p_conv_b': nrm(ks[7], (CONV_EMB,), 0.1),
        'p_bn_g': 1.0 + nrm(ks[8], (CONV_EMB,), 0.1),
        'p_bn_b': nrm(ks[9], (CONV_EMB,), 0.1),
        'p_bn_m': nrm(ks[10], (CONV_EMB,), 0.1),
        'p_bn_v': 1.0 + jnp.abs(nrm(ks[11], (CONV_EMB,), 0.1)),
        'fc_map_w': nrm(ks[12], (FC_DIM, FEAT), 0.02),
        'fc_map_b': nrm(ks[13], (FC_DIM,), 0.02),
        'fc_p_w': nrm(ks[14], (FC_DIM, FEAT), 0.02),
        'fc_p_b': nrm(ks[15], (FC_DIM,), 0.02),
        'fc_t_w': nrm(ks[16], (FC_DIM, TVEC_DIM), 0.1),
        'fc_t_b': nrm(ks[17], (FC_DIM,), 0.1),
        'lstm_w_ih': nrm(ks[18], (4 * HIDDEN, HIDDEN), 0.05),
        'lstm_w_hh': nrm(ks[19], (4 * HIDDEN, HIDDEN), 0.05),
        'lstm_b_ih': nrm(ks[20], (4 * HIDDEN,), 0.05),
        'lstm_b_hh': nrm(ks[21], (4 * HIDDEN,), 0.05),
        'fc_action_w': nrm(ks[22], (N_ACTIONS, HIDDEN), 0.1),
        'fc_action_b': nrm(ks[23], (N_ACTIONS,), 0.1),
    }


# ================================= main ======================================
if __name__ == "__main__":
    key = jax.random.PRNGKey(0)
    kp, k1, k2, k3, k4 = jax.random.split(key, 5)
    params = init_params(kp)
    prep = prepare_params(params)          # one-time weight folding / padding

    B, T = 2, 2
    map_pred = jax.random.normal(k1, (B, T, MAP_IN_EMB, MAP_HW, MAP_HW), jnp.float32)
    p_pred = jax.random.normal(k2, (B, T, MAP_ORIENT, MAP_HW, MAP_HW), jnp.float32)
    t_vec = jax.random.normal(k3, (B, TVEC_DIM), jnp.float32)
    collision = jax.random.normal(k4, (B, T), jnp.float32)

    out = jax.jit(ilnet_forward)(prep, map_pred, p_pred, t_vec, collision)
    out = jax.block_until_ready(out)
    assert out.shape == (B, T, N_ACTIONS)

    ref = ref_forward(params, map_pred, p_pred, t_vec, collision)
    np.testing.assert_allclose(np.asarray(out), np.asarray(ref), rtol=2e-2, atol=2e-2)

    print("KERNEL_OK")
</pallas_src>

<mosaic_0001>
module attributes {stable_mosaic.version = 11 : i64} {
  func.func @_conv_pool_kernel(%arg0: i32, %arg1: memref<4x72x768xbf16, #tpu.memory_space<vmem>>, %arg2: memref<16x72xbf16, #tpu.memory_space<vmem>>, %arg3: memref<16x1xf32, #tpu.memory_space<vmem>>, %arg4: memref<16x768xf32, #tpu.memory_space<vmem>>) attributes {dimension_semantics = [#tpu.dimension_semantics<parallel>], iteration_bounds = array<i64: 1>, scalar_prefetch = 0 : i64, scratch_operands = 0 : i64, tpu.core_type = #tpu.core_type<tc>, window_params = [{transform_indices = @transform_0, window_bounds = array<i64: 4, 72, 768>}, {pipeline_mode = #tpu.pipeline_mode<synchronous>, transform_indices = @transform_1, window_bounds = array<i64: 16, 72>}, {pipeline_mode = #tpu.pipeline_mode<synchronous>, transform_indices = @transform_2, window_bounds = array<i64: 16, 1>}, {transform_indices = @transform_3, window_bounds = array<i64: 16, 768>}]} {
    %c0 = arith.constant 0 : index
    %c0_0 = arith.constant 0 : index
    %0 = vector.load %arg2[%c0, %c0_0] : memref<16x72xbf16, #tpu.memory_space<vmem>>, vector<16x72xbf16>
    %c0_1 = arith.constant 0 : index
    %c0_2 = arith.constant 0 : index
    %c0_3 = arith.constant 0 : index
    %1 = vector.load %arg1[%c0_1, %c0_2, %c0_3] : memref<4x72x768xbf16, #tpu.memory_space<vmem>>, vector<1x72x768xbf16>
    %2 = vector.shape_cast %1 : vector<1x72x768xbf16> to vector<72x768xbf16>
    %cst = arith.constant dense<0.000000e+00> : vector<16x768xf32>
    %3 = tpu.matmul %0, %2, %cst {dimension_numbers = #tpu.dot_dimension_numbers<[1], [0], [0], [1], [0, 0, 1, 1], [], []>} : vector<16x72xbf16>, vector<72x768xbf16>, vector<16x768xf32> -> vector<16x768xf32>
    %c1 = arith.constant 1 : index
    %c0_4 = arith.constant 0 : index
    %c0_5 = arith.constant 0 : index
    %4 = vector.load %arg1[%c1, %c0_4, %c0_5] : memref<4x72x768xbf16, #tpu.memory_space<vmem>>, vector<1x72x768xbf16>
    %5 = vector.shape_cast %4 : vector<1x72x768xbf16> to vector<72x768xbf16>
    %cst_6 = arith.constant dense<0.000000e+00> : vector<16x768xf32>
    %6 = tpu.matmul %0, %5, %cst_6 {dimension_numbers = #tpu.dot_dimension_numbers<[1], [0], [0], [1], [0, 0, 1, 1], [], []>} : vector<16x72xbf16>, vector<72x768xbf16>, vector<16x768xf32> -> vector<16x768xf32>
    %7 = arith.maximumf %3, %6 : vector<16x768xf32>
    %c2 = arith.constant 2 : index
    %c0_7 = arith.constant 0 : index
    %c0_8 = arith.constant 0 : index
    %8 = vector.load %arg1[%c2, %c0_7, %c0_8] : memref<4x72x768xbf16, #tpu.memory_space<vmem>>, vector<1x72x768xbf16>
    %9 = vector.shape_cast %8 : vector<1x72x768xbf16> to vector<72x768xbf16>
    %cst_9 = arith.constant dense<0.000000e+00> : vector<16x768xf32>
    %10 = tpu.matmul %0, %9, %cst_9 {dimension_numbers = #tpu.dot_dimension_numbers<[1], [0], [0], [1], [0, 0, 1, 1], [], []>} : vector<16x72xbf16>, vector<72x768xbf16>, vector<16x768xf32> -> vector<16x768xf32>
    %11 = arith.maximumf %7, %10 : vector<16x768xf32>
    %c3 = arith.constant 3 : index
    %c0_10 = arith.constant 0 : index
    %c0_11 = arith.constant 0 : index
    %12 = vector.load %arg1[%c3, %c0_10, %c0_11] : memref<4x72x768xbf16, #tpu.memory_space<vmem>>, vector<1x72x768xbf16>
    %13 = vector.shape_cast %12 : vector<1x72x768xbf16> to vector<72x768xbf16>
    %cst_12 = arith.constant dense<0.000000e+00> : vector<16x768xf32>
    %14 = tpu.matmul %0, %13, %cst_12 {dimension_numbers = #tpu.dot_dimension_numbers<[1], [0], [0], [1], [0, 0, 1, 1], [], []>} : vector<16x72xbf16>, vector<72x768xbf16>, vector<16x768xf32> -> vector<16x768xf32>
    %15 = arith.maximumf %11, %14 : vector<16x768xf32>
    %c0_13 = arith.constant 0 : index
    %c0_14 = arith.constant 0 : index
    %16 = vector.load %arg3[%c0_13, %c0_14] : memref<16x1xf32, #tpu.memory_space<vmem>>, vector<16x1xf32>
    %17 = vector.broadcast %16 : vector<16x1xf32> to vector<16x768xf32>
    %18 = arith.addf %15, %17 : vector<16x768xf32>
    %cst_15 = arith.constant 0.000000e+00 : f32
    %19 = vector.broadcast %cst_15 : f32 to vector<16x768xf32>
    %20 = arith.maximumf %18, %19 : vector<16x768xf32>
    %c0_16 = arith.constant 0 : index
    %c0_17 = arith.constant 0 : index
    %21 = vector.load %arg4[%c0_16, %c0_17] : memref<16x768xf32, #tpu.memory_space<vmem>>, vector<16x768xf32>
    tpu.vector_store %arg4[%c0_16, %c0_17], %20 {strides = array<i32>} : memref<16x768xf32, #tpu.memory_space<vmem>>, vector<16x768xf32>,
    return
  }
  func.func @transform_0(%arg0: i32) -> (i32, i32, i32) {
    %c0_i32 = arith.constant 0 : i32
    %c0_i32_0 = arith.constant 0 : i32
    %c0_i32_1 = arith.constant 0 : i32
    return %c0_i32, %c0_i32_0, %arg0 : i32, i32, i32
  }
  func.func @transform_1(%arg0: i32) -> (i32, i32) {
    %c0_i32 = arith.constant 0 : i32
    %c0_i32_0 = arith.constant 0 : i32
    %c0_i32_1 = arith.constant 0 : i32
    return %c0_i32, %c0_i32_0 : i32, i32
  }
  func.func @transform_2(%arg0: i32) -> (i32, i32) {
    %c0_i32 = arith.constant 0 : i32
    %c0_i32_0 = arith.constant 0 : i32
    %c0_i32_1 = arith.constant 0 : i32
    return %c0_i32, %c0_i32_0 : i32, i32
  }
  func.func @transform_3(%arg0: i32) -> (i32, i32) {
    %c0_i32 = arith.constant 0 : i32
    %c0_i32_0 = arith.constant 0 : i32
    return %c0_i32, %arg0 : i32, i32
  }
}

module attributes {stable_mosaic.version = 11 : i64} {
  func.func @_feature_kernel(%arg0: i32, %arg1: memref<8x2712xf32, #tpu.memory_space<vmem>>, %arg2: memref<8x1xf32, #tpu.memory_space<vmem>>, %arg3: memref<2712x128xf32, #tpu.memory_space<vmem>>, %arg4: memref<1x128xf32, #tpu.memory_space<vmem>>, %arg5: memref<128x512xf32, #tpu.memory_space<vmem>>, %arg6: memref<1x512xf32, #tpu.memory_space<vmem>>, %arg7: memref<8x512xf32, #tpu.memory_space<vmem>>) attributes {dimension_semantics = [#tpu.dimension_semantics<parallel>], iteration_bounds = array<i64: 1>, scalar_prefetch = 0 : i64, scratch_operands = 0 : i64, tpu.core_type = #tpu.core_type<tc>, window_params = [{transform_indices = @transform_0, window_bounds = array<i64: 8, 2712>}, {transform_indices = @transform_1, window_bounds = array<i64: 8, 1>}, {pipeline_mode = #tpu.pipeline_mode<synchronous>, transform_indices = @transform_2, window_bounds = array<i64: 2712, 128>}, {pipeline_mode = #tpu.pipeline_mode<synchronous>, transform_indices = @transform_3, window_bounds = array<i64: 1, 128>}, {pipeline_mode = #tpu.pipeline_mode<synchronous>, transform_indices = @transform_4, window_bounds = array<i64: 128, 512>}, {pipeline_mode = #tpu.pipeline_mode<synchronous>, transform_indices = @transform_5, window_bounds = array<i64: 1, 512>}, {transform_indices = @transform_6, window_bounds = array<i64: 8, 512>}]} {
    %c0 = arith.constant 0 : index
    %c0_0 = arith.constant 0 : index
    %0 = vector.load %arg1[%c0, %c0_0] : memref<8x2712xf32, #tpu.memory_space<vmem>>, vector<8x2712xf32>
    %c0_1 = arith.constant 0 : index
    %c0_2 = arith.constant 0 : index
    %1 = vector.load %arg3[%c0_1, %c0_2] : memref<2712x128xf32, #tpu.memory_space<vmem>>, vector<2712x128xf32>
    %cst = arith.constant dense<0.000000e+00> : vector<8x128xf32>
    %2 = tpu.matmul %0, %1, %cst {dimension_numbers = #tpu.dot_dimension_numbers<[1], [0], [0], [1], [0, 0, 1, 1], [], []>} : vector<8x2712xf32>, vector<2712x128xf32>, vector<8x128xf32> -> vector<8x128xf32>
    %c0_3 = arith.constant 0 : index
    %c0_4 = arith.constant 0 : index
    %3 = vector.load %arg4[%c0_3, %c0_4] : memref<1x128xf32, #tpu.memory_space<vmem>>, vector<1x128xf32>
    %4 = vector.broadcast %3 : vector<1x128xf32> to vector<8x128xf32>
    %5 = arith.addf %2, %4 : vector<8x128xf32>
    %cst_5 = arith.constant 0.000000e+00 : f32
    %6 = vector.broadcast %cst_5 : f32 to vector<8x128xf32>
    %7 = arith.maximumf %5, %6 : vector<8x128xf32>
    %8 = tpu.iota {dimensions = array<i32: 1>} : vector<8x128xi32>
    %c96_i32 = arith.constant 96 : i32
    %9 = vector.broadcast %c96_i32 : i32 to vector<8x128xi32>
    %10 = arith.cmpi eq, %8, %9 : vector<8x128xi32>
    %c0_6 = arith.constant 0 : index
    %c0_7 = arith.constant 0 : index
    %11 = vector.load %arg2[%c0_6, %c0_7] : memref<8x1xf32, #tpu.memory_space<vmem>>, vector<8x1xf32>
    %12 = vector.shape_cast %11 : vector<8x1xf32> to vector<8x1xf32>
    %13 = vector.broadcast %12 : vector<8x1xf32> to vector<8x128xf32>
    %14 = arith.select %10, %13, %7 : vector<8x128xi1>, vector<8x128xf32>
    %c0_8 = arith.constant 0 : index
    %c0_9 = arith.constant 0 : index
    %15 = vector.load %arg5[%c0_8, %c0_9] : memref<128x512xf32, #tpu.memory_space<vmem>>, vector<128x512xf32>
    %cst_10 = arith.constant dense<0.000000e+00> : vector<8x512xf32>
    %16 = tpu.matmul %14, %15, %cst_10 {dimension_numbers = #tpu.dot_dimension_numbers<[1], [0], [0], [1], [0, 0, 1, 1], [], []>} : vector<8x128xf32>, vector<128x512xf32>, vector<8x512xf32> -> vector<8x512xf32>
    %c0_11 = arith.constant 0 : index
    %c0_12 = arith.constant 0 : index
    %17 = vector.load %arg6[%c0_11, %c0_12] : memref<1x512xf32, #tpu.memory_space<vmem>>, vector<1x512xf32>
    %18 = vector.broadcast %17 : vector<1x512xf32> to vector<8x512xf32>
    %19 = arith.addf %16, %18 : vector<8x512xf32>
    %c0_13 = arith.constant 0 : index
    %c0_14 = arith.constant 0 : index
    %20 = vector.load %arg7[%c0_13, %c0_14] : memref<8x512xf32, #tpu.memory_space<vmem>>, vector<8x512xf32>
    tpu.vector_store %arg7[%c0_13, %c0_14], %19 {strides = array<i32>} : memref<8x512xf32, #tpu.memory_space<vmem>>, vector<8x512xf32>,
    return
  }
  func.func @transform_0(%arg0: i32) -> (i32, i32) {
    %c0_i32 = arith.constant 0 : i32
    %c0_i32_0 = arith.constant 0 : i32
    return %arg0, %c0_i32 : i32, i32
  }
  func.func @transform_1(%arg0: i32) -> (i32, i32) {
    %c0_i32 = arith.constant 0 : i32
    %c0_i32_0 = arith.constant 0 : i32
    return %arg0, %c0_i32 : i32, i32
  }
  func.func @transform_2(%arg0: i32) -> (i32, i32) {
    %c0_i32 = arith.constant 0 : i32
    %c0_i32_0 = arith.constant 0 : i32
    %c0_i32_1 = arith.constant 0 : i32
    return %c0_i32, %c0_i32_0 : i32, i32
  }
  func.func @transform_3(%arg0: i32) -> (i32, i32) {
    %c0_i32 = arith.constant 0 : i32
    %c0_i32_0 = arith.constant 0 : i32
    %c0_i32_1 = arith.constant 0 : i32
    return %c0_i32, %c0_i32_0 : i32, i32
  }
  func.func @transform_4(%arg0: i32) -> (i32, i32) {
    %c0_i32 = arith.constant 0 : i32
    %c0_i32_0 = arith.constant 0 : i32
    %c0_i32_1 = arith.constant 0 : i32
    return %c0_i32, %c0_i32_0 : i32, i32
  }
  func.func @transform_5(%arg0: i32) -> (i32, i32) {
    %c0_i32 = arith.constant 0 : i32
    %c0_i32_0 = arith.constant 0 : i32
    %c0_i32_1 = arith.constant 0 : i32
    return %c0_i32, %c0_i32_0 : i32, i32
  }
  func.func @transform_6(%arg0: i32) -> (i32, i32) {
    %c0_i32 = arith.constant 0 : i32
    %c0_i32_0 = arith.constant 0 : i32
    return %arg0, %c0_i32 : i32, i32
  }
}

module attributes {stable_mosaic.version = 11 : i64} {
  func.func @_lstm_kernel(%arg0: i32, %arg1: memref<2x2x512xf32, #tpu.memory_space<vmem>>, %arg2: memref<128x512xf32, #tpu.memory_space<vmem>>, %arg3: memref<2x2x128xf32, #tpu.memory_space<vmem>>) attributes {dimension_semantics = [#tpu.dimension_semantics<arbitrary>], iteration_bounds = array<i64: 1>, scalar_prefetch = 0 : i64, scratch_operands = 0 : i64, tpu.core_type = #tpu.core_type<tc>, window_params = [{pipeline_mode = #tpu.pipeline_mode<synchronous>, transform_indices = @transform_0, window_bounds = array<i64: 2, 2, 512>}, {pipeline_mode = #tpu.pipeline_mode<synchronous>, transform_indices = @transform_1, window_bounds = array<i64: 128, 512>}, {pipeline_mode = #tpu.pipeline_mode<synchronous>, transform_indices = @transform_2, window_bounds = array<i64: 2, 2, 128>}]} {
    %c0 = arith.constant 0 : index
    %c0_0 = arith.constant 0 : index
    %0 = vector.load %arg2[%c0, %c0_0] : memref<128x512xf32, #tpu.memory_space<vmem>>, vector<128x512xf32>
    %cst = arith.constant 0.000000e+00 : f32
    %1 = vector.broadcast %cst : f32 to vector<2x128xf32>
    %c0_i32 = arith.constant 0 : i32
    %c2_i32 = arith.constant 2 : i32
    %2 = arith.addi %c0_i32, %c2_i32 : i32
    %c1_i32 = arith.constant 1 : i32
    %3:2 = scf.for %arg4 = %c0_i32 to %2 step %c1_i32 iter_args(%arg5 = %1, %arg6 = %1) -> (vector<2x128xf32>, vector<2x128xf32>)  : i32 {
      %4 = arith.index_cast %arg4 : i32 to index
      %c0_2 = arith.constant 0 : index
      %c0_3 = arith.constant 0 : index
      %5 = vector.load %arg1[%4, %c0_2, %c0_3] : memref<2x2x512xf32, #tpu.memory_space<vmem>>, vector<1x2x512xf32>
      %6 = vector.shape_cast %5 : vector<1x2x512xf32> to vector<2x512xf32>
      %cst_4 = arith.constant dense<0.000000e+00> : vector<2x512xf32>
      %7 = tpu.matmul %arg5, %0, %cst_4 {dimension_numbers = #tpu.dot_dimension_numbers<[1], [0], [0], [1], [0, 0, 1, 1], [], []>} : vector<2x128xf32>, vector<128x512xf32>, vector<2x512xf32> -> vector<2x512xf32>
      %8 = arith.addf %6, %7 : vector<2x512xf32>
      %9 = vector.extract_strided_slice %8 {offsets = [0, 0], sizes = [2, 128], strides = [1, 1]} : vector<2x512xf32> to vector<2x128xf32>
      %cst_5 = arith.constant 5.000000e-01 : f32
      %10 = vector.broadcast %cst_5 : f32 to vector<2x128xf32>
      %11 = arith.mulf %10, %9 : vector<2x128xf32>
      %12 = math.tanh %11 : vector<2x128xf32>
      %cst_6 = arith.constant 1.000000e+00 : f32
      %13 = vector.broadcast %cst_6 : f32 to vector<2x128xf32>
      %14 = arith.addf %12, %13 : vector<2x128xf32>
      %cst_7 = arith.constant 5.000000e-01 : f32
      %15 = vector.broadcast %cst_7 : f32 to vector<2x128xf32>
      %16 = arith.mulf %15, %14 : vector<2x128xf32>
      %17 = vector.extract_strided_slice %8 {offsets = [0, 128], sizes = [2, 128], strides = [1, 1]} : vector<2x512xf32> to vector<2x128xf32>
      %cst_8 = arith.constant 5.000000e-01 : f32
      %18 = vector.broadcast %cst_8 : f32 to vector<2x128xf32>
      %19 = arith.mulf %18, %17 : vector<2x128xf32>
      %20 = math.tanh %19 : vector<2x128xf32>
      %cst_9 = arith.constant 1.000000e+00 : f32
      %21 = vector.broadcast %cst_9 : f32 to vector<2x128xf32>
      %22 = arith.addf %20, %21 : vector<2x128xf32>
      %cst_10 = arith.constant 5.000000e-01 : f32
      %23 = vector.broadcast %cst_10 : f32 to vector<2x128xf32>
      %24 = arith.mulf %23, %22 : vector<2x128xf32>
      %25 = vector.extract_strided_slice %8 {offsets = [0, 256], sizes = [2, 128], strides = [1, 1]} : vector<2x512xf32> to vector<2x128xf32>
      %26 = math.tanh %25 : vector<2x128xf32>
      %27 = vector.extract_strided_slice %8 {offsets = [0, 384], sizes = [2, 128], strides = [1, 1]} : vector<2x512xf32> to vector<2x128xf32>
      %cst_11 = arith.constant 5.000000e-01 : f32
      %28 = vector.broadcast %cst_11 : f32 to vector<2x128xf32>
      %29 = arith.mulf %28, %27 : vector<2x128xf32>
      %30 = math.tanh %29 : vector<2x128xf32>
      %cst_12 = arith.constant 1.000000e+00 : f32
      %31 = vector.broadcast %cst_12 : f32 to vector<2x128xf32>
      %32 = arith.addf %30, %31 : vector<2x128xf32>
      %cst_13 = arith.constant 5.000000e-01 : f32
      %33 = vector.broadcast %cst_13 : f32 to vector<2x128xf32>
      %34 = arith.mulf %33, %32 : vector<2x128xf32>
      %35 = arith.mulf %24, %arg6 : vector<2x128xf32>
      %36 = arith.mulf %16, %26 : vector<2x128xf32>
      %37 = arith.addf %35, %36 : vector<2x128xf32>
      %38 = math.tanh %37 : vector<2x128xf32>
      %39 = arith.mulf %34, %38 : vector<2x128xf32>
      %40 = arith.index_cast %arg4 : i32 to index
      %c0_14 = arith.constant 0 : index
      %c0_15 = arith.constant 0 : index
      %41 = vector.load %arg3[%40, %c0_14, %c0_15] : memref<2x2x128xf32, #tpu.memory_space<vmem>>, vector<1x2x128xf32>
      %42 = vector.shape_cast %41 : vector<1x2x128xf32> to vector<2x128xf32>
      %43 = vector.shape_cast %39 : vector<2x128xf32> to vector<1x2x128xf32>
      tpu.vector_store %arg3[%40, %c0_14, %c0_15], %43 {strides = array<i32>} : memref<2x2x128xf32, #tpu.memory_space<vmem>>, vector<1x2x128xf32>,
      scf.yield %39, %37 : vector<2x128xf32>, vector<2x128xf32>
    }
    %c2_i32_1 = arith.constant 2 : i32
    return
  }
  func.func @transform_0(%arg0: i32) -> (i32, i32, i32) {
    %c0_i32 = arith.constant 0 : i32
    %c0_i32_0 = arith.constant 0 : i32
    %c0_i32_1 = arith.constant 0 : i32
    %c0_i32_2 = arith.constant 0 : i32
    return %c0_i32, %c0_i32_0, %c0_i32_1 : i32, i32, i32
  }
  func.func @transform_1(%arg0: i32) -> (i32, i32) {
    %c0_i32 = arith.constant 0 : i32
    %c0_i32_0 = arith.constant 0 : i32
    %c0_i32_1 = arith.constant 0 : i32
    return %c0_i32, %c0_i32_0 : i32, i32
  }
  func.func @transform_2(%arg0: i32) -> (i32, i32, i32) {
    %c0_i32 = arith.constant 0 : i32
    %c0_i32_0 = arith.constant 0 : i32
    %c0_i32_1 = arith.constant 0 : i32
    %c0_i32_2 = arith.constant 0 : i32
    return %c0_i32, %c0_i32_0, %c0_i32_1 : i32, i32, i32
  }
}

</mosaic_0001>

<bundles_post_ra>
// kernel: ilnet_forward.5
= control target key start
LH: loop header
LB: loop body
LE: loop exit
PB: predicated region body
PF: predicated region fallthrough
CT: control target
= control target key end

     0   :  { %s630_s25 = smov 0   ;;  %s725_s0 = inlined_call_operand.vmem [shape: f32[2,2,512], index: 0, kind: input, shape index: {}]   ;;  %s726_s1 = inlined_call_operand.vmem [shape: f32[128,512], index: 1, kind: input, shape index: {}]   ;;  %s727_s2 = inlined_call_operand.vmem [shape: f32[2,2,128], index: 2, kind: output, shape index: {}]  }
   0x1   :  { %v309_v0 = vld [vmem:[%s726_s1] sm:$0xff]  ;;  %v314_v1 = vld [vmem:[%s726_s1 + $0x8] sm:$0xff]  ;;  %v319_v2 = vld [vmem:[%s726_s1 + $0x10] sm:$0xff] }
   0x2   :  { %728 = vst [vmem:[#allocation2_spill] sm:$0xff] %v309_v0  ;;  %v324_v3 = vld [vmem:[%s726_s1 + $0x18] sm:$0xff]  ;;  %v329_v4 = vld [vmem:[%s726_s1 + $0x20] sm:$0xff]  ;;  %v334_v5 = vld [vmem:[%s726_s1 + $0x28] sm:$0xff]  ;;  %v626_v0 = vmov 0.0  }
   0x3   :  { %729 = vst [vmem:[#allocation3_spill] sm:$0xff] %v314_v1  ;;  %v339_v6 = vld [vmem:[%s726_s1 + $0x30] sm:$0xff]  ;;  %v344_v7 = vld [vmem:[%s726_s1 + $0x38] sm:$0xff]  ;;  %v349_v8 = vld [vmem:[%s726_s1 + $0x40] sm:$0xff]  ;;  %v628_v1 = vmov 0.0  }
   0x4   :  { %730 = vst [vmem:[#allocation4_spill] sm:$0xff] %v319_v2  ;;  %v354_v9 = vld [vmem:[%s726_s1 + $0x48] sm:$0xff]  ;;  %v359_v10 = vld [vmem:[%s726_s1 + $0x50] sm:$0xff]  ;;  %v364_v11 = vld [vmem:[%s726_s1 + $0x58] sm:$0xff] }
   0x5   :  { %731 = vst [vmem:[#allocation5_spill] sm:$0xff] %v324_v3  ;;  %v369_v12 = vld [vmem:[%s726_s1 + $0x60] sm:$0xff]  ;;  %v374_v13 = vld [vmem:[%s726_s1 + $0x68] sm:$0xff]  ;;  %v379_v14 = vld [vmem:[%s726_s1 + $0x70] sm:$0xff] }
   0x6   :  { %732 = vst [vmem:[#allocation6_spill] sm:$0xff] %v329_v4  ;;  %v384_v15 = vld [vmem:[%s726_s1 + $0x78] sm:$0xff]  ;;  %v389_v16 = vld [vmem:[%s726_s1 + $0x80] sm:$0xff]  ;;  %v394_v17 = vld [vmem:[%s726_s1 + $0x88] sm:$0xff] }
   0x7   :  { %733 = vst [vmem:[#allocation7_spill] sm:$0xff] %v334_v5  ;;  %v399_v18 = vld [vmem:[%s726_s1 + $0x90] sm:$0xff]  ;;  %v404_v19 = vld [vmem:[%s726_s1 + $0x98] sm:$0xff]  ;;  %v409_v20 = vld [vmem:[%s726_s1 + $0xa0] sm:$0xff] }
   0x8   :  { %734 = vst [vmem:[#allocation8_spill] sm:$0xff] %v339_v6  ;;  %v414_v21 = vld [vmem:[%s726_s1 + $0xa8] sm:$0xff]  ;;  %v419_v22 = vld [vmem:[%s726_s1 + $0xb0] sm:$0xff]  ;;  %v424_v23 = vld [vmem:[%s726_s1 + $0xb8] sm:$0xff] }
   0x9   :  { %735 = vst [vmem:[#allocation9_spill] sm:$0xff] %v344_v7  ;;  %v429_v24 = vld [vmem:[%s726_s1 + $0xc0] sm:$0xff]  ;;  %v434_v25 = vld [vmem:[%s726_s1 + $0xc8] sm:$0xff]  ;;  %v439_v26 = vld [vmem:[%s726_s1 + $0xd0] sm:$0xff] }
   0xa   :  { %736 = vst [vmem:[#allocation10_spill] sm:$0xff] %v349_v8  ;;  %v444_v27 = vld [vmem:[%s726_s1 + $0xd8] sm:$0xff]  ;;  %v449_v28 = vld [vmem:[%s726_s1 + $0xe0] sm:$0xff]  ;;  %v454_v29 = vld [vmem:[%s726_s1 + $0xe8] sm:$0xff] }
   0xb   :  { %737 = vst [vmem:[#allocation11_spill] sm:$0xff] %v354_v9  ;;  %v459_v30 = vld [vmem:[%s726_s1 + $0xf0] sm:$0xff]  ;;  %v464_v31 = vld [vmem:[%s726_s1 + $0xf8] sm:$0xff]  ;;  %v469_v32 = vld [vmem:[%s726_s1 + $0x100] sm:$0xff] }
   0xc   :  { %738 = vst [vmem:[#allocation12_spill] sm:$0xff] %v359_v10  ;;  %v474_v33 = vld [vmem:[%s726_s1 + $0x108] sm:$0xff]  ;;  %v479_v34 = vld [vmem:[%s726_s1 + $0x110] sm:$0xff]  ;;  %v484_v35 = vld [vmem:[%s726_s1 + $0x118] sm:$0xff] }
   0xd   :  { %739 = vst [vmem:[#allocation13_spill] sm:$0xff] %v364_v11  ;;  %v489_v36 = vld [vmem:[%s726_s1 + $0x120] sm:$0xff]  ;;  %v494_v37 = vld [vmem:[%s726_s1 + $0x128] sm:$0xff]  ;;  %v499_v38 = vld [vmem:[%s726_s1 + $0x130] sm:$0xff] }
   0xe   :  { %740 = vst [vmem:[#allocation14_spill] sm:$0xff] %v369_v12  ;;  %v504_v39 = vld [vmem:[%s726_s1 + $0x138] sm:$0xff]  ;;  %v509_v40 = vld [vmem:[%s726_s1 + $0x140] sm:$0xff]  ;;  %v514_v41 = vld [vmem:[%s726_s1 + $0x148] sm:$0xff] }
   0xf   :  { %741 = vst [vmem:[#allocation15_spill] sm:$0xff] %v374_v13  ;;  %v519_v42 = vld [vmem:[%s726_s1 + $0x150] sm:$0xff]  ;;  %v524_v43 = vld [vmem:[%s726_s1 + $0x158] sm:$0xff]  ;;  %v529_v44 = vld [vmem:[%s726_s1 + $0x160] sm:$0xff] }
  0x10   :  { %742 = vst [vmem:[#allocation16_spill] sm:$0xff] %v379_v14  ;;  %v534_v45 = vld [vmem:[%s726_s1 + $0x168] sm:$0xff]  ;;  %v539_v46 = vld [vmem:[%s726_s1 + $0x170] sm:$0xff]  ;;  %v544_v47 = vld [vmem:[%s726_s1 + $0x178] sm:$0xff] }
  0x11   :  { %743 = vst [vmem:[#allocation17_spill] sm:$0xff] %v384_v15  ;;  %v549_v48 = vld [vmem:[%s726_s1 + $0x180] sm:$0xff]  ;;  %v554_v49 = vld [vmem:[%s726_s1 + $0x188] sm:$0xff]  ;;  %v559_v50 = vld [vmem:[%s726_s1 + $0x190] sm:$0xff] }
  0x12   :  { %744 = vst [vmem:[#allocation18_spill] sm:$0xff] %v389_v16  ;;  %v564_v51 = vld [vmem:[%s726_s1 + $0x198] sm:$0xff]  ;;  %v569_v52 = vld [vmem:[%s726_s1 + $0x1a0] sm:$0xff]  ;;  %v574_v53 = vld [vmem:[%s726_s1 + $0x1a8] sm:$0xff] }
  0x13   :  { %745 = vst [vmem:[#allocation19_spill] sm:$0xff] %v394_v17  ;;  %v579_v54 = vld [vmem:[%s726_s1 + $0x1b0] sm:$0xff]  ;;  %v584_v55 = vld [vmem:[%s726_s1 + $0x1b8] sm:$0xff]  ;;  %v589_v56 = vld [vmem:[%s726_s1 + $0x1c0] sm:$0xff] }
  0x14   :  { %746 = vst [vmem:[#allocation20_spill] sm:$0xff] %v399_v18  ;;  %v594_v57 = vld [vmem:[%s726_s1 + $0x1c8] sm:$0xff]  ;;  %v599_v58 = vld [vmem:[%s726_s1 + $0x1d0] sm:$0xff]  ;;  %v604_v59 = vld [vmem:[%s726_s1 + $0x1d8] sm:$0xff] }
  0x15   :  { %747 = vst [vmem:[#allocation21_spill] sm:$0xff] %v404_v19  ;;  %v609_v60 = vld [vmem:[%s726_s1 + $0x1e0] sm:$0xff]  ;;  %v614_v61 = vld [vmem:[%s726_s1 + $0x1e8] sm:$0xff]  ;;  %v619_v62 = vld [vmem:[%s726_s1 + $0x1f0] sm:$0xff] }
  0x16   :  { %v624_v63 = vld [vmem:[%s726_s1 + $0x1f8] sm:$0xff] }
  0x17 LB: > { %127 = vmatpush.msra.mxu2 %v619_v62  ;;  %147 = vmatpush.msra.mxu3 %v624_v63  ;;  %v752_v14 = vld [vmem:[#allocation16_spill] sm:$0xff]  ;;  %v754_v13 = vld [vmem:[#allocation15_spill] sm:$0xff]  ;;  %v755_v12 = vld [vmem:[#allocation14_spill] sm:$0xff]  ;;  %s232_s1 = sshll.u32 %s289_s25, 3  ;;  %vm174_vm0 = vcmask 1041408   ;;  %vm176_vm1 = vcmask 1045508   ;;  %s289_s25 = sphi %s630_s25, %s80_s25   ;;  %v285_v1 = vphi %v628_v1, %v206_v1   ;;  %v281_v0 = vphi %v626_v0, %v204_v0  }
  0x18   : > { %107 = vmatpush.msra.mxu1 %v614_v61  ;;  %87 = vmatpush.msra.mxu0 %v609_v60  ;;  %v753_v15 = vld [vmem:[#allocation17_spill] sm:$0xff]  ;;  %v756_v10 = vld [vmem:[#allocation12_spill] sm:$0xff]  ;;  %v758_v9 = vld [vmem:[#allocation11_spill] sm:$0xff]  ;;  %s85_s28 = scalar_lea.vmem %s725_s0, %s232_s1  ;;  %vm178_vm2 = vcmask 1043456   ;;  %s231_s29 = sshll.u32 %s289_s25, 1 }
  0x19   : > { %128 = vmatpush.msra.mxu2 %v599_v58  ;;  %148 = vmatpush.msra.mxu3 %v604_v59  ;;  %v751_v16 = vld [vmem:[#allocation18_spill] sm:$0xff]  ;;  %v757_v11 = vld [vmem:[#allocation13_spill] sm:$0xff]  ;;  %v760_v6 = vld [vmem:[#allocation8_spill] sm:$0xff]  ;;  %s208_s4 = scalar_lea.vmem %s727_s2, %s231_s29  ;;  %s80_s25 = sadd.s32 1, %s289_s25  }
  0x1a   : > { %108 = vmatpush.msra.mxu1 %v594_v57  ;;  %88 = vmatpush.msra.mxu0 %v589_v56  ;;  %v750_v17 = vld [vmem:[#allocation19_spill] sm:$0xff]  ;;  %v759_v8 = vld [vmem:[#allocation10_spill] sm:$0xff]  ;;  %v761_v7 = vld [vmem:[#allocation9_spill] sm:$0xff]  ;;  %p77_p0 = scmp.ge.s32.totalorder %s80_s25, 2  }
  0x1b   : > { %129 = vmatpush.msra.mxu2 %v579_v54  ;;  %149 = vmatpush.msra.mxu3 %v584_v55  ;;  %v748_v18 = vld [vmem:[#allocation20_spill] sm:$0xff]  ;;  %v762_v5 = vld [vmem:[#allocation7_spill] sm:$0xff]  ;;  %v763_v4 = vld [vmem:[#allocation6_spill] sm:$0xff] }
  0x1c   : > { %109 = vmatpush.msra.mxu1 %v574_v53  ;;  %89 = vmatpush.msra.mxu0 %v569_v52  ;;  %v749_v19 = vld [vmem:[#allocation21_spill] sm:$0xff]  ;;  %v764_v2 = vld [vmem:[#allocation4_spill] sm:$0xff] }
  0x1d   : > { %130 = vmatpush.msra.mxu2 %v559_v50  ;;  %150 = vmatpush.msra.mxu3 %v564_v51  ;;  %v765_v3 = vld [vmem:[#allocation5_spill] sm:$0xff] }
  0x1e   : > { %110 = vmatpush.msra.mxu1 %v554_v49  ;;  %90 = vmatpush.msra.mxu0 %v549_v48 }
  0x1f   : > { %131 = vmatpush.msra.mxu2 %v539_v46  ;;  %151 = vmatpush.msra.mxu3 %v544_v47 }
  0x20   : > { %111 = vmatpush.msra.mxu1 %v534_v45  ;;  %91 = vmatpush.msra.mxu0 %v529_v44 }
  0x21   : > { %132 = vmatpush.msra.mxu2 %v519_v42  ;;  %152 = vmatpush.msra.mxu3 %v524_v43 }
  0x22   : > { %112 = vmatpush.msra.mxu1 %v514_v41  ;;  %92 = vmatpush.msra.mxu0 %v509_v40 }
  0x23   : > { %133 = vmatpush.msra.mxu2 %v499_v38  ;;  %153 = vmatpush.msra.mxu3 %v504_v39 }
  0x24   : > { %113 = vmatpush.msra.mxu1 %v494_v37  ;;  %93 = vmatpush.msra.mxu0 %v489_v36 }
  0x25   : > { %134 = vmatpush.msra.mxu2 %v479_v34  ;;  %154 = vmatpush.msra.mxu3 %v484_v35 }
  0x26   : > { %114 = vmatpush.msra.mxu1 %v474_v33  ;;  %94 = vmatpush.msra.mxu0 %v469_v32 }
  0x27   : > { %135 = vmatpush.msra.mxu2 %v459_v30  ;;  %155 = vmatpush.msra.mxu3 %v464_v31 }
  0x28   : > { %115 = vmatpush.msra.mxu1 %v454_v29  ;;  %95 = vmatpush.msra.mxu0 %v449_v28 }
  0x29   : > { %136 = vmatpush.msra.mxu2 %v439_v26  ;;  %156 = vmatpush.msra.mxu3 %v444_v27 }
  0x2a   : > { %116 = vmatpush.msra.mxu1 %v434_v25  ;;  %96 = vmatpush.msra.mxu0 %v429_v24 }
  0x2b   : > { %137 = vmatpush.msra.mxu2 %v419_v22  ;;  %157 = vmatpush.msra.mxu3 %v424_v23 }
  0x2c   : > { %117 = vmatpush.msra.mxu1 %v414_v21  ;;  %97 = vmatpush.msra.mxu0 %v409_v20 }
  0x2d   : > { %138 = vmatpush.msra.mxu2 %v748_v18  ;;  %158 = vmatpush.msra.mxu3 %v749_v19 }
  0x2e   : > { %118 = vmatpush.msra.mxu1 %v750_v17  ;;  %98 = vmatpush.msra.mxu0 %v751_v16 }
  0x2f   : > { %139 = vmatpush.msra.mxu2 %v752_v14  ;;  %159 = vmatpush.msra.mxu3 %v753_v15 }
  0x30   : > { %119 = vmatpush.msra.mxu1 %v754_v13  ;;  %99 = vmatpush.msra.mxu0 %v755_v12 }
  0x31   : > { %140 = vmatpush.msra.mxu2 %v756_v10  ;;  %160 = vmatpush.msra.mxu3 %v757_v11  ;;  %v766_v10 = vld [vmem:[#allocation3_spill] sm:$0xff] }
  0x32   : > { %120 = vmatpush.msra.mxu1 %v758_v9  ;;  %100 = vmatpush.msra.mxu0 %v759_v8  ;;  %v767_v9 = vld [vmem:[#allocation2_spill] sm:$0xff] }
  0x33   : > { %141 = vmatpush.msra.mxu2 %v760_v6  ;;  %161 = vmatpush.msra.mxu3 %v761_v7 }
  0x34   : > { %121 = vmatpush.msra.mxu1 %v762_v5  ;;  %101 = vmatpush.msra.mxu0 %v763_v4 }
  0x35   : > { %142 = vmatpush.msra.mxu2 %v764_v2  ;;  %162 = vmatpush.msra.mxu3 %v765_v3 }
  0x36   : > { %143 = vmatmul.f32.vlgmr.msra.gmra.mxu2 %v285_v1  ;;  %163 = vmatmul.f32.vlgmr.msra.gmra.mxu3 %v285_v1 }
  0x37   : > { %122 = vmatpush.msra.mxu1 %v766_v10  ;;  %102 = vmatpush.msra.mxu0 %v767_v9  ;;  %v86_v9 = vld [vmem:[%s85_s28] sm:$0xff] }
  0x38   : > { %123 = vmatmul.f32.vlgmr.msra.gmra.mxu1 %v285_v1  ;;  %103 = vmatmul.f32.vlgmr.msra.gmra.mxu0 %v285_v1 }
  0xb5   : > { %v124_v6 = vpop.f32.mrf.mxu1  ;;  %v104_v4 = vpop.f32.mrf.mxu0 }
  0xb6   : > { %v171_v5 = vrot.slane %v124_v6, 6 }
  0xb8   : > { %v175_v8 = vsel %vm174_vm0, %v104_v4, %v171_v5 }
  0xb9   : > { %v144_v2 = vpop.f32.mrf.mxu2  ;;  %v164_v3 = vpop.f32.mrf.mxu3 }
  0xba   : > { %v172_v7 = vrot.slane %v144_v2, 4  ;;  %v173_v10 = vrot.slane %v164_v3, 2 }
  0xbc   : > { %v177_v11 = vsel %vm176_vm1, %v172_v7, %v173_v10 }
  0xbd   : > { %v179_v12 = vsel %vm178_vm2, %v175_v8, %v177_v11 }
  0xbe   : > { %v181_v1 = vadd.f32 %v179_v12, %v86_v9 }
  0xc0   : > { %v182_v13 = vmul.f32 0.5, %v181_v1  ;;  %v187_v14 = vrot.slane %v181_v1, 2  ;;  %v196_v15 = vrot.slane %v181_v1, 6  ;;  %v193_v16 = vrot.slane %v181_v1, 4 }
  0xc2   : > { %257 = vtanh.f32 %v182_v13  ;;  %v189_v6 = vmul.f32 0.5, %v187_v14  ;;  %v198_v17 = vmul.f32 0.5, %v196_v15 }
  0xc4   : > { %259 = vtanh.f32 %v189_v6 }
  0xc5   : > { %261 = vtanh.f32 %v193_v16 }
  0xc6   : > { %263 = vtanh.f32 %v198_v17 }
  0xc8   : > { %v258_v18 = vpop.eup %257 }
  0xc9   : > { %v184_v19 = vadd.f32 1.0, %v258_v18 }
  0xca   : > { %v260_v2 = vpop.eup %259 }
  0xcb   : > { %v185_v3 = vmul.f32 0.5, %v184_v19  ;;  %v191_v4 = vadd.f32 1.0, %v260_v2  ;;  %v262_v7 = vpop.eup %261 }
  0xcc   : > { %v264_v12 = vpop.eup %263 }
  0xcd   : > { %v192_v5 = vmul.f32 0.5, %v191_v4  ;;  %v203_v11 = vmul.f32 %v262_v7, %v185_v3  ;;  %v200_v13 = vadd.f32 1.0, %v264_v12 }
  0xcf   : > { %v202_v8 = vmul.f32 %v281_v0, %v192_v5  ;;  %v201_v14 = vmul.f32 0.5, %v200_v13 }
  0xd1   : > { %v204_v0 = vadd.f32 %v203_v11, %v202_v8  }
  0xd3   : > { %265 = vtanh.f32 %v204_v0 }
  0xd8   :  { %79 = sbr.rel (!%p77_p0) target bundleno = 23 (0x17), region = 37 }
  0xd9   : > { %v266_v15 = vpop.eup %265 }
  0xda   : > { %v206_v1 = vmul.f32 %v266_v15, %v201_v14  }
  0xdc   : > { %209 = vst [vmem:[%s208_s4] sm:$0x3] %v206_v1 }

// kernel: ilnet_forward.3
= control target key start
LH: loop header
LB: loop body
LE: loop exit
PB: predicated region body
PF: predicated region fallthrough
CT: control target
= control target key end

     0   :  { %vm188_vm0 = vcmask 1043456   ;;  %vm184_vm1 = vcmask 588800   ;;  %s2560_s0 = inlined_call_operand.vmem [shape: bf16[4,72,768], index: 0, kind: input, shape index: {}]   ;;  %s2561_s1 = inlined_call_operand.vmem [shape: bf16[16,72], index: 1, kind: input, shape index: {}]   ;;  %s2562_s2 = inlined_call_operand.vmem [shape: f32[16,1], index: 2, kind: input, shape index: {}]   ;;  %s2563_s3 = inlined_call_operand.vmem [shape: f32[16,768], index: 3, kind: output, shape index: {}]  }
   0x1   :  { %v41_v0 = vld [vmem:[%s2560_s0 + $0xc0] sm:$0xff]  ;;  %v42_v1 = vld [vmem:[%s2560_s0 + $0xc8] sm:$0xff]  ;;  %v1252_v6 = vld [vmem:[%s2560_s0 + $0x90] sm:$0xf] }
   0x2   :  { %v124_v2 = vunpack.c.l.b16 %v41_v0  ;;  %v125_v3 = vunpack.c.h.b16 %v41_v0  ;;  %v126_v4 = vunpack.c.l.b16 %v42_v1  ;;  %v127_v5 = vunpack.c.h.b16 %v42_v1  ;;  %v1689_v7 = vld [vmem:[%s2560_s0 + $0xa4] sm:$0xf0]  ;;  %v1686_v12 = vld [vmem:[%s2560_s0 + $0x94] sm:$0xf]  ;;  %v1254_v13 = vld [vmem:[%s2560_s0 + $0xa8] sm:$0xf0] }
   0x3   :  { %v1260_v14 = vld [vmem:[%s2560_s0 + $0x98] sm:$0xf]  ;;  %v1690_v15 = vld [vmem:[%s2560_s0 + $0xac] sm:$0xf0]  ;;  %v1687_v16 = vld [vmem:[%s2560_s0 + $0x9c] sm:$0xf]  ;;  %v1253_v22 = vor.u32 %v1689_v7, %v1252_v6  ;;  %v1257_v23 = vor.u32 %v1686_v12, %v1254_v13 }
   0x4   :  { %v154_v8 = vpack.c.b16 %v124_v2, %v124_v2  ;;  %v155_v9 = vpack.c.b16 %v125_v3, %v125_v3  ;;  %v156_v10 = vpack.c.b16 %v126_v4, %v126_v4  ;;  %v157_v11 = vpack.c.b16 %v127_v5, %v127_v5  ;;  %v1262_v17 = vld [vmem:[%s2560_s0 + $0xb0] sm:$0xf0]  ;;  %v1228_v24 = vld [vmem:[%s2560_s0 + $0x60] sm:$0xf]  ;;  %v1683_v25 = vld [vmem:[%s2560_s0 + $0x74] sm:$0xf0] }
   0x5   :  { %v1261_v26 = vor.u32 %v1690_v15, %v1260_v14  ;;  %v1265_v27 = vor.u32 %v1687_v16, %v1262_v17  ;;  %v1680_v28 = vld [vmem:[%s2560_s0 + $0x64] sm:$0xf]  ;;  %v1230_v29 = vld [vmem:[%s2560_s0 + $0x78] sm:$0xf0]  ;;  %v1236_v30 = vld [vmem:[%s2560_s0 + $0x68] sm:$0xf]  ;;  %v1229_v35 = vor.u32 %v1683_v25, %v1228_v24 }
   0x6   :  { %v190_v18 = vsel %vm188_vm0, %v154_v8, 0  ;;  %v193_v19 = vsel %vm188_vm0, %v155_v9, 0  ;;  %v196_v20 = vsel %vm188_vm0, %v156_v10, 0  ;;  %v199_v21 = vsel %vm188_vm0, %v157_v11, 0  ;;  %v1684_v31 = vld [vmem:[%s2560_s0 + $0x7c] sm:$0xf0] }
   0x7   :  { %210 = vmatpush.bf16.msra.mxu0 %v190_v18  ;;  %224 = vmatpush.bf16.msra.mxu1 %v193_v19  ;;  %v1681_v32 = vld [vmem:[%s2560_s0 + $0x6c] sm:$0xf]  ;;  %v1238_v33 = vld [vmem:[%s2560_s0 + $0x80] sm:$0xf0]  ;;  %v1204_v34 = vld [vmem:[%s2560_s0 + $0x30] sm:$0xf]  ;;  %v1233_v36 = vor.u32 %v1680_v28, %v1230_v29  ;;  %v1237_v40 = vor.u32 %v1684_v31, %v1236_v30 }
   0x8   :  { %238 = vmatpush.bf16.msra.mxu2 %v196_v20  ;;  %252 = vmatpush.bf16.msra.mxu3 %v199_v21  ;;  %v1677_v37 = vld [vmem:[%s2560_s0 + $0x44] sm:$0xf0]  ;;  %v1674_v38 = vld [vmem:[%s2560_s0 + $0x34] sm:$0xf]  ;;  %v1206_v39 = vld [vmem:[%s2560_s0 + $0x48] sm:$0xf0]  ;;  %v1241_v41 = vor.u32 %v1681_v32, %v1238_v33 }
   0x9   :  { %v1212_v42 = vld [vmem:[%s2560_s0 + $0x38] sm:$0xf]  ;;  %v1678_v43 = vld [vmem:[%s2560_s0 + $0x4c] sm:$0xf0]  ;;  %v1675_v44 = vld [vmem:[%s2560_s0 + $0x3c] sm:$0xf]  ;;  %v1205_v50 = vor.u32 %v1677_v37, %v1204_v34  ;;  %v1209_v51 = vor.u32 %v1674_v38, %v1206_v39 }
   0xa   :  { %v1214_v45 = vld [vmem:[%s2560_s0 + $0x50] sm:$0xf0]  ;;  %v1304_v47 = vld [vmem:[%s2560_s0 + $0x198] sm:$0xff]  ;;  %v1180_v52 = vld [vmem:[%s2560_s0] sm:$0xf]  ;;  %v1213_v56 = vor.u32 %v1678_v43, %v1212_v42 }
   0xb   :  { %211 = vmatpush.bf16.msra.mxu0 %v1253_v22  ;;  %225 = vmatpush.bf16.msra.mxu1 %v1257_v23  ;;  %v43_v46 = vld [vmem:[%s2560_s0 + $0xd0] sm:$0xff]  ;;  %v1671_v53 = vld [vmem:[%s2560_s0 + $0x14] sm:$0xf0]  ;;  %v394_v54 = vunpack.c.l.b16 %v1304_v47  ;;  %v395_v55 = vunpack.c.h.b16 %v1304_v47  ;;  %v1217_v57 = vor.u32 %v1675_v44, %v1214_v45  ;;  %v1668_v58 = vld [vmem:[%s2560_s0 + $0x4] sm:$0xf] }
   0xc   :  { %239 = vmatpush.bf16.msra.mxu2 %v1261_v26  ;;  %253 = vmatpush.bf16.msra.mxu3 %v1265_v27  ;;  %v128_v48 = vunpack.c.l.b16 %v43_v46  ;;  %v129_v49 = vunpack.c.h.b16 %v43_v46  ;;  %v1182_v59 = vld [vmem:[%s2560_s0 + $0x18] sm:$0xf0]  ;;  %v1188_v60 = vld [vmem:[%s2560_s0 + $0x8] sm:$0xf]  ;;  %v1672_v61 = vld [vmem:[%s2560_s0 + $0x1c] sm:$0xf0]  ;;  %v1181_v0 = vor.u32 %v1671_v53, %v1180_v52 }
   0xd   :  { %v1669_v62 = vld [vmem:[%s2560_s0 + $0xc] sm:$0xf]  ;;  %v1190_v63 = vld [vmem:[%s2560_s0 + $0x20] sm:$0xf0]  ;;  %v1185_v3 = vor.u32 %v1668_v58, %v1182_v59  ;;  %v424_v4 = vpack.c.b16 %v394_v54, %v394_v54  ;;  %v425_v5 = vpack.c.b16 %v395_v55, %v395_v55  ;;  %v1189_v6 = vor.u32 %v1672_v61, %v1188_v60  ;;  %v1268_v8 = vld [vmem:[%s2560_s0 + $0xa0] sm:$0xf] }
   0xe   :  { %v158_v1 = vpack.c.b16 %v128_v48, %v128_v48  ;;  %v159_v2 = vpack.c.b16 %v129_v49, %v129_v49  ;;  %v1193_v7 = vor.u32 %v1669_v62, %v1190_v63  ;;  %v1905_v9 = vld [vmem:[%s2561_s1] sm:$0xff]  ;;  %v1691_v10 = vld [vmem:[%s2560_s0 + $0xb4] sm:$0xf0]  ;;  %v1270_v12 = vld [vmem:[%s2560_s0 + $0xb8] sm:$0xf0] }
   0xf   :  { %212 = vmatpush.bf16.msra.mxu0 %v1229_v35  ;;  %226 = vmatpush.bf16.msra.mxu1 %v1233_v36  ;;  %v1688_v11 = vld [vmem:[%s2560_s0 + $0xa4] sm:$0xf]  ;;  %v1381_v15 = vld [vmem:[%s2560_s0 + $0x168] sm:$0xf]  ;;  %v1713_v16 = vld [vmem:[%s2560_s0 + $0x17c] sm:$0xf0]  ;;  %v1269_v21 = vor.u32 %v1691_v10, %v1268_v8 }
  0x10   :  { %240 = vmatpush.bf16.msra.mxu2 %v1237_v40  ;;  %254 = vmatpush.bf16.msra.mxu3 %v1241_v41  ;;  %v202_v13 = vsel %vm188_vm0, %v158_v1, 0  ;;  %v205_v14 = vsel %vm188_vm0, %v159_v2, 0  ;;  %v455_v17 = vsel %vm188_vm0, %v424_v4, 0  ;;  %v458_v18 = vsel %vm188_vm0, %v425_v5, 0  ;;  %v1710_v19 = vld [vmem:[%s2560_s0 + $0x16c] sm:$0xf] }
  0x11   :  { %v1383_v20 = vld [vmem:[%s2560_s0 + $0x180] sm:$0xf0]  ;;  %v1273_v22 = vor.u32 %v1688_v11, %v1270_v12  ;;  %v1244_v23 = vld [vmem:[%s2560_s0 + $0x70] sm:$0xf]  ;;  %v1685_v24 = vld [vmem:[%s2560_s0 + $0x84] sm:$0xf0]  ;;  %v1382_v26 = vor.u32 %v1713_v16, %v1381_v15 }
  0x12   :  { %v1682_v25 = vld [vmem:[%s2560_s0 + $0x74] sm:$0xf]  ;;  %v1386_v27 = vor.u32 %v1710_v19, %v1383_v20  ;;  %v1246_v28 = vld [vmem:[%s2560_s0 + $0x88] sm:$0xf0]  ;;  %v1357_v29 = vld [vmem:[%s2560_s0 + $0x138] sm:$0xf]  ;;  %v1245_v35 = vor.u32 %v1685_v24, %v1244_v23 }
  0x13   :  { %213 = vmatpush.bf16.msra.mxu0 %v1205_v50  ;;  %227 = vmatpush.bf16.msra.mxu1 %v1209_v51  ;;  %v1305_v30 = vld [vmem:[%s2560_s0 + $0x1a0] sm:$0xff]  ;;  %v1707_v31 = vld [vmem:[%s2560_s0 + $0x14c] sm:$0xf0]  ;;  %v1704_v32 = vld [vmem:[%s2560_s0 + $0x13c] sm:$0xf]  ;;  %v1249_v36 = vor.u32 %v1682_v25, %v1246_v28 }
  0x14   :  { %241 = vmatpush.bf16.msra.mxu2 %v1213_v56  ;;  %255 = vmatpush.bf16.msra.mxu3 %v1217_v57  ;;  %v1359_v33 = vld [vmem:[%s2560_s0 + $0x150] sm:$0xf0]  ;;  %v1306_v34 = vld [vmem:[%s2560_s0 + $0x1a8] sm:$0xff]  ;;  %v1220_v37 = vld [vmem:[%s2560_s0 + $0x40] sm:$0xf]  ;;  %v396_v39 = vunpack.c.l.b16 %v1305_v30  ;;  %v1358_v40 = vor.u32 %v1707_v31, %v1357_v29  ;;  %v397_v45 = vunpack.c.h.b16 %v1305_v30 }
  0x15   :  { %v1679_v38 = vld [vmem:[%s2560_s0 + $0x54] sm:$0xf0]  ;;  %v1362_v41 = vor.u32 %v1704_v32, %v1359_v33  ;;  %v1676_v42 = vld [vmem:[%s2560_s0 + $0x44] sm:$0xf]  ;;  %v1222_v43 = vld [vmem:[%s2560_s0 + $0x58] sm:$0xf0]  ;;  %v398_v49 = vunpack.c.l.b16 %v1306_v34  ;;  %v399_v50 = vunpack.c.h.b16 %v1306_v34 }
  0x16   :  { %v1333_v44 = vld [vmem:[%s2560_s0 + $0x108] sm:$0xf]  ;;  %v1701_v46 = vld [vmem:[%s2560_s0 + $0x11c] sm:$0xf0]  ;;  %v1698_v47 = vld [vmem:[%s2560_s0 + $0x10c] sm:$0xf]  ;;  %v1221_v51 = vor.u32 %v1679_v38, %v1220_v37  ;;  %v1225_v52 = vor.u32 %v1676_v42, %v1222_v43  ;;  %v426_v55 = vpack.c.b16 %v396_v39, %v396_v39  ;;  %v427_v61 = vpack.c.b16 %v397_v45, %v397_v45 }
  0x17   :  { %214 = vmatpush.bf16.msra.mxu0 %v1181_v0  ;;  %228 = vmatpush.bf16.msra.mxu1 %v1185_v3  ;;  %v1335_v48 = vld [vmem:[%s2560_s0 + $0x120] sm:$0xf0]  ;;  %v1196_v53 = vld [vmem:[%s2560_s0 + $0x10] sm:$0xf]  ;;  %v1673_v54 = vld [vmem:[%s2560_s0 + $0x24] sm:$0xf0]  ;;  %v1334_v56 = vor.u32 %v1701_v46, %v1333_v44  ;;  %v428_v1 = vpack.c.b16 %v398_v49, %v398_v49  ;;  %v429_v2 = vpack.c.b16 %v399_v50, %v399_v50 }
  0x18   :  { %242 = vmatpush.bf16.msra.mxu2 %v1189_v6  ;;  %256 = vmatpush.bf16.msra.mxu3 %v1193_v7  ;;  %v1338_v57 = vor.u32 %v1698_v47, %v1335_v48  ;;  %v1670_v58 = vld [vmem:[%s2560_s0 + $0x14] sm:$0xf]  ;;  %v1198_v59 = vld [vmem:[%s2560_s0 + $0x28] sm:$0xf0]  ;;  %v1309_v60 = vld [vmem:[%s2560_s0 + $0xd8] sm:$0xf]  ;;  %v1197_v3 = vor.u32 %v1673_v54, %v1196_v53 }
  0x19   :  { %v1695_v62 = vld [vmem:[%s2560_s0 + $0xec] sm:$0xf0]  ;;  %v1692_v63 = vld [vmem:[%s2560_s0 + $0xdc] sm:$0xf]  ;;  %v1311_v0 = vld [vmem:[%s2560_s0 + $0xf0] sm:$0xf0]  ;;  %v1201_v4 = vor.u32 %v1670_v58, %v1198_v59 }
  0x1a   :  { %1274 = vmatmul.msk.bf16.vlgmr.msra.gmra.mxu0 %vm184_vm1, %v1905_v9  ;;  %1275 = vmatmul.msk.bf16.vlgmr.msra.gmra.mxu1 %vm184_vm1, %v1905_v9  ;;  %v1310_v5 = vor.u32 %v1695_v62, %v1309_v60  ;;  %v1314_v6 = vor.u32 %v1692_v63, %v1311_v0  ;;  %v461_v7 = vsel %vm188_vm0, %v426_v55, 0  ;;  %v464_v8 = vsel %vm188_vm0, %v427_v61, 0  ;;  %v1389_v12 = vld [vmem:[%s2560_s0 + $0x170] sm:$0xf]  ;;  %v1391_v15 = vld [vmem:[%s2560_s0 + $0x188] sm:$0xf0] }
  0x1b   :  { %266 = vmatpush.bf16.msrb.mxu0 %v202_v13  ;;  %280 = vmatpush.bf16.msrb.mxu1 %v205_v14  ;;  %v467_v10 = vsel %vm188_vm0, %v428_v1, 0  ;;  %v470_v11 = vsel %vm188_vm0, %v429_v2, 0  ;;  %v1714_v13 = vld [vmem:[%s2560_s0 + $0x184] sm:$0xf0]  ;;  %v1711_v14 = vld [vmem:[%s2560_s0 + $0x174] sm:$0xf] }
  0x1c   :  { %475 = vmatpush.bf16.msrb.mxu2 %v455_v17  ;;  %489 = vmatpush.bf16.msrb.mxu3 %v458_v18  ;;  %v1397_v16 = vld [vmem:[%s2560_s0 + $0x178] sm:$0xf]  ;;  %v1715_v17 = vld [vmem:[%s2560_s0 + $0x18c] sm:$0xf0]  ;;  %v1712_v18 = vld [vmem:[%s2560_s0 + $0x17c] sm:$0xf]  ;;  %v1390_v20 = vor.u32 %v1714_v13, %v1389_v12 }
  0x1d   :  { %1276 = vmatmul.msk.bf16.vlgmr.msra.gmra.mxu2 %vm184_vm1, %v1905_v9  ;;  %1277 = vmatmul.msk.bf16.vlgmr.msra.gmra.mxu3 %vm184_vm1, %v1905_v9  ;;  %v1399_v19 = vld [vmem:[%s2560_s0 + $0x190] sm:$0xf0]  ;;  %v1708_v23 = vld [vmem:[%s2560_s0 + $0x154] sm:$0xf0]  ;;  %v1398_v24 = vor.u32 %v1715_v17, %v1397_v16  ;;  %v1373_v28 = vld [vmem:[%s2560_s0 + $0x148] sm:$0xf] }
  0x1e   :  { %v1402_v25 = vor.u32 %v1712_v18, %v1399_v19  ;;  %v1709_v29 = vld [vmem:[%s2560_s0 + $0x15c] sm:$0xf0]  ;;  %v1706_v30 = vld [vmem:[%s2560_s0 + $0x14c] sm:$0xf]  ;;  %v1375_v31 = vld [vmem:[%s2560_s0 + $0x160] sm:$0xf0] }
  0x1f   :  { %267 = vmatpush.bf16.msrb.mxu0 %v1269_v21  ;;  %281 = vmatpush.bf16.msrb.mxu1 %v1273_v22  ;;  %v1394_v21 = vor.u32 %v1711_v14, %v1391_v15  ;;  %v1365_v22 = vld [vmem:[%s2560_s0 + $0x140] sm:$0xf]  ;;  %v1341_v32 = vld [vmem:[%s2560_s0 + $0x110] sm:$0xf]  ;;  %v1374_v38 = vor.u32 %v1709_v29, %v1373_v28  ;;  %v1378_v39 = vor.u32 %v1706_v30, %v1375_v31  ;;  %v1434_v42 = vld [vmem:[%s2560_s0 + $0x278] sm:$0xff] }
  0x20   :  { %476 = vmatpush.bf16.msrb.mxu2 %v1382_v26  ;;  %490 = vmatpush.bf16.msrb.mxu3 %v1386_v27  ;;  %v1705_v26 = vld [vmem:[%s2560_s0 + $0x144] sm:$0xf]  ;;  %v1367_v27 = vld [vmem:[%s2560_s0 + $0x158] sm:$0xf0]  ;;  %v1366_v33 = vor.u32 %v1708_v23, %v1365_v22  ;;  %v1433_v37 = vld [vmem:[%s2560_s0 + $0x270] sm:$0xff]  ;;  %v674_v53 = vunpack.c.h.b16 %v1434_v42 }
  0x21   :  { %v1370_v34 = vor.u32 %v1705_v26, %v1367_v27  ;;  %v1703_v43 = vld [vmem:[%s2560_s0 + $0x12c] sm:$0xf0]  ;;  %v1700_v44 = vld [vmem:[%s2560_s0 + $0x11c] sm:$0xf]  ;;  %v1351_v45 = vld [vmem:[%s2560_s0 + $0x130] sm:$0xf0]  ;;  %v671_v46 = vunpack.c.l.b16 %v1433_v37  ;;  %v672_v47 = vunpack.c.h.b16 %v1433_v37 }
  0x22   :  { %v1317_v50 = vld [vmem:[%s2560_s0 + $0xe0] sm:$0xf]  ;;  %v1354_v55 = vor.u32 %v1700_v44, %v1351_v45  ;;  %v1325_v58 = vld [vmem:[%s2560_s0 + $0xe8] sm:$0xf]  ;;  %v1694_v60 = vld [vmem:[%s2560_s0 + $0xec] sm:$0xf] }
  0x23   :  { %268 = vmatpush.bf16.msrb.mxu0 %v1245_v35  ;;  %282 = vmatpush.bf16.msrb.mxu1 %v1249_v36  ;;  %v1702_v35 = vld [vmem:[%s2560_s0 + $0x124] sm:$0xf0]  ;;  %v1699_v36 = vld [vmem:[%s2560_s0 + $0x114] sm:$0xf]  ;;  %v1697_v59 = vld [vmem:[%s2560_s0 + $0xfc] sm:$0xf0]  ;;  %v701_v63 = vpack.c.b16 %v671_v46, %v671_v46  ;;  %v702_v0 = vpack.c.b16 %v672_v47, %v672_v47 }
  0x24   :  { %477 = vmatpush.bf16.msrb.mxu2 %v1358_v40  ;;  %491 = vmatpush.bf16.msrb.mxu3 %v1362_v41  ;;  %v1343_v40 = vld [vmem:[%s2560_s0 + $0x128] sm:$0xf0]  ;;  %v1349_v41 = vld [vmem:[%s2560_s0 + $0x118] sm:$0xf]  ;;  %v1342_v48 = vor.u32 %v1702_v35, %v1341_v32  ;;  %v1327_v61 = vld [vmem:[%s2560_s0 + $0x100] sm:$0xf0] }
  0x25   :  { %v1346_v49 = vor.u32 %v1699_v36, %v1343_v40  ;;  %v1350_v54 = vor.u32 %v1703_v43, %v1349_v41  ;;  %v735_v12 = vsel %vm188_vm0, %v702_v0, 0  ;;  %v1518_v13 = vld [vmem:[%s2560_s0 + $0x248] sm:$0xf]  ;;  %v1738_v14 = vld [vmem:[%s2560_s0 + $0x25c] sm:$0xf0] }
  0x26   :  { %v1735_v17 = vld [vmem:[%s2560_s0 + $0x24c] sm:$0xf]  ;;  %v1520_v18 = vld [vmem:[%s2560_s0 + $0x260] sm:$0xf0]  ;;  %v1731_v22 = vld [vmem:[%s2560_s0 + $0x224] sm:$0xf0]  ;;  %v1519_v23 = vor.u32 %v1738_v14, %v1518_v13 }
  0x27   :  { %269 = vmatpush.bf16.msrb.mxu0 %v1221_v51  ;;  %283 = vmatpush.bf16.msrb.mxu1 %v1225_v52  ;;  %v1696_v51 = vld [vmem:[%s2560_s0 + $0xf4] sm:$0xf0]  ;;  %v673_v52 = vunpack.c.l.b16 %v1434_v42  ;;  %v1488_v26 = vld [vmem:[%s2560_s0 + $0x228] sm:$0xf0]  ;;  %v1732_v28 = vld [vmem:[%s2560_s0 + $0x22c] sm:$0xf0] }
  0x28   :  { %478 = vmatpush.bf16.msrb.mxu2 %v1334_v56  ;;  %492 = vmatpush.bf16.msrb.mxu3 %v1338_v57  ;;  %v1693_v56 = vld [vmem:[%s2560_s0 + $0xe4] sm:$0xf]  ;;  %v1319_v57 = vld [vmem:[%s2560_s0 + $0xf8] sm:$0xf0]  ;;  %v1318_v62 = vor.u32 %v1696_v51, %v1317_v50  ;;  %v1494_v27 = vld [vmem:[%s2560_s0 + $0x218] sm:$0xf] }
  0x29   :  { %v1322_v1 = vor.u32 %v1693_v56, %v1319_v57  ;;  %v703_v2 = vpack.c.b16 %v673_v52, %v673_v52  ;;  %v1729_v29 = vld [vmem:[%s2560_s0 + $0x21c] sm:$0xf]  ;;  %v1496_v30 = vld [vmem:[%s2560_s0 + $0x230] sm:$0xf0]  ;;  %v1462_v31 = vld [vmem:[%s2560_s0 + $0x1e0] sm:$0xf]  ;;  %v1495_v37 = vor.u32 %v1732_v28, %v1494_v27 }
  0x2a   :  { %v1722_v35 = vld [vmem:[%s2560_s0 + $0x1e4] sm:$0xf]  ;;  %v1470_v40 = vld [vmem:[%s2560_s0 + $0x1e8] sm:$0xf]  ;;  %v1726_v42 = vld [vmem:[%s2560_s0 + $0x1fc] sm:$0xf0] }
  0x2b   :  { %270 = vmatpush.bf16.msrb.mxu0 %v1197_v3  ;;  %284 = vmatpush.bf16.msrb.mxu1 %v1201_v4  ;;  %v704_v3 = vpack.c.b16 %v674_v53, %v674_v53  ;;  %v1326_v4 = vor.u32 %v1697_v59, %v1325_v58  ;;  %v738_v15 = vsel %vm188_vm0, %v703_v2, 0  ;;  %v1435_v36 = vld [vmem:[%s2560_s0 + $0x280] sm:$0xff]  ;;  %v1562_v41 = vld [vmem:[%s2560_s0 + $0x348] sm:$0xff]  ;;  %v1471_v53 = vor.u32 %v1726_v42, %v1470_v40  ;;  %v1446_v57 = vld [vmem:[%s2560_s0 + $0x1b8] sm:$0xf] }
  0x2c   :  { %479 = vmatpush.bf16.msrb.mxu2 %v1310_v5  ;;  %493 = vmatpush.bf16.msrb.mxu3 %v1314_v6  ;;  %v1330_v5 = vor.u32 %v1694_v60, %v1327_v61  ;;  %v1510_v6 = vld [vmem:[%s2560_s0 + $0x240] sm:$0xf]  ;;  %v1723_v43 = vld [vmem:[%s2560_s0 + $0x1ec] sm:$0xf]  ;;  %v1472_v44 = vld [vmem:[%s2560_s0 + $0x200] sm:$0xf0]  ;;  %v675_v45 = vunpack.c.l.b16 %v1435_v36  ;;  %v676_v46 = vunpack.c.h.b16 %v1435_v36  ;;  %v948_v51 = vunpack.c.l.b16 %v1562_v41 }
  0x2d   :  { %v741_v16 = vsel %vm188_vm0, %v704_v3, 0  ;;  %v1719_v50 = vld [vmem:[%s2560_s0 + $0x1c4] sm:$0xf0]  ;;  %v949_v52 = vunpack.c.h.b16 %v1562_v41  ;;  %v1440_v56 = vld [vmem:[%s2560_s0 + $0x1c8] sm:$0xf0] }
  0x2e   :  { %1278 = vmatmul.msk.bf16.vlgmr.msrb.gmra.mxu0 %vm184_vm1, %v1905_v9  ;;  %1279 = vmatmul.msk.bf16.vlgmr.msrb.gmra.mxu1 %vm184_vm1, %v1905_v9  ;;  %v1720_v58 = vld [vmem:[%s2560_s0 + $0x1cc] sm:$0xf0]  ;;  %v1717_v59 = vld [vmem:[%s2560_s0 + $0x1bc] sm:$0xf]  ;;  %v1448_v60 = vld [vmem:[%s2560_s0 + $0x1d0] sm:$0xf0] }
  0x2f   :  { %503 = vmatpush.bf16.msra.mxu0 %v461_v7  ;;  %517 = vmatpush.bf16.msra.mxu1 %v464_v8  ;;  %v1737_v7 = vld [vmem:[%s2560_s0 + $0x254] sm:$0xf0]  ;;  %v1734_v8 = vld [vmem:[%s2560_s0 + $0x244] sm:$0xf]  ;;  %v979_v2 = vpack.c.b16 %v949_v52, %v949_v52  ;;  %v1447_v3 = vor.u32 %v1720_v58, %v1446_v57  ;;  %v1761_v13 = vld [vmem:[%s2560_s0 + $0x32c] sm:$0xf0] }
  0x30   :  { %531 = vmatpush.bf16.msra.mxu2 %v467_v10  ;;  %545 = vmatpush.bf16.msra.mxu3 %v470_v11  ;;  %v1512_v10 = vld [vmem:[%s2560_s0 + $0x258] sm:$0xf0]  ;;  %v732_v11 = vsel %vm188_vm0, %v701_v63, 0  ;;  %v1511_v19 = vor.u32 %v1737_v7, %v1510_v6  ;;  %v706_v63 = vpack.c.b16 %v676_v46, %v676_v46  ;;  %v1739_v6 = vld [vmem:[%s2560_s0 + $0x264] sm:$0xf0] }
  0x31   :  { %1403 = vmatmul.msk.bf16.vlgmr.msrb.gmra.mxu2 %vm184_vm1, %v1905_v9  ;;  %1404 = vmatmul.msk.bf16.vlgmr.msrb.gmra.mxu3 %vm184_vm1, %v1905_v9  ;;  %v1736_v7 = vld [vmem:[%s2560_s0 + $0x254] sm:$0xf]  ;;  %v1755_v27 = vld [vmem:[%s2560_s0 + $0x2fc] sm:$0xf0]  ;;  %v1752_v28 = vld [vmem:[%s2560_s0 + $0x2ec] sm:$0xf] }
  0x32   :  { %v1724_v36 = vld [vmem:[%s2560_s0 + $0x1f4] sm:$0xf]  ;;  %v1591_v40 = vld [vmem:[%s2560_s0 + $0x2b8] sm:$0xf]  ;;  %v1749_v41 = vld [vmem:[%s2560_s0 + $0x2cc] sm:$0xf0] }
  0x33   :  { %504 = vmatpush.bf16.msra.mxu0 %v1390_v20  ;;  %518 = vmatpush.bf16.msra.mxu1 %v1394_v21  ;;  %v1515_v20 = vor.u32 %v1734_v8, %v1512_v10  ;;  %v1486_v21 = vld [vmem:[%s2560_s0 + $0x210] sm:$0xf]  ;;  %v1528_v8 = vld [vmem:[%s2560_s0 + $0x268] sm:$0xf0]  ;;  %v1592_v52 = vor.u32 %v1749_v41, %v1591_v40  ;;  %v1456_v57 = vld [vmem:[%s2560_s0 + $0x1d8] sm:$0xf0] }
  0x34   :  { %532 = vmatpush.bf16.msra.mxu2 %v1398_v24  ;;  %546 = vmatpush.bf16.msra.mxu3 %v1402_v25  ;;  %v1523_v24 = vor.u32 %v1735_v17, %v1520_v18  ;;  %v1728_v25 = vld [vmem:[%s2560_s0 + $0x214] sm:$0xf]  ;;  %v1487_v32 = vor.u32 %v1731_v22, %v1486_v21  ;;  %v1733_v21 = vld [vmem:[%s2560_s0 + $0x234] sm:$0xf0]  ;;  %v1730_v22 = vld [vmem:[%s2560_s0 + $0x224] sm:$0xf] }
  0x35   :  { %v1641_v17 = vld [vmem:[%s2560_s0 + $0x330] sm:$0xf0]  ;;  %v1567_v58 = vld [vmem:[%s2560_s0 + $0x288] sm:$0xf]  ;;  %v1751_v41 = vld [vmem:[%s2560_s0 + $0x2dc] sm:$0xf0] }
  0x36   :  { %v1607_v40 = vld [vmem:[%s2560_s0 + $0x2c8] sm:$0xf] }
  0x37   :  { %505 = vmatpush.bf16.msra.mxu0 %v1366_v33  ;;  %519 = vmatpush.bf16.msra.mxu1 %v1370_v34  ;;  %v1491_v33 = vor.u32 %v1728_v25, %v1488_v26  ;;  %v1725_v34 = vld [vmem:[%s2560_s0 + $0x1f4] sm:$0xf0]  ;;  %v1504_v25 = vld [vmem:[%s2560_s0 + $0x238] sm:$0xf0]  ;;  %v1615_v26 = vld [vmem:[%s2560_s0 + $0x2e8] sm:$0xf] }
  0x38   :  { %533 = vmatpush.bf16.msra.mxu2 %v1374_v38  ;;  %547 = vmatpush.bf16.msra.mxu3 %v1378_v39  ;;  %v1499_v38 = vor.u32 %v1729_v29, %v1496_v30  ;;  %v1464_v39 = vld [vmem:[%s2560_s0 + $0x1f8] sm:$0xf0]  ;;  %v1463_v47 = vor.u32 %v1725_v34, %v1462_v31  ;;  %v1617_v29 = vld [vmem:[%s2560_s0 + $0x300] sm:$0xf0]  ;;  %v1563_v30 = vld [vmem:[%s2560_s0 + $0x350] sm:$0xff] }
  0x39   :  { %v1564_v31 = vld [vmem:[%s2560_s0 + $0x358] sm:$0xff]  ;;  %v1478_v34 = vld [vmem:[%s2560_s0 + $0x1f0] sm:$0xf]  ;;  %v950_v42 = vunpack.c.l.b16 %v1563_v30 }
  0x3a   :  { %v952_v46 = vunpack.c.l.b16 %v1564_v31 }
  0x3b   :  { %506 = vmatpush.bf16.msra.mxu0 %v1342_v48  ;;  %520 = vmatpush.bf16.msra.mxu1 %v1346_v49  ;;  %v1467_v48 = vor.u32 %v1722_v35, %v1464_v39  ;;  %v1438_v49 = vld [vmem:[%s2560_s0 + $0x1b0] sm:$0xf]  ;;  %v1727_v35 = vld [vmem:[%s2560_s0 + $0x204] sm:$0xf0]  ;;  %v1480_v39 = vld [vmem:[%s2560_s0 + $0x208] sm:$0xf0] }
  0x3c   :  { %534 = vmatpush.bf16.msra.mxu2 %v1350_v54  ;;  %548 = vmatpush.bf16.msra.mxu3 %v1354_v55  ;;  %v1475_v54 = vor.u32 %v1723_v43, %v1472_v44  ;;  %v1716_v55 = vld [vmem:[%s2560_s0 + $0x1b4] sm:$0xf]  ;;  %v1439_v61 = vor.u32 %v1719_v50, %v1438_v49  ;;  %v951_v43 = vunpack.c.h.b16 %v1563_v30  ;;  %v1746_v44 = vld [vmem:[%s2560_s0 + $0x2bc] sm:$0xf]  ;;  %v1122_v49 = vld [vmem:[%s2562_s2] sm:$0xff]  ;;  %v1479_v50 = vor.u32 %v1727_v35, %v1478_v34 }
  0x3d   :  { %v1443_v0 = vor.u32 %v1716_v55, %v1440_v56  ;;  %v1718_v56 = vld [vmem:[%s2560_s0 + $0x1c4] sm:$0xf]  ;;  %v1633_v30 = vld [vmem:[%s2560_s0 + $0x310] sm:$0xf0]  ;;  %v1599_v34 = vld [vmem:[%s2560_s0 + $0x2c0] sm:$0xf] }
  0x3e   :  { %v1750_v35 = vld [vmem:[%s2560_s0 + $0x2d4] sm:$0xf0] }
  0x3f   :  { %507 = vmatpush.bf16.msra.mxu0 %v1318_v62  ;;  %521 = vmatpush.bf16.msra.mxu1 %v1322_v1  ;;  %v705_v62 = vpack.c.b16 %v675_v45, %v675_v45  ;;  %v978_v1 = vpack.c.b16 %v948_v51, %v948_v51  ;;  %v1593_v45 = vld [vmem:[%s2560_s0 + $0x2d0] sm:$0xf0]  ;;  %v1483_v51 = vor.u32 %v1724_v36, %v1480_v39  ;;  %v1601_v39 = vld [vmem:[%s2560_s0 + $0x2d8] sm:$0xf0] }
  0x40   :  { %535 = vmatpush.bf16.msra.mxu2 %v1326_v4  ;;  %549 = vmatpush.bf16.msra.mxu3 %v1330_v5  ;;  %v1451_v4 = vor.u32 %v1717_v59, %v1448_v60  ;;  %v1526_v5 = vld [vmem:[%s2560_s0 + $0x250] sm:$0xf]  ;;  %v1596_v55 = vor.u32 %v1746_v44, %v1593_v45  ;;  %v980_v59 = vpack.c.b16 %v950_v42, %v950_v42  ;;  %v1748_v42 = vld [vmem:[%s2560_s0 + $0x2cc] sm:$0xf] }
  0x41   :  { %v744_v10 = vsel %vm188_vm0, %v705_v62, 0  ;;  %v1009_v14 = vsel %vm188_vm0, %v978_v1, 0  ;;  %v1527_v18 = vor.u32 %v1739_v6, %v1526_v5  ;;  %v981_v60 = vpack.c.b16 %v951_v43, %v951_v43  ;;  %v1740_v62 = vld [vmem:[%s2560_s0 + $0x28c] sm:$0xf]  ;;  %v1609_v43 = vld [vmem:[%s2560_s0 + $0x2e0] sm:$0xf0] }
  0x42   :  { %1405 = vmatmul.msk.bf16.vlgmr.msra.gmra.mxu0 %vm184_vm1, %v1905_v9  ;;  %1406 = vmatmul.msk.bf16.vlgmr.msra.gmra.mxu1 %vm184_vm1, %v1905_v9  ;;  %v1015_v6 = vsel %vm188_vm0, %v980_v59, 0  ;;  %v1600_v44 = vor.u32 %v1750_v35, %v1599_v34 }
  0x43   :  { %752 = vmatpush.bf16.msrb.mxu0 %v732_v11  ;;  %766 = vmatpush.bf16.msrb.mxu1 %v735_v12  ;;  %v747_v11 = vsel %vm188_vm0, %v706_v63, 0  ;;  %v1639_v12 = vld [vmem:[%s2560_s0 + $0x318] sm:$0xf]  ;;  %v1569_v63 = vld [vmem:[%s2560_s0 + $0x2a0] sm:$0xf0] }
  0x44   :  { %780 = vmatpush.bf16.msrb.mxu2 %v738_v15  ;;  %794 = vmatpush.bf16.msrb.mxu3 %v741_v16  ;;  %v1012_v15 = vsel %vm188_vm0, %v979_v2, 0  ;;  %v1758_v16 = vld [vmem:[%s2560_s0 + $0x31c] sm:$0xf]  ;;  %v1572_v5 = vor.u32 %v1740_v62, %v1569_v63 }
  0x45   :  { %1407 = vmatmul.msk.bf16.vlgmr.msra.gmra.mxu2 %vm184_vm1, %v1905_v9  ;;  %1408 = vmatmul.msk.bf16.vlgmr.msra.gmra.mxu3 %vm184_vm1, %v1905_v9 }
  0x47   :  { %753 = vmatpush.bf16.msrb.mxu0 %v1511_v19  ;;  %767 = vmatpush.bf16.msrb.mxu1 %v1515_v20  ;;  %v1531_v19 = vor.u32 %v1736_v7, %v1528_v8  ;;  %v1502_v20 = vld [vmem:[%s2560_s0 + $0x220] sm:$0xf]  ;;  %v1018_v7 = vsel %vm188_vm0, %v981_v60, 0 }
  0x48   :  { %781 = vmatpush.bf16.msrb.mxu2 %v1519_v23  ;;  %795 = vmatpush.bf16.msrb.mxu3 %v1523_v24  ;;  %v1640_v23 = vor.u32 %v1761_v13, %v1639_v12  ;;  %v1644_v24 = vor.u32 %v1758_v16, %v1641_v17  ;;  %v1762_v12 = vld [vmem:[%s2560_s0 + $0x334] sm:$0xf0]  ;;  %v1759_v13 = vld [vmem:[%s2560_s0 + $0x324] sm:$0xf]  ;;  %v1763_v16 = vld [vmem:[%s2560_s0 + $0x33c] sm:$0xf0] }
  0x49   :  { %v1760_v17 = vld [vmem:[%s2560_s0 + $0x32c] sm:$0xf] }
  0x4b   :  { %754 = vmatpush.bf16.msrb.mxu0 %v1487_v32  ;;  %768 = vmatpush.bf16.msrb.mxu1 %v1491_v33  ;;  %v1503_v32 = vor.u32 %v1733_v21, %v1502_v20  ;;  %v1507_v33 = vor.u32 %v1730_v22, %v1504_v25  ;;  %v1623_v21 = vld [vmem:[%s2560_s0 + $0x2f0] sm:$0xf]  ;;  %v1756_v22 = vld [vmem:[%s2560_s0 + $0x304] sm:$0xf0]  ;;  %v1753_v25 = vld [vmem:[%s2560_s0 + $0x2f4] sm:$0xf] }
  0x4c   :  { %782 = vmatpush.bf16.msrb.mxu2 %v1495_v37  ;;  %796 = vmatpush.bf16.msrb.mxu3 %v1499_v38  ;;  %v1616_v37 = vor.u32 %v1755_v27, %v1615_v26  ;;  %v1620_v38 = vor.u32 %v1752_v28, %v1617_v29  ;;  %v1625_v26 = vld [vmem:[%s2560_s0 + $0x308] sm:$0xf0]  ;;  %v1631_v27 = vld [vmem:[%s2560_s0 + $0x2f8] sm:$0xf]  ;;  %v1757_v28 = vld [vmem:[%s2560_s0 + $0x30c] sm:$0xf0] }
  0x4d   :  { %v1754_v29 = vld [vmem:[%s2560_s0 + $0x2fc] sm:$0xf]  ;;  %v1632_v36 = vor.u32 %v1757_v28, %v1631_v27 }
  0x4f   :  { %755 = vmatpush.bf16.msrb.mxu0 %v1463_v47  ;;  %769 = vmatpush.bf16.msrb.mxu1 %v1467_v48  ;;  %v953_v47 = vunpack.c.h.b16 %v1564_v31  ;;  %v1766_v48 = vmov 0   ;;  %v1123_v31 = vld [vmem:[%s2562_s2 + $0x8] sm:$0xff] }
  0x50   :  { %783 = vmatpush.bf16.msrb.mxu2 %v1471_v53  ;;  %797 = vmatpush.bf16.msrb.mxu3 %v1475_v54  ;;  %v1454_v53 = vld [vmem:[%s2560_s0 + $0x1c0] sm:$0xf]  ;;  %v1721_v54 = vld [vmem:[%s2560_s0 + $0x1d4] sm:$0xf0] }
  0x51   :  { %1765 = vset.pattern.permute.xlu0 %v1766_v48  ;;  %v983_v1 = vpack.c.b16 %v953_v47, %v953_v47  ;;  %v1455_v2 = vor.u32 %v1721_v54, %v1454_v53  ;;  %v1744_v47 = vld [vmem:[%s2560_s0 + $0x2a4] sm:$0xf0]  ;;  %v1608_v48 = vor.u32 %v1751_v41, %v1607_v40  ;;  %v1745_v53 = vld [vmem:[%s2560_s0 + $0x2ac] sm:$0xf0]  ;;  %v1742_v54 = vld [vmem:[%s2560_s0 + $0x29c] sm:$0xf] }
  0x52   :  { %1126 = vperm.xlu0 %1765, %v1122_v49   ;;  %v1612_v49 = vor.u32 %v1748_v42, %v1609_v43 }
  0x53   :  { %756 = vmatpush.bf16.msrb.mxu0 %v1439_v61  ;;  %770 = vmatpush.bf16.msrb.mxu1 %v1443_v0  ;;  %v1743_v61 = vld [vmem:[%s2560_s0 + $0x29c] sm:$0xf0]  ;;  %v982_v0 = vpack.c.b16 %v952_v46, %v952_v46  ;;  %v1575_v46 = vld [vmem:[%s2560_s0 + $0x290] sm:$0xf] }
  0x54   :  { %784 = vmatpush.bf16.msrb.mxu2 %v1447_v3  ;;  %798 = vmatpush.bf16.msrb.mxu3 %v1451_v4  ;;  %v1459_v3 = vor.u32 %v1718_v56, %v1456_v57  ;;  %v1568_v4 = vor.u32 %v1743_v61, %v1567_v58  ;;  %v1576_v56 = vor.u32 %v1744_v47, %v1575_v46 }
  0x55   :  { %v1021_v8 = vsel %vm188_vm0, %v982_v0, 0 }
  0x56   :  { %1532 = vmatmul.msk.bf16.vlgmr.msrb.gmra.mxu0 %vm184_vm1, %v1905_v9  ;;  %1533 = vmatmul.msk.bf16.vlgmr.msrb.gmra.mxu1 %vm184_vm1, %v1905_v9 }
  0x57   :  { %808 = vmatpush.bf16.msra.mxu0 %v744_v10  ;;  %822 = vmatpush.bf16.msra.mxu1 %v747_v11  ;;  %v1024_v10 = vsel %vm188_vm0, %v983_v1, 0  ;;  %v1647_v11 = vld [vmem:[%s2560_s0 + $0x320] sm:$0xf] }
  0x58   :  { %1029 = vmatpush.bf16.msra.mxu2 %v1009_v14  ;;  %1043 = vmatpush.bf16.msra.mxu3 %v1012_v15  ;;  %v1649_v14 = vld [vmem:[%s2560_s0 + $0x338] sm:$0xf0]  ;;  %v1655_v15 = vld [vmem:[%s2560_s0 + $0x328] sm:$0xf] }
  0x59   :  { %1534 = vmatmul.msk.bf16.vlgmr.msrb.gmra.mxu2 %vm184_vm1, %v1905_v9  ;;  %1535 = vmatmul.msk.bf16.vlgmr.msrb.gmra.mxu3 %vm184_vm1, %v1905_v9  ;;  %v1652_v20 = vor.u32 %v1759_v13, %v1649_v14 }
  0x5a   :  { %1131 = vperm.xlu0 %1765, %v1123_v31  }
  0x5b   :  { %809 = vmatpush.bf16.msra.mxu0 %v1527_v18  ;;  %823 = vmatpush.bf16.msra.mxu1 %v1531_v19  ;;  %v1657_v18 = vld [vmem:[%s2560_s0 + $0x340] sm:$0xf0]  ;;  %v1648_v19 = vor.u32 %v1762_v12, %v1647_v11 }
  0x5c   :  { %1030 = vmatpush.bf16.msra.mxu2 %v1640_v23  ;;  %1044 = vmatpush.bf16.msra.mxu3 %v1644_v24  ;;  %v1656_v23 = vor.u32 %v1763_v16, %v1655_v15  ;;  %v1660_v24 = vor.u32 %v1760_v17, %v1657_v18 }
  0x5f   :  { %810 = vmatpush.bf16.msra.mxu0 %v1503_v32  ;;  %824 = vmatpush.bf16.msra.mxu1 %v1507_v33  ;;  %v1624_v32 = vor.u32 %v1756_v22, %v1623_v21  ;;  %v1628_v33 = vor.u32 %v1753_v25, %v1625_v26 }
  0x60   :  { %1031 = vmatpush.bf16.msra.mxu2 %v1616_v37  ;;  %1045 = vmatpush.bf16.msra.mxu3 %v1620_v38  ;;  %v1636_v37 = vor.u32 %v1754_v29, %v1633_v30  ;;  %v1747_v38 = vld [vmem:[%s2560_s0 + $0x2c4] sm:$0xf] }
  0x61   :  { %v1604_v45 = vor.u32 %v1747_v38, %v1601_v39 }
  0x63   :  { %811 = vmatpush.bf16.msra.mxu0 %v1479_v50  ;;  %825 = vmatpush.bf16.msra.mxu1 %v1483_v51  ;;  %v1741_v50 = vld [vmem:[%s2560_s0 + $0x294] sm:$0xf]  ;;  %v1577_v51 = vld [vmem:[%s2560_s0 + $0x2a8] sm:$0xf0] }
  0x64   :  { %1032 = vmatpush.bf16.msra.mxu2 %v1592_v52  ;;  %1046 = vmatpush.bf16.msra.mxu3 %v1596_v55  ;;  %v1583_v52 = vld [vmem:[%s2560_s0 + $0x298] sm:$0xf]  ;;  %v1585_v55 = vld [vmem:[%s2560_s0 + $0x2b0] sm:$0xf0]  ;;  %v1580_v57 = vor.u32 %v1741_v50, %v1577_v51 }
  0x65   :  { %v1584_v58 = vor.u32 %v1745_v53, %v1583_v52  ;;  %v1588_v59 = vor.u32 %v1742_v54, %v1585_v55 }
  0x67   :  { %812 = vmatpush.bf16.msra.mxu0 %v1455_v2  ;;  %826 = vmatpush.bf16.msra.mxu1 %v1459_v3 }
  0x68   :  { %1033 = vmatpush.bf16.msra.mxu2 %v1568_v4  ;;  %1047 = vmatpush.bf16.msra.mxu3 %v1572_v5 }
  0x6a   :  { %1536 = vmatmul.msk.bf16.vlgmr.msra.gmra.mxu0 %vm184_vm1, %v1905_v9  ;;  %1537 = vmatmul.msk.bf16.vlgmr.msra.gmra.mxu1 %vm184_vm1, %v1905_v9 }
  0x6b   :  { %1057 = vmatpush.bf16.msrb.mxu0 %v1015_v6  ;;  %1071 = vmatpush.bf16.msrb.mxu1 %v1018_v7 }
  0x6c   :  { %1085 = vmatpush.bf16.msrb.mxu2 %v1021_v8  ;;  %1099 = vmatpush.bf16.msrb.mxu3 %v1024_v10 }
  0x6d   :  { %1661 = vmatmul.msk.bf16.vlgmr.msra.gmra.mxu2 %vm184_vm1, %v1905_v9  ;;  %1662 = vmatmul.msk.bf16.vlgmr.msra.gmra.mxu3 %vm184_vm1, %v1905_v9 }
  0x6f   :  { %1058 = vmatpush.bf16.msrb.mxu0 %v1648_v19  ;;  %1072 = vmatpush.bf16.msrb.mxu1 %v1652_v20 }
  0x70   :  { %1086 = vmatpush.bf16.msrb.mxu2 %v1656_v23  ;;  %1100 = vmatpush.bf16.msrb.mxu3 %v1660_v24 }
  0x73   :  { %1059 = vmatpush.bf16.msrb.mxu0 %v1624_v32  ;;  %1073 = vmatpush.bf16.msrb.mxu1 %v1628_v33 }
  0x74   :  { %1087 = vmatpush.bf16.msrb.mxu2 %v1632_v36  ;;  %1101 = vmatpush.bf16.msrb.mxu3 %v1636_v37 }
  0x77   :  { %1060 = vmatpush.bf16.msrb.mxu0 %v1600_v44  ;;  %1074 = vmatpush.bf16.msrb.mxu1 %v1604_v45 }
  0x78   :  { %1088 = vmatpush.bf16.msrb.mxu2 %v1608_v48  ;;  %1102 = vmatpush.bf16.msrb.mxu3 %v1612_v49 }
  0x7b   :  { %1061 = vmatpush.bf16.msrb.mxu0 %v1576_v56  ;;  %1075 = vmatpush.bf16.msrb.mxu1 %v1580_v57 }
  0x7c   :  { %1089 = vmatpush.bf16.msrb.mxu2 %v1584_v58  ;;  %1103 = vmatpush.bf16.msrb.mxu3 %v1588_v59 }
  0x7e   :  { %1663 = vmatmul.msk.bf16.vlgmr.msrb.gmra.mxu0 %vm184_vm1, %v1905_v9  ;;  %1664 = vmatmul.msk.bf16.vlgmr.msrb.gmra.mxu1 %vm184_vm1, %v1905_v9 }
  0x7f   :  { %1665 = vmatmul.msk.bf16.vlgmr.msrb.gmra.mxu2 %vm184_vm1, %v1905_v9  ;;  %1666 = vmatmul.msk.bf16.vlgmr.msrb.gmra.mxu3 %vm184_vm1, %v1905_v9 }
  0x97   :  { %v216_v60 = vpop.f32.mrf.mxu0  ;;  %v230_v61 = vpop.f32.mrf.mxu1 }
  0x9f   :  { %v218_v0 = vpop.f32.mrf.mxu0  ;;  %v232_v1 = vpop.f32.mrf.mxu1 }
  0xa0   :  { %v244_v62 = vpop.f32.mrf.mxu2  ;;  %v258_v63 = vpop.f32.mrf.mxu3 }
  0xa8   :  { %v2482_v2 = vpop.f32.mrf.mxu2  ;;  %v2484_v3 = vpop.f32.mrf.mxu3 }
  0xab   :  { %v2486_v4 = vpop.f32.mrf.mxu0  ;;  %v2488_v5 = vpop.f32.mrf.mxu1 }
  0xb3   :  { %v2490_v8 = vpop.f32.mrf.mxu0  ;;  %v2492_v10 = vpop.f32.mrf.mxu1 }
  0xb4   :  { %v481_v6 = vpop.f32.mrf.mxu2  ;;  %v495_v7 = vpop.f32.mrf.mxu3 }
  0xb5   :  { %v556_v30 = vmax.f32 %v216_v60, %v481_v6  ;;  %v557_v31 = vmax.f32 %v230_v61, %v495_v7 }
  0xbc   :  { %v483_v9 = vpop.f32.mrf.mxu2  ;;  %v497_v11 = vpop.f32.mrf.mxu3 }
  0xbd   :  { %v562_v43 = vmax.f32 %v218_v0, %v483_v9  ;;  %v563_v44 = vmax.f32 %v232_v1, %v497_v11 }
  0xbf   :  { %v509_v12 = vpop.f32.mrf.mxu0  ;;  %v523_v13 = vpop.f32.mrf.mxu1 }
  0xc0   :  { %v558_v47 = vmax.f32 %v244_v62, %v509_v12  ;;  %v559_v48 = vmax.f32 %v258_v63, %v523_v13 }
  0xc4   :  { %v1127_v32 = vpop.permute.xlu0 %1126 }
  0xc7   :  { %v2498_v16 = vpop.f32.mrf.mxu0  ;;  %v2500_v17 = vpop.f32.mrf.mxu1 }
  0xc8   :  { %v2494_v14 = vpop.f32.mrf.mxu2  ;;  %v2496_v15 = vpop.f32.mrf.mxu3  ;;  %v564_v12 = vmax.f32 %v2482_v2, %v2498_v16  ;;  %v565_v13 = vmax.f32 %v2484_v3, %v2500_v17 }
  0xc9   :  { %v560_v9 = vmax.f32 %v2486_v4, %v2494_v14  ;;  %v561_v11 = vmax.f32 %v2488_v5, %v2496_v15 }
  0xcc   :  { %v1132_v51 = vpop.permute.xlu0 %1131 }
  0xd0   :  { %v2502_v18 = vpop.f32.mrf.mxu2  ;;  %v2504_v19 = vpop.f32.mrf.mxu3 }
  0xd3   :  { %v758_v20 = vpop.f32.mrf.mxu0  ;;  %v772_v21 = vpop.f32.mrf.mxu1 }
  0xd4   :  { %v833_v33 = vmax.f32 %v556_v30, %v758_v20  ;;  %v834_v34 = vmax.f32 %v557_v31, %v772_v21  ;;  %v566_v30 = vmax.f32 %v2490_v8, %v2502_v18  ;;  %v567_v31 = vmax.f32 %v2492_v10, %v2504_v19 }
  0xdb   :  { %v760_v24 = vpop.f32.mrf.mxu0  ;;  %v774_v25 = vpop.f32.mrf.mxu1 }
  0xdc   :  { %v786_v22 = vpop.f32.mrf.mxu2  ;;  %v800_v23 = vpop.f32.mrf.mxu3  ;;  %v839_v49 = vmax.f32 %v562_v43, %v760_v24  ;;  %v840_v50 = vmax.f32 %v563_v44, %v774_v25 }
  0xdd   :  { %v835_v54 = vmax.f32 %v558_v47, %v786_v22  ;;  %v836_v55 = vmax.f32 %v559_v48, %v800_v23 }
  0xe4   :  { %v788_v26 = vpop.f32.mrf.mxu2  ;;  %v802_v27 = vpop.f32.mrf.mxu3 }
  0xe5   :  { %v841_v4 = vmax.f32 %v564_v12, %v788_v26  ;;  %v842_v5 = vmax.f32 %v565_v13, %v802_v27 }
  0xe7   :  { %v814_v28 = vpop.f32.mrf.mxu0  ;;  %v828_v29 = vpop.f32.mrf.mxu1 }
  0xe8   :  { %v837_v22 = vmax.f32 %v560_v9, %v814_v28  ;;  %v838_v23 = vmax.f32 %v561_v11, %v828_v29 }
  0xef   :  { %v2506_v39 = vpop.f32.mrf.mxu0  ;;  %v2508_v40 = vpop.f32.mrf.mxu1 }
  0xf0   :  { %v1035_v35 = vpop.f32.mrf.mxu2  ;;  %v1049_v36 = vpop.f32.mrf.mxu3 }
  0xf1   :  { %v1110_v37 = vmax.f32 %v833_v33, %v1035_v35  ;;  %v1111_v38 = vmax.f32 %v834_v34, %v1049_v36 }
  0xf3   :  { %v1134_v41 = vadd.f32 %v1127_v32, %v1110_v37  ;;  %v1135_v42 = vadd.f32 %v1127_v32, %v1111_v38  ;;  %v843_v37 = vmax.f32 %v566_v30, %v2506_v39  ;;  %v844_v38 = vmax.f32 %v567_v31, %v2508_v40 }
  0xf5   :  { %v1146_v45 = vmax.f32 %v1134_v41, 0.0  ;;  %v1147_v46 = vmax.f32 %v1135_v42, 0.0 }
  0xf7   :  { %1158 = vst [vmem:[%s2563_s3] sm:$0xff] %v1146_v45 }
  0xf8   :  { %1159 = vst [vmem:[%s2563_s3 + $0x8] sm:$0xff] %v1147_v46  ;;  %v1037_v52 = vpop.f32.mrf.mxu2  ;;  %v1051_v53 = vpop.f32.mrf.mxu3 }
  0xf9   :  { %v1116_v56 = vmax.f32 %v839_v49, %v1037_v52  ;;  %v1117_v57 = vmax.f32 %v840_v50, %v1051_v53 }
  0xfb   :  { %v1063_v58 = vpop.f32.mrf.mxu0  ;;  %v1077_v59 = vpop.f32.mrf.mxu1  ;;  %v1140_v60 = vadd.f32 %v1132_v51, %v1116_v56  ;;  %v1141_v61 = vadd.f32 %v1132_v51, %v1117_v57 }
  0xfc   :  { %v1112_v62 = vmax.f32 %v835_v54, %v1063_v58  ;;  %v1113_v63 = vmax.f32 %v836_v55, %v1077_v59 }
  0xfd   :  { %v1152_v0 = vmax.f32 %v1140_v60, 0.0  ;;  %v1153_v1 = vmax.f32 %v1141_v61, 0.0 }
  0xfe   :  { %v1136_v6 = vadd.f32 %v1127_v32, %v1112_v62  ;;  %v1137_v7 = vadd.f32 %v1127_v32, %v1113_v63 }
  0xff   :  { %1164 = vst [vmem:[%s2563_s3 + $0x30] sm:$0xff] %v1152_v0 }
 0x100   :  { %v1148_v20 = vmax.f32 %v1136_v6, 0.0  ;;  %v1149_v21 = vmax.f32 %v1137_v7, 0.0  ;;  %1165 = vst [vmem:[%s2563_s3 + $0x38] sm:$0xff] %v1153_v1 }
 0x102   :  { %1160 = vst [vmem:[%s2563_s3 + $0x10] sm:$0xff] %v1148_v20  ;;  %v1091_v2 = vpop.f32.mrf.mxu2  ;;  %v1105_v3 = vpop.f32.mrf.mxu3 }
 0x103   :  { %1161 = vst [vmem:[%s2563_s3 + $0x18] sm:$0xff] %v1149_v21  ;;  %v1114_v14 = vmax.f32 %v837_v22, %v1091_v2  ;;  %v1115_v15 = vmax.f32 %v838_v23, %v1105_v3  ;;  %v1065_v16 = vpop.f32.mrf.mxu0  ;;  %v1079_v17 = vpop.f32.mrf.mxu1 }
 0x104   :  { %v1118_v24 = vmax.f32 %v841_v4, %v1065_v16  ;;  %v1119_v25 = vmax.f32 %v842_v5, %v1079_v17 }
 0x105   :  { %v1138_v28 = vadd.f32 %v1127_v32, %v1114_v14  ;;  %v1139_v29 = vadd.f32 %v1127_v32, %v1115_v15 }
 0x106   :  { %v1142_v26 = vadd.f32 %v1132_v51, %v1118_v24  ;;  %v1143_v27 = vadd.f32 %v1132_v51, %v1119_v25 }
 0x107   :  { %v1150_v33 = vmax.f32 %v1138_v28, 0.0  ;;  %v1151_v34 = vmax.f32 %v1139_v29, 0.0 }
 0x108   :  { %v1154_v35 = vmax.f32 %v1142_v26, 0.0  ;;  %v1155_v36 = vmax.f32 %v1143_v27, 0.0 }
 0x109   :  { %1162 = vst [vmem:[%s2563_s3 + $0x20] sm:$0xff] %v1150_v33 }
 0x10a   :  { %1163 = vst [vmem:[%s2563_s3 + $0x28] sm:$0xff] %v1151_v34  ;;  %v1093_v8 = vpop.f32.mrf.mxu2  ;;  %v1107_v18 = vpop.f32.mrf.mxu3 }
 0x10b   :  { %1166 = vst [vmem:[%s2563_s3 + $0x40] sm:$0xff] %v1154_v35  ;;  %v1120_v10 = vmax.f32 %v843_v37, %v1093_v8  ;;  %v1121_v19 = vmax.f32 %v844_v38, %v1107_v18 }
 0x10c   :  { %1167 = vst [vmem:[%s2563_s3 + $0x48] sm:$0xff] %v1155_v36 }
 0x10d   :  { %v1144_v32 = vadd.f32 %v1132_v51, %v1120_v10  ;;  %v1145_v39 = vadd.f32 %v1132_v51, %v1121_v19 }
 0x10f   :  { %v1156_v40 = vmax.f32 %v1144_v32, 0.0  ;;  %v1157_v41 = vmax.f32 %v1145_v39, 0.0 }
 0x111   :  { %1168 = vst [vmem:[%s2563_s3 + $0x50] sm:$0xff] %v1156_v40 }
 0x112   :  { %1169 = vst [vmem:[%s2563_s3 + $0x58] sm:$0xff] %v1157_v41 }

// kernel: ilnet_forward.4
= control target key start
LH: loop header
LB: loop body
LE: loop exit
PB: predicated region body
PF: predicated region fallthrough
CT: control target
= control target key end

     0   :  { %vm388_vm0 = vcmask 195584   ;;  %s2341_s2 = inlined_call_operand.vmem [shape: f32[2712,128], index: 2, kind: input, shape index: {}]   ;;  %s2342_s0 = inlined_call_operand.vmem [shape: f32[8,2712], index: 0, kind: input, shape index: {}]   ;;  %s2343_s3 = inlined_call_operand.vmem [shape: f32[1,128], index: 3, kind: input, shape index: {}]   ;;  %s2344_s1 = inlined_call_operand.vmem [shape: f32[8,1], index: 1, kind: input, shape index: {}]   ;;  %s2345_s4 = inlined_call_operand.vmem [shape: f32[128,512], index: 4, kind: input, shape index: {}]   ;;  %s2346_s5 = inlined_call_operand.vmem [shape: f32[1,512], index: 5, kind: input, shape index: {}]   ;;  %s2347_s6 = inlined_call_operand.vmem [shape: f32[8,512], index: 6, kind: output, shape index: {}]  }
   0x1   :  { %v60_v0 = vld [vmem:[%s2341_s2 + $0x78] sm:$0xff]  ;;  %v59_v2 = vld [vmem:[%s2341_s2 + $0x70] sm:$0xff]  ;;  %v58_v6 = vld [vmem:[%s2341_s2 + $0x68] sm:$0xff] }
   0x2   :  { %v92_v1 = vld [vmem:[%s2341_s2 + $0x178] sm:$0xff]  ;;  %392 = vmatpush.msra.mxu0 %v60_v0  ;;  %v91_v4 = vld [vmem:[%s2341_s2 + $0x170] sm:$0xff]  ;;  %v90_v8 = vld [vmem:[%s2341_s2 + $0x168] sm:$0xff] }
   0x3   :  { %432 = vmatpush.msra.mxu2 %v92_v1  ;;  %v76_v3 = vld [vmem:[%s2341_s2 + $0xf8] sm:$0xff]  ;;  %v75_v7 = vld [vmem:[%s2341_s2 + $0xf0] sm:$0xff]  ;;  %v74_v10 = vld [vmem:[%s2341_s2 + $0xe8] sm:$0xff] }
   0x4   :  { %v108_v5 = vld [vmem:[%s2341_s2 + $0x1f8] sm:$0xff]  ;;  %412 = vmatpush.msra.mxu1 %v76_v3  ;;  %393 = vmatpush.msra.mxu0 %v59_v2  ;;  %v107_v9 = vld [vmem:[%s2341_s2 + $0x1f0] sm:$0xff]  ;;  %v57_v11 = vld [vmem:[%s2341_s2 + $0x60] sm:$0xff] }
   0x5   :  { %452 = vmatpush.msra.mxu3 %v108_v5  ;;  %433 = vmatpush.msra.mxu2 %v91_v4  ;;  %v89_v12 = vld [vmem:[%s2341_s2 + $0x160] sm:$0xff]  ;;  %v106_v13 = vld [vmem:[%s2341_s2 + $0x1e8] sm:$0xff]  ;;  %v56_v16 = vld [vmem:[%s2341_s2 + $0x58] sm:$0xff] }
   0x6   :  { %413 = vmatpush.msra.mxu1 %v75_v7  ;;  %394 = vmatpush.msra.mxu0 %v58_v6  ;;  %v73_v14 = vld [vmem:[%s2341_s2 + $0xe0] sm:$0xff]  ;;  %v88_v17 = vld [vmem:[%s2341_s2 + $0x158] sm:$0xff]  ;;  %v55_v20 = vld [vmem:[%s2341_s2 + $0x50] sm:$0xff] }
   0x7   :  { %453 = vmatpush.msra.mxu3 %v107_v9  ;;  %434 = vmatpush.msra.mxu2 %v90_v8  ;;  %v105_v15 = vld [vmem:[%s2341_s2 + $0x1e0] sm:$0xff]  ;;  %v72_v18 = vld [vmem:[%s2341_s2 + $0xd8] sm:$0xff]  ;;  %v87_v21 = vld [vmem:[%s2341_s2 + $0x150] sm:$0xff] }
   0x8   :  { %414 = vmatpush.msra.mxu1 %v74_v10  ;;  %395 = vmatpush.msra.mxu0 %v57_v11  ;;  %v104_v19 = vld [vmem:[%s2341_s2 + $0x1d8] sm:$0xff]  ;;  %v71_v22 = vld [vmem:[%s2341_s2 + $0xd0] sm:$0xff]  ;;  %v54_v24 = vld [vmem:[%s2341_s2 + $0x48] sm:$0xff] }
   0x9   :  { %454 = vmatpush.msra.mxu3 %v106_v13  ;;  %435 = vmatpush.msra.mxu2 %v89_v12  ;;  %v103_v23 = vld [vmem:[%s2341_s2 + $0x1d0] sm:$0xff]  ;;  %v86_v25 = vld [vmem:[%s2341_s2 + $0x148] sm:$0xff]  ;;  %v53_v28 = vld [vmem:[%s2341_s2 + $0x40] sm:$0xff] }
   0xa   :  { %415 = vmatpush.msra.mxu1 %v73_v14  ;;  %396 = vmatpush.msra.mxu0 %v56_v16  ;;  %v70_v26 = vld [vmem:[%s2341_s2 + $0xc8] sm:$0xff]  ;;  %v85_v29 = vld [vmem:[%s2341_s2 + $0x140] sm:$0xff]  ;;  %v52_v32 = vld [vmem:[%s2341_s2 + $0x38] sm:$0xff] }
   0xb   :  { %455 = vmatpush.msra.mxu3 %v105_v15  ;;  %436 = vmatpush.msra.mxu2 %v88_v17  ;;  %v102_v27 = vld [vmem:[%s2341_s2 + $0x1c8] sm:$0xff]  ;;  %v69_v30 = vld [vmem:[%s2341_s2 + $0xc0] sm:$0xff]  ;;  %v84_v33 = vld [vmem:[%s2341_s2 + $0x138] sm:$0xff] }
   0xc   :  { %416 = vmatpush.msra.mxu1 %v72_v18  ;;  %397 = vmatpush.msra.mxu0 %v55_v20  ;;  %v101_v31 = vld [vmem:[%s2341_s2 + $0x1c0] sm:$0xff]  ;;  %v68_v34 = vld [vmem:[%s2341_s2 + $0xb8] sm:$0xff]  ;;  %v51_v36 = vld [vmem:[%s2341_s2 + $0x30] sm:$0xff] }
   0xd   :  { %456 = vmatpush.msra.mxu3 %v104_v19  ;;  %437 = vmatpush.msra.mxu2 %v87_v21  ;;  %v100_v35 = vld [vmem:[%s2341_s2 + $0x1b8] sm:$0xff]  ;;  %v83_v37 = vld [vmem:[%s2341_s2 + $0x130] sm:$0xff]  ;;  %v50_v40 = vld [vmem:[%s2341_s2 + $0x28] sm:$0xff] }
   0xe   :  { %417 = vmatpush.msra.mxu1 %v71_v22  ;;  %398 = vmatpush.msra.mxu0 %v54_v24  ;;  %v67_v38 = vld [vmem:[%s2341_s2 + $0xb0] sm:$0xff]  ;;  %v82_v41 = vld [vmem:[%s2341_s2 + $0x128] sm:$0xff]  ;;  %v49_v44 = vld [vmem:[%s2341_s2 + $0x20] sm:$0xff] }
   0xf   :  { %457 = vmatpush.msra.mxu3 %v103_v23  ;;  %438 = vmatpush.msra.mxu2 %v86_v25  ;;  %v99_v39 = vld [vmem:[%s2341_s2 + $0x1b0] sm:$0xff]  ;;  %v66_v42 = vld [vmem:[%s2341_s2 + $0xa8] sm:$0xff]  ;;  %v81_v45 = vld [vmem:[%s2341_s2 + $0x120] sm:$0xff] }
  0x10   :  { %418 = vmatpush.msra.mxu1 %v70_v26  ;;  %399 = vmatpush.msra.mxu0 %v53_v28  ;;  %v98_v43 = vld [vmem:[%s2341_s2 + $0x1a8] sm:$0xff]  ;;  %v65_v46 = vld [vmem:[%s2341_s2 + $0xa0] sm:$0xff]  ;;  %v48_v48 = vld [vmem:[%s2341_s2 + $0x18] sm:$0xff] }
  0x11   :  { %458 = vmatpush.msra.mxu3 %v102_v27  ;;  %439 = vmatpush.msra.mxu2 %v85_v29  ;;  %v97_v47 = vld [vmem:[%s2341_s2 + $0x1a0] sm:$0xff]  ;;  %v80_v49 = vld [vmem:[%s2341_s2 + $0x118] sm:$0xff]  ;;  %v47_v52 = vld [vmem:[%s2341_s2 + $0x10] sm:$0xff] }
  0x12   :  { %419 = vmatpush.msra.mxu1 %v69_v30  ;;  %400 = vmatpush.msra.mxu0 %v52_v32  ;;  %v64_v50 = vld [vmem:[%s2341_s2 + $0x98] sm:$0xff]  ;;  %v79_v53 = vld [vmem:[%s2341_s2 + $0x110] sm:$0xff]  ;;  %v46_v56 = vld [vmem:[%s2341_s2 + $0x8] sm:$0xff] }
  0x13   :  { %459 = vmatpush.msra.mxu3 %v101_v31  ;;  %440 = vmatpush.msra.mxu2 %v84_v33  ;;  %v96_v51 = vld [vmem:[%s2341_s2 + $0x198] sm:$0xff]  ;;  %v63_v54 = vld [vmem:[%s2341_s2 + $0x90] sm:$0xff]  ;;  %v78_v57 = vld [vmem:[%s2341_s2 + $0x108] sm:$0xff] }
  0x14   :  { %420 = vmatpush.msra.mxu1 %v68_v34  ;;  %401 = vmatpush.msra.mxu0 %v51_v36  ;;  %v95_v55 = vld [vmem:[%s2341_s2 + $0x190] sm:$0xff]  ;;  %v62_v58 = vld [vmem:[%s2341_s2 + $0x88] sm:$0xff]  ;;  %v45_v60 = vld [vmem:[%s2341_s2] sm:$0xff] }
  0x15   :  { %460 = vmatpush.msra.mxu3 %v100_v35  ;;  %441 = vmatpush.msra.mxu2 %v83_v37  ;;  %v94_v59 = vld [vmem:[%s2341_s2 + $0x188] sm:$0xff]  ;;  %v77_v61 = vld [vmem:[%s2341_s2 + $0x100] sm:$0xff]  ;;  %v124_v62 = vld [vmem:[%s2341_s2 + $0x278] sm:$0xff] }
  0x16   :  { %421 = vmatpush.msra.mxu1 %v67_v38  ;;  %402 = vmatpush.msra.mxu0 %v50_v40  ;;  %v156_v63 = vld [vmem:[%s2341_s2 + $0x378] sm:$0xff]  ;;  %v61_v0 = vld [vmem:[%s2341_s2 + $0x80] sm:$0xff]  ;;  %v123_v2 = vld [vmem:[%s2341_s2 + $0x270] sm:$0xff] }
  0x17   :  { %461 = vmatpush.msra.mxu3 %v99_v39  ;;  %442 = vmatpush.msra.mxu2 %v82_v41  ;;  %v93_v1 = vld [vmem:[%s2341_s2 + $0x180] sm:$0xff]  ;;  %v140_v3 = vld [vmem:[%s2341_s2 + $0x2f8] sm:$0xff]  ;;  %v155_v4 = vld [vmem:[%s2341_s2 + $0x370] sm:$0xff] }
  0x18   :  { %422 = vmatpush.msra.mxu1 %v66_v42  ;;  %403 = vmatpush.msra.mxu0 %v49_v44  ;;  %v172_v5 = vld [vmem:[%s2341_s2 + $0x3f8] sm:$0xff]  ;;  %v122_v6 = vld [vmem:[%s2341_s2 + $0x268] sm:$0xff]  ;;  %v139_v7 = vld [vmem:[%s2341_s2 + $0x2f0] sm:$0xff] }
  0x19   :  { %462 = vmatpush.msra.mxu3 %v98_v43  ;;  %443 = vmatpush.msra.mxu2 %v81_v45  ;;  %v154_v8 = vld [vmem:[%s2341_s2 + $0x368] sm:$0xff]  ;;  %v171_v9 = vld [vmem:[%s2341_s2 + $0x3f0] sm:$0xff]  ;;  %v121_v10 = vld [vmem:[%s2341_s2 + $0x260] sm:$0xff] }
  0x1a   :  { %423 = vmatpush.msra.mxu1 %v65_v46  ;;  %404 = vmatpush.msra.mxu0 %v48_v48  ;;  %v138_v11 = vld [vmem:[%s2341_s2 + $0x2e8] sm:$0xff]  ;;  %v153_v12 = vld [vmem:[%s2341_s2 + $0x360] sm:$0xff]  ;;  %v120_v14 = vld [vmem:[%s2341_s2 + $0x258] sm:$0xff] }
  0x1b   :  { %463 = vmatpush.msra.mxu3 %v97_v47  ;;  %444 = vmatpush.msra.mxu2 %v80_v49  ;;  %v170_v13 = vld [vmem:[%s2341_s2 + $0x3e8] sm:$0xff]  ;;  %v137_v15 = vld [vmem:[%s2341_s2 + $0x2e0] sm:$0xff]  ;;  %v152_v16 = vld [vmem:[%s2341_s2 + $0x358] sm:$0xff] }
  0x1c   :  { %424 = vmatpush.msra.mxu1 %v64_v50  ;;  %405 = vmatpush.msra.mxu0 %v47_v52  ;;  %v169_v17 = vld [vmem:[%s2341_s2 + $0x3e0] sm:$0xff]  ;;  %v119_v18 = vld [vmem:[%s2341_s2 + $0x250] sm:$0xff]  ;;  %v136_v19 = vld [vmem:[%s2341_s2 + $0x2d8] sm:$0xff] }
  0x1d   :  { %464 = vmatpush.msra.mxu3 %v96_v51  ;;  %445 = vmatpush.msra.mxu2 %v79_v53  ;;  %v151_v20 = vld [vmem:[%s2341_s2 + $0x350] sm:$0xff]  ;;  %v168_v21 = vld [vmem:[%s2341_s2 + $0x3d8] sm:$0xff]  ;;  %v118_v22 = vld [vmem:[%s2341_s2 + $0x248] sm:$0xff] }
  0x1e   :  { %425 = vmatpush.msra.mxu1 %v63_v54  ;;  %406 = vmatpush.msra.mxu0 %v46_v56  ;;  %v135_v23 = vld [vmem:[%s2341_s2 + $0x2d0] sm:$0xff]  ;;  %v150_v24 = vld [vmem:[%s2341_s2 + $0x348] sm:$0xff]  ;;  %v117_v26 = vld [vmem:[%s2341_s2 + $0x240] sm:$0xff] }
  0x1f   :  { %465 = vmatpush.msra.mxu3 %v95_v55  ;;  %446 = vmatpush.msra.mxu2 %v78_v57  ;;  %v167_v25 = vld [vmem:[%s2341_s2 + $0x3d0] sm:$0xff]  ;;  %v134_v27 = vld [vmem:[%s2341_s2 + $0x2c8] sm:$0xff]  ;;  %v149_v28 = vld [vmem:[%s2341_s2 + $0x340] sm:$0xff] }
  0x20   :  { %426 = vmatpush.msra.mxu1 %v62_v58  ;;  %407 = vmatpush.msra.mxu0 %v45_v60  ;;  %v166_v29 = vld [vmem:[%s2341_s2 + $0x3c8] sm:$0xff]  ;;  %v116_v30 = vld [vmem:[%s2341_s2 + $0x238] sm:$0xff]  ;;  %v133_v31 = vld [vmem:[%s2341_s2 + $0x2c0] sm:$0xff] }
  0x21   :  { %466 = vmatpush.msra.mxu3 %v94_v59  ;;  %447 = vmatpush.msra.mxu2 %v77_v61  ;;  %v148_v32 = vld [vmem:[%s2341_s2 + $0x338] sm:$0xff]  ;;  %v165_v33 = vld [vmem:[%s2341_s2 + $0x3c0] sm:$0xff]  ;;  %v115_v34 = vld [vmem:[%s2341_s2 + $0x230] sm:$0xff] }
  0x22   :  { %472 = vmatpush.msrb.mxu0 %v124_v62  ;;  %427 = vmatpush.msra.mxu1 %v61_v0  ;;  %v132_v35 = vld [vmem:[%s2341_s2 + $0x2b8] sm:$0xff]  ;;  %v147_v36 = vld [vmem:[%s2341_s2 + $0x330] sm:$0xff]  ;;  %v114_v38 = vld [vmem:[%s2341_s2 + $0x228] sm:$0xff] }
  0x23   :  { %512 = vmatpush.msrb.mxu2 %v156_v63  ;;  %467 = vmatpush.msra.mxu3 %v93_v1  ;;  %v164_v37 = vld [vmem:[%s2341_s2 + $0x3b8] sm:$0xff]  ;;  %v131_v39 = vld [vmem:[%s2341_s2 + $0x2b0] sm:$0xff]  ;;  %v146_v40 = vld [vmem:[%s2341_s2 + $0x328] sm:$0xff] }
  0x24   :  { %473 = vmatpush.msrb.mxu0 %v123_v2  ;;  %492 = vmatpush.msrb.mxu1 %v140_v3  ;;  %v163_v41 = vld [vmem:[%s2341_s2 + $0x3b0] sm:$0xff]  ;;  %v113_v42 = vld [vmem:[%s2341_s2 + $0x220] sm:$0xff]  ;;  %v130_v43 = vld [vmem:[%s2341_s2 + $0x2a8] sm:$0xff] }
  0x25   :  { %513 = vmatpush.msrb.mxu2 %v155_v4  ;;  %532 = vmatpush.msrb.mxu3 %v172_v5  ;;  %v145_v44 = vld [vmem:[%s2341_s2 + $0x320] sm:$0xff]  ;;  %v162_v45 = vld [vmem:[%s2341_s2 + $0x3a8] sm:$0xff]  ;;  %v112_v46 = vld [vmem:[%s2341_s2 + $0x218] sm:$0xff] }
  0x26   :  { %474 = vmatpush.msrb.mxu0 %v122_v6  ;;  %493 = vmatpush.msrb.mxu1 %v139_v7  ;;  %v129_v47 = vld [vmem:[%s2341_s2 + $0x2a0] sm:$0xff]  ;;  %v144_v48 = vld [vmem:[%s2341_s2 + $0x318] sm:$0xff]  ;;  %v111_v50 = vld [vmem:[%s2341_s2 + $0x210] sm:$0xff] }
  0x27   :  { %514 = vmatpush.msrb.mxu2 %v154_v8  ;;  %533 = vmatpush.msrb.mxu3 %v171_v9  ;;  %v161_v49 = vld [vmem:[%s2341_s2 + $0x3a0] sm:$0xff]  ;;  %v128_v51 = vld [vmem:[%s2341_s2 + $0x298] sm:$0xff]  ;;  %v143_v52 = vld [vmem:[%s2341_s2 + $0x310] sm:$0xff] }
  0x28   :  { %475 = vmatpush.msrb.mxu0 %v121_v10  ;;  %494 = vmatpush.msrb.mxu1 %v138_v11  ;;  %v160_v53 = vld [vmem:[%s2341_s2 + $0x398] sm:$0xff]  ;;  %v110_v54 = vld [vmem:[%s2341_s2 + $0x208] sm:$0xff]  ;;  %v127_v55 = vld [vmem:[%s2341_s2 + $0x290] sm:$0xff] }
  0x29   :  { %515 = vmatpush.msrb.mxu2 %v153_v12  ;;  %534 = vmatpush.msrb.mxu3 %v170_v13  ;;  %v142_v56 = vld [vmem:[%s2341_s2 + $0x308] sm:$0xff]  ;;  %v159_v57 = vld [vmem:[%s2341_s2 + $0x390] sm:$0xff]  ;;  %v109_v59 = vld [vmem:[%s2341_s2 + $0x200] sm:$0xff] }
  0x2a   :  { %476 = vmatpush.msrb.mxu0 %v120_v14  ;;  %495 = vmatpush.msrb.mxu1 %v137_v15  ;;  %v25_v58 = vld [vmem:[%s2342_s0 + $0x10] sm:$0xff]  ;;  %v126_v60 = vld [vmem:[%s2341_s2 + $0x288] sm:$0xff]  ;;  %v141_v61 = vld [vmem:[%s2341_s2 + $0x300] sm:$0xff] }
  0x2b   :  { %516 = vmatpush.msrb.mxu2 %v152_v16  ;;  %535 = vmatpush.msrb.mxu3 %v169_v17  ;;  %v158_v62 = vld [vmem:[%s2341_s2 + $0x388] sm:$0xff]  ;;  %v23_v63 = vld [vmem:[%s2342_s0] sm:$0xff]  ;;  %v26_v0 = vld [vmem:[%s2342_s0 + $0x18] sm:$0xff] }
  0x2c   :  { %477 = vmatpush.msrb.mxu0 %v119_v18  ;;  %496 = vmatpush.msrb.mxu1 %v136_v19  ;;  %v188_v1 = vld [vmem:[%s2341_s2 + $0x478] sm:$0xff]  ;;  %v125_v3 = vld [vmem:[%s2341_s2 + $0x280] sm:$0xff]  ;;  %v24_v5 = vld [vmem:[%s2342_s0 + $0x8] sm:$0xff] }
  0x2d   :  { %517 = vmatpush.msrb.mxu2 %v151_v20  ;;  %536 = vmatpush.msrb.mxu3 %v168_v21  ;;  %v220_v2 = vld [vmem:[%s2341_s2 + $0x578] sm:$0xff]  ;;  %v157_v4 = vld [vmem:[%s2341_s2 + $0x380] sm:$0xff]  ;;  %v187_v6 = vld [vmem:[%s2341_s2 + $0x470] sm:$0xff] }
  0x2e   :  { %478 = vmatpush.msrb.mxu0 %v118_v22  ;;  %497 = vmatpush.msrb.mxu1 %v135_v23  ;;  %v204_v7 = vld [vmem:[%s2341_s2 + $0x4f8] sm:$0xff]  ;;  %v219_v8 = vld [vmem:[%s2341_s2 + $0x570] sm:$0xff]  ;;  %v186_v10 = vld [vmem:[%s2341_s2 + $0x468] sm:$0xff] }
  0x2f   :  { %518 = vmatpush.msrb.mxu2 %v150_v24  ;;  %537 = vmatpush.msrb.mxu3 %v167_v25  ;;  %v236_v9 = vld [vmem:[%s2341_s2 + $0x5f8] sm:$0xff]  ;;  %v203_v11 = vld [vmem:[%s2341_s2 + $0x4f0] sm:$0xff]  ;;  %v218_v12 = vld [vmem:[%s2341_s2 + $0x568] sm:$0xff] }
  0x30   :  { %479 = vmatpush.msrb.mxu0 %v117_v26  ;;  %498 = vmatpush.msrb.mxu1 %v134_v27  ;;  %v235_v13 = vld [vmem:[%s2341_s2 + $0x5f0] sm:$0xff]  ;;  %v185_v15 = vld [vmem:[%s2341_s2 + $0x460] sm:$0xff]  ;;  %v202_v16 = vld [vmem:[%s2341_s2 + $0x4e8] sm:$0xff] }
  0x31   :  { %519 = vmatpush.msrb.mxu2 %v149_v28  ;;  %538 = vmatpush.msrb.mxu3 %v166_v29  ;;  %v29_v14 = vld [vmem:[%s2342_s0 + $0x30] sm:$0xff]  ;;  %v217_v17 = vld [vmem:[%s2341_s2 + $0x560] sm:$0xff]  ;;  %v234_v18 = vld [vmem:[%s2341_s2 + $0x5e8] sm:$0xff] }
  0x32   :  { %480 = vmatpush.msrb.mxu0 %v116_v30  ;;  %499 = vmatpush.msrb.mxu1 %v133_v31  ;;  %v27_v19 = vld [vmem:[%s2342_s0 + $0x20] sm:$0xff]  ;;  %v30_v20 = vld [vmem:[%s2342_s0 + $0x38] sm:$0xff]  ;;  %v28_v25 = vld [vmem:[%s2342_s0 + $0x28] sm:$0xff] }
  0x33   :  { %520 = vmatpush.msrb.mxu2 %v148_v32  ;;  %539 = vmatpush.msrb.mxu3 %v165_v33  ;;  %v184_v21 = vld [vmem:[%s2341_s2 + $0x458] sm:$0xff]  ;;  %v201_v22 = vld [vmem:[%s2341_s2 + $0x4e0] sm:$0xff]  ;;  %v183_v26 = vld [vmem:[%s2341_s2 + $0x450] sm:$0xff] }
  0x34   :  { %481 = vmatpush.msrb.mxu0 %v115_v34  ;;  %500 = vmatpush.msrb.mxu1 %v132_v35  ;;  %v216_v23 = vld [vmem:[%s2341_s2 + $0x558] sm:$0xff]  ;;  %v233_v24 = vld [vmem:[%s2341_s2 + $0x5e0] sm:$0xff]  ;;  %v215_v28 = vld [vmem:[%s2341_s2 + $0x550] sm:$0xff] }
  0x35   :  { %521 = vmatpush.msrb.mxu2 %v147_v36  ;;  %540 = vmatpush.msrb.mxu3 %v164_v37  ;;  %v200_v27 = vld [vmem:[%s2341_s2 + $0x4d8] sm:$0xff]  ;;  %v182_v30 = vld [vmem:[%s2341_s2 + $0x448] sm:$0xff]  ;;  %v199_v31 = vld [vmem:[%s2341_s2 + $0x4d0] sm:$0xff] }
  0x36   :  { %482 = vmatpush.msrb.mxu0 %v114_v38  ;;  %501 = vmatpush.msrb.mxu1 %v131_v39  ;;  %v232_v29 = vld [vmem:[%s2341_s2 + $0x5d8] sm:$0xff]  ;;  %v214_v32 = vld [vmem:[%s2341_s2 + $0x548] sm:$0xff]  ;;  %v231_v33 = vld [vmem:[%s2341_s2 + $0x5d0] sm:$0xff] }
  0x37   :  { %522 = vmatpush.msrb.mxu2 %v146_v40  ;;  %541 = vmatpush.msrb.mxu3 %v163_v41  ;;  %v181_v34 = vld [vmem:[%s2341_s2 + $0x440] sm:$0xff]  ;;  %v198_v35 = vld [vmem:[%s2341_s2 + $0x4c8] sm:$0xff]  ;;  %v180_v38 = vld [vmem:[%s2341_s2 + $0x438] sm:$0xff] }
  0x38   :  { %483 = vmatpush.msrb.mxu0 %v113_v42  ;;  %502 = vmatpush.msrb.mxu1 %v130_v43  ;;  %v213_v36 = vld [vmem:[%s2341_s2 + $0x540] sm:$0xff]  ;;  %v230_v37 = vld [vmem:[%s2341_s2 + $0x5c8] sm:$0xff]  ;;  %v212_v40 = vld [vmem:[%s2341_s2 + $0x538] sm:$0xff] }
  0x39   :  { %523 = vmatpush.msrb.mxu2 %v145_v44  ;;  %542 = vmatpush.msrb.mxu3 %v162_v45  ;;  %v197_v39 = vld [vmem:[%s2341_s2 + $0x4c0] sm:$0xff]  ;;  %v179_v42 = vld [vmem:[%s2341_s2 + $0x430] sm:$0xff]  ;;  %v196_v43 = vld [vmem:[%s2341_s2 + $0x4b8] sm:$0xff] }
  0x3a   :  { %484 = vmatpush.msrb.mxu0 %v112_v46  ;;  %503 = vmatpush.msrb.mxu1 %v129_v47  ;;  %v229_v41 = vld [vmem:[%s2341_s2 + $0x5c0] sm:$0xff]  ;;  %v211_v44 = vld [vmem:[%s2341_s2 + $0x530] sm:$0xff]  ;;  %v228_v45 = vld [vmem:[%s2341_s2 + $0x5b8] sm:$0xff] }
  0x3b   :  { %524 = vmatpush.msrb.mxu2 %v144_v48  ;;  %543 = vmatpush.msrb.mxu3 %v161_v49  ;;  %v178_v46 = vld [vmem:[%s2341_s2 + $0x428] sm:$0xff]  ;;  %v195_v47 = vld [vmem:[%s2341_s2 + $0x4b0] sm:$0xff] }
  0x3c   :  { %485 = vmatpush.msrb.mxu0 %v111_v50  ;;  %504 = vmatpush.msrb.mxu1 %v128_v51  ;;  %v210_v48 = vld [vmem:[%s2341_s2 + $0x528] sm:$0xff]  ;;  %v227_v49 = vld [vmem:[%s2341_s2 + $0x5b0] sm:$0xff]  ;;  %v177_v50 = vld [vmem:[%s2341_s2 + $0x420] sm:$0xff] }
  0x3d   :  { %525 = vmatpush.msrb.mxu2 %v143_v52  ;;  %544 = vmatpush.msrb.mxu3 %v160_v53  ;;  %v194_v51 = vld [vmem:[%s2341_s2 + $0x4a8] sm:$0xff]  ;;  %v209_v52 = vld [vmem:[%s2341_s2 + $0x520] sm:$0xff] }
  0x3e   :  { %486 = vmatpush.msrb.mxu0 %v110_v54  ;;  %505 = vmatpush.msrb.mxu1 %v127_v55  ;;  %v226_v53 = vld [vmem:[%s2341_s2 + $0x5a8] sm:$0xff]  ;;  %v176_v54 = vld [vmem:[%s2341_s2 + $0x418] sm:$0xff]  ;;  %v193_v55 = vld [vmem:[%s2341_s2 + $0x4a0] sm:$0xff] }
  0x3f   :  { %526 = vmatpush.msrb.mxu2 %v142_v56  ;;  %545 = vmatpush.msrb.mxu3 %v159_v57  ;;  %v208_v56 = vld [vmem:[%s2341_s2 + $0x518] sm:$0xff]  ;;  %v225_v57 = vld [vmem:[%s2341_s2 + $0x5a0] sm:$0xff] }
  0x40   :  { %448 = vmatmul.f32.vlgmr.msra.gmra.mxu2 %v25_v58  ;;  %487 = vmatpush.msrb.mxu0 %v109_v59  ;;  %v175_v58 = vld [vmem:[%s2341_s2 + $0x410] sm:$0xff]  ;;  %v192_v59 = vld [vmem:[%s2341_s2 + $0x498] sm:$0xff] }
  0x41   :  { %506 = vmatpush.msrb.mxu1 %v126_v60  ;;  %527 = vmatpush.msrb.mxu2 %v141_v61  ;;  %v207_v60 = vld [vmem:[%s2341_s2 + $0x510] sm:$0xff]  ;;  %v224_v61 = vld [vmem:[%s2341_s2 + $0x598] sm:$0xff] }
  0x42   :  { %546 = vmatpush.msrb.mxu3 %v158_v62  ;;  %408 = vmatmul.f32.vlgmr.msra.gmra.mxu0 %v23_v63  ;;  %v174_v62 = vld [vmem:[%s2341_s2 + $0x408] sm:$0xff]  ;;  %v191_v63 = vld [vmem:[%s2341_s2 + $0x490] sm:$0xff] }
  0x43   :  { %468 = vmatmul.f32.vlgmr.msra.gmra.mxu3 %v26_v0  ;;  %552 = vmatpush.msra.mxu0 %v188_v1  ;;  %v206_v0 = vld [vmem:[%s2341_s2 + $0x508] sm:$0xff]  ;;  %v223_v1 = vld [vmem:[%s2341_s2 + $0x590] sm:$0xff] }
  0x44   :  { %592 = vmatpush.msra.mxu2 %v220_v2  ;;  %507 = vmatpush.msrb.mxu1 %v125_v3  ;;  %v173_v2 = vld [vmem:[%s2341_s2 + $0x400] sm:$0xff]  ;;  %v190_v3 = vld [vmem:[%s2341_s2 + $0x488] sm:$0xff] }
  0x45   :  { %547 = vmatpush.msrb.mxu3 %v157_v4  ;;  %428 = vmatmul.f32.vlgmr.msra.gmra.mxu1 %v24_v5  ;;  %v205_v4 = vld [vmem:[%s2341_s2 + $0x500] sm:$0xff]  ;;  %v222_v5 = vld [vmem:[%s2341_s2 + $0x588] sm:$0xff] }
  0x46   :  { %553 = vmatpush.msra.mxu0 %v187_v6  ;;  %572 = vmatpush.msra.mxu1 %v204_v7  ;;  %v31_v6 = vld [vmem:[%s2342_s0 + $0x40] sm:$0xff]  ;;  %v33_v7 = vld [vmem:[%s2342_s0 + $0x50] sm:$0xff] }
  0x47   :  { %593 = vmatpush.msra.mxu2 %v219_v8  ;;  %612 = vmatpush.msra.mxu3 %v236_v9  ;;  %v252_v8 = vld [vmem:[%s2341_s2 + $0x678] sm:$0xff] }
  0x48   :  { %554 = vmatpush.msra.mxu0 %v186_v10  ;;  %573 = vmatpush.msra.mxu1 %v203_v11  ;;  %v284_v9 = vld [vmem:[%s2341_s2 + $0x778] sm:$0xff]  ;;  %v189_v10 = vld [vmem:[%s2341_s2 + $0x480] sm:$0xff] }
  0x49   :  { %594 = vmatpush.msra.mxu2 %v218_v12  ;;  %613 = vmatpush.msra.mxu3 %v235_v13  ;;  %v221_v11 = vld [vmem:[%s2341_s2 + $0x580] sm:$0xff]  ;;  %v32_v12 = vld [vmem:[%s2342_s0 + $0x48] sm:$0xff]  ;;  %v34_v13 = vld [vmem:[%s2342_s0 + $0x58] sm:$0xff] }
  0x4a   :  { %528 = vmatmul.f32.vlgmr.msrb.gmra.mxu2 %v29_v14  ;;  %555 = vmatpush.msra.mxu0 %v185_v15  ;;  %v251_v14 = vld [vmem:[%s2341_s2 + $0x670] sm:$0xff]  ;;  %v268_v15 = vld [vmem:[%s2341_s2 + $0x6f8] sm:$0xff] }
  0x4b   :  { %574 = vmatpush.msra.mxu1 %v202_v16  ;;  %595 = vmatpush.msra.mxu2 %v217_v17  ;;  %v283_v16 = vld [vmem:[%s2341_s2 + $0x770] sm:$0xff]  ;;  %v300_v17 = vld [vmem:[%s2341_s2 + $0x7f8] sm:$0xff] }
  0x4c   :  { %614 = vmatpush.msra.mxu3 %v234_v18  ;;  %488 = vmatmul.f32.vlgmr.msrb.gmra.mxu0 %v27_v19  ;;  %v250_v18 = vld [vmem:[%s2341_s2 + $0x668] sm:$0xff]  ;;  %v267_v19 = vld [vmem:[%s2341_s2 + $0x6f0] sm:$0xff] }
  0x4d   :  { %548 = vmatmul.f32.vlgmr.msrb.gmra.mxu3 %v30_v20  ;;  %556 = vmatpush.msra.mxu0 %v184_v21  ;;  %v282_v20 = vld [vmem:[%s2341_s2 + $0x768] sm:$0xff]  ;;  %v299_v21 = vld [vmem:[%s2341_s2 + $0x7f0] sm:$0xff] }
  0x4e   :  { %575 = vmatpush.msra.mxu1 %v201_v22  ;;  %596 = vmatpush.msra.mxu2 %v216_v23  ;;  %v249_v22 = vld [vmem:[%s2341_s2 + $0x660] sm:$0xff]  ;;  %v266_v23 = vld [vmem:[%s2341_s2 + $0x6e8] sm:$0xff] }
  0x4f   :  { %615 = vmatpush.msra.mxu3 %v233_v24  ;;  %508 = vmatmul.f32.vlgmr.msrb.gmra.mxu1 %v28_v25  ;;  %v281_v24 = vld [vmem:[%s2341_s2 + $0x760] sm:$0xff]  ;;  %v298_v25 = vld [vmem:[%s2341_s2 + $0x7e8] sm:$0xff] }
  0x50   :  { %557 = vmatpush.msra.mxu0 %v183_v26  ;;  %576 = vmatpush.msra.mxu1 %v200_v27  ;;  %v248_v26 = vld [vmem:[%s2341_s2 + $0x658] sm:$0xff]  ;;  %v265_v27 = vld [vmem:[%s2341_s2 + $0x6e0] sm:$0xff] }
  0x51   :  { %597 = vmatpush.msra.mxu2 %v215_v28  ;;  %616 = vmatpush.msra.mxu3 %v232_v29  ;;  %v280_v28 = vld [vmem:[%s2341_s2 + $0x758] sm:$0xff]  ;;  %v297_v29 = vld [vmem:[%s2341_s2 + $0x7e0] sm:$0xff] }
  0x52   :  { %558 = vmatpush.msra.mxu0 %v182_v30  ;;  %577 = vmatpush.msra.mxu1 %v199_v31  ;;  %v247_v30 = vld [vmem:[%s2341_s2 + $0x650] sm:$0xff]  ;;  %v264_v31 = vld [vmem:[%s2341_s2 + $0x6d8] sm:$0xff] }
  0x53   :  { %598 = vmatpush.msra.mxu2 %v214_v32  ;;  %617 = vmatpush.msra.mxu3 %v231_v33  ;;  %v279_v32 = vld [vmem:[%s2341_s2 + $0x750] sm:$0xff]  ;;  %v296_v33 = vld [vmem:[%s2341_s2 + $0x7d8] sm:$0xff] }
  0x54   :  { %559 = vmatpush.msra.mxu0 %v181_v34  ;;  %578 = vmatpush.msra.mxu1 %v198_v35  ;;  %v246_v34 = vld [vmem:[%s2341_s2 + $0x648] sm:$0xff]  ;;  %v263_v35 = vld [vmem:[%s2341_s2 + $0x6d0] sm:$0xff] }
  0x55   :  { %599 = vmatpush.msra.mxu2 %v213_v36  ;;  %618 = vmatpush.msra.mxu3 %v230_v37  ;;  %v278_v36 = vld [vmem:[%s2341_s2 + $0x748] sm:$0xff]  ;;  %v295_v37 = vld [vmem:[%s2341_s2 + $0x7d0] sm:$0xff] }
  0x56   :  { %560 = vmatpush.msra.mxu0 %v180_v38  ;;  %579 = vmatpush.msra.mxu1 %v197_v39  ;;  %v245_v38 = vld [vmem:[%s2341_s2 + $0x640] sm:$0xff]  ;;  %v262_v39 = vld [vmem:[%s2341_s2 + $0x6c8] sm:$0xff] }
  0x57   :  { %600 = vmatpush.msra.mxu2 %v212_v40  ;;  %619 = vmatpush.msra.mxu3 %v229_v41  ;;  %v277_v40 = vld [vmem:[%s2341_s2 + $0x740] sm:$0xff]  ;;  %v294_v41 = vld [vmem:[%s2341_s2 + $0x7c8] sm:$0xff] }
  0x58   :  { %561 = vmatpush.msra.mxu0 %v179_v42  ;;  %580 = vmatpush.msra.mxu1 %v196_v43  ;;  %v244_v42 = vld [vmem:[%s2341_s2 + $0x638] sm:$0xff]  ;;  %v261_v43 = vld [vmem:[%s2341_s2 + $0x6c0] sm:$0xff] }
  0x59   :  { %601 = vmatpush.msra.mxu2 %v211_v44  ;;  %620 = vmatpush.msra.mxu3 %v228_v45  ;;  %v276_v44 = vld [vmem:[%s2341_s2 + $0x738] sm:$0xff]  ;;  %v293_v45 = vld [vmem:[%s2341_s2 + $0x7c0] sm:$0xff] }
  0x5a   :  { %562 = vmatpush.msra.mxu0 %v178_v46  ;;  %581 = vmatpush.msra.mxu1 %v195_v47  ;;  %v243_v46 = vld [vmem:[%s2341_s2 + $0x630] sm:$0xff]  ;;  %v260_v47 = vld [vmem:[%s2341_s2 + $0x6b8] sm:$0xff] }
  0x5b   :  { %602 = vmatpush.msra.mxu2 %v210_v48  ;;  %621 = vmatpush.msra.mxu3 %v227_v49  ;;  %v275_v48 = vld [vmem:[%s2341_s2 + $0x730] sm:$0xff]  ;;  %v292_v49 = vld [vmem:[%s2341_s2 + $0x7b8] sm:$0xff] }
  0x5c   :  { %563 = vmatpush.msra.mxu0 %v177_v50  ;;  %582 = vmatpush.msra.mxu1 %v194_v51  ;;  %v242_v50 = vld [vmem:[%s2341_s2 + $0x628] sm:$0xff]  ;;  %v259_v51 = vld [vmem:[%s2341_s2 + $0x6b0] sm:$0xff] }
  0x5d   :  { %603 = vmatpush.msra.mxu2 %v209_v52  ;;  %622 = vmatpush.msra.mxu3 %v226_v53  ;;  %v274_v52 = vld [vmem:[%s2341_s2 + $0x728] sm:$0xff]  ;;  %v291_v53 = vld [vmem:[%s2341_s2 + $0x7b0] sm:$0xff] }
  0x5e   :  { %564 = vmatpush.msra.mxu0 %v176_v54  ;;  %583 = vmatpush.msra.mxu1 %v193_v55  ;;  %v241_v54 = vld [vmem:[%s2341_s2 + $0x620] sm:$0xff]  ;;  %v258_v55 = vld [vmem:[%s2341_s2 + $0x6a8] sm:$0xff] }
  0x5f   :  { %604 = vmatpush.msra.mxu2 %v208_v56  ;;  %623 = vmatpush.msra.mxu3 %v225_v57  ;;  %v273_v56 = vld [vmem:[%s2341_s2 + $0x720] sm:$0xff]  ;;  %v290_v57 = vld [vmem:[%s2341_s2 + $0x7a8] sm:$0xff] }
  0x60   :  { %565 = vmatpush.msra.mxu0 %v175_v58  ;;  %584 = vmatpush.msra.mxu1 %v192_v59  ;;  %v240_v58 = vld [vmem:[%s2341_s2 + $0x618] sm:$0xff]  ;;  %v257_v59 = vld [vmem:[%s2341_s2 + $0x6a0] sm:$0xff] }
  0x61   :  { %605 = vmatpush.msra.mxu2 %v207_v60  ;;  %624 = vmatpush.msra.mxu3 %v224_v61  ;;  %v272_v60 = vld [vmem:[%s2341_s2 + $0x718] sm:$0xff]  ;;  %v289_v61 = vld [vmem:[%s2341_s2 + $0x7a0] sm:$0xff] }
  0x62   :  { %566 = vmatpush.msra.mxu0 %v174_v62  ;;  %585 = vmatpush.msra.mxu1 %v191_v63  ;;  %v239_v62 = vld [vmem:[%s2341_s2 + $0x610] sm:$0xff]  ;;  %v256_v63 = vld [vmem:[%s2341_s2 + $0x698] sm:$0xff] }
  0x63   :  { %606 = vmatpush.msra.mxu2 %v206_v0  ;;  %625 = vmatpush.msra.mxu3 %v223_v1  ;;  %v271_v0 = vld [vmem:[%s2341_s2 + $0x710] sm:$0xff]  ;;  %v288_v1 = vld [vmem:[%s2341_s2 + $0x798] sm:$0xff] }
  0x64   :  { %567 = vmatpush.msra.mxu0 %v173_v2  ;;  %586 = vmatpush.msra.mxu1 %v190_v3  ;;  %v238_v2 = vld [vmem:[%s2341_s2 + $0x608] sm:$0xff]  ;;  %v255_v3 = vld [vmem:[%s2341_s2 + $0x690] sm:$0xff] }
  0x65   :  { %607 = vmatpush.msra.mxu2 %v205_v4  ;;  %626 = vmatpush.msra.mxu3 %v222_v5  ;;  %v270_v4 = vld [vmem:[%s2341_s2 + $0x708] sm:$0xff]  ;;  %v287_v5 = vld [vmem:[%s2341_s2 + $0x790] sm:$0xff] }
  0x66   :  { %568 = vmatmul.f32.vlgmr.msra.gmra.mxu0 %v31_v6  ;;  %608 = vmatmul.f32.vlgmr.msra.gmra.mxu2 %v33_v7  ;;  %v237_v6 = vld [vmem:[%s2341_s2 + $0x600] sm:$0xff]  ;;  %v254_v7 = vld [vmem:[%s2341_s2 + $0x688] sm:$0xff] }
  0x67   :  { %632 = vmatpush.msrb.mxu0 %v252_v8  ;;  %672 = vmatpush.msrb.mxu2 %v284_v9  ;;  %v269_v8 = vld [vmem:[%s2341_s2 + $0x700] sm:$0xff]  ;;  %v286_v9 = vld [vmem:[%s2341_s2 + $0x788] sm:$0xff] }
  0x68   :  { %587 = vmatpush.msra.mxu1 %v189_v10  ;;  %627 = vmatpush.msra.mxu3 %v221_v11  ;;  %v35_v10 = vld [vmem:[%s2342_s0 + $0x60] sm:$0xff]  ;;  %v37_v11 = vld [vmem:[%s2342_s0 + $0x70] sm:$0xff] }
  0x69   :  { %588 = vmatmul.f32.vlgmr.msra.gmra.mxu1 %v32_v12  ;;  %628 = vmatmul.f32.vlgmr.msra.gmra.mxu3 %v34_v13  ;;  %v316_v12 = vld [vmem:[%s2341_s2 + $0x878] sm:$0xff] }
  0x6a   :  { %633 = vmatpush.msrb.mxu0 %v251_v14  ;;  %652 = vmatpush.msrb.mxu1 %v268_v15  ;;  %v348_v13 = vld [vmem:[%s2341_s2 + $0x978] sm:$0xff]  ;;  %v253_v14 = vld [vmem:[%s2341_s2 + $0x680] sm:$0xff] }
  0x6b   :  { %673 = vmatpush.msrb.mxu2 %v283_v16  ;;  %692 = vmatpush.msrb.mxu3 %v300_v17  ;;  %v285_v15 = vld [vmem:[%s2341_s2 + $0x780] sm:$0xff]  ;;  %v36_v16 = vld [vmem:[%s2342_s0 + $0x68] sm:$0xff]  ;;  %v38_v17 = vld [vmem:[%s2342_s0 + $0x78] sm:$0xff] }
  0x6c   :  { %634 = vmatpush.msrb.mxu0 %v250_v18  ;;  %653 = vmatpush.msrb.mxu1 %v267_v19  ;;  %v315_v18 = vld [vmem:[%s2341_s2 + $0x870] sm:$0xff]  ;;  %v332_v19 = vld [vmem:[%s2341_s2 + $0x8f8] sm:$0xff] }
  0x6d   :  { %674 = vmatpush.msrb.mxu2 %v282_v20  ;;  %693 = vmatpush.msrb.mxu3 %v299_v21  ;;  %v347_v20 = vld [vmem:[%s2341_s2 + $0x970] sm:$0xff]  ;;  %v364_v21 = vld [vmem:[%s2341_s2 + $0x9f8] sm:$0xff] }
  0x6e   :  { %635 = vmatpush.msrb.mxu0 %v249_v22  ;;  %654 = vmatpush.msrb.mxu1 %v266_v23  ;;  %v314_v22 = vld [vmem:[%s2341_s2 + $0x868] sm:$0xff]  ;;  %v331_v23 = vld [vmem:[%s2341_s2 + $0x8f0] sm:$0xff] }
  0x6f   :  { %675 = vmatpush.msrb.mxu2 %v281_v24  ;;  %694 = vmatpush.msrb.mxu3 %v298_v25  ;;  %v346_v24 = vld [vmem:[%s2341_s2 + $0x968] sm:$0xff]  ;;  %v363_v25 = vld [vmem:[%s2341_s2 + $0x9f0] sm:$0xff] }
  0x70   :  { %636 = vmatpush.msrb.mxu0 %v248_v26  ;;  %655 = vmatpush.msrb.mxu1 %v265_v27  ;;  %v313_v26 = vld [vmem:[%s2341_s2 + $0x860] sm:$0xff]  ;;  %v330_v27 = vld [vmem:[%s2341_s2 + $0x8e8] sm:$0xff] }
  0x71   :  { %676 = vmatpush.msrb.mxu2 %v280_v28  ;;  %695 = vmatpush.msrb.mxu3 %v297_v29  ;;  %v345_v28 = vld [vmem:[%s2341_s2 + $0x960] sm:$0xff]  ;;  %v362_v29 = vld [vmem:[%s2341_s2 + $0x9e8] sm:$0xff] }
  0x72   :  { %637 = vmatpush.msrb.mxu0 %v247_v30  ;;  %656 = vmatpush.msrb.mxu1 %v264_v31  ;;  %v312_v30 = vld [vmem:[%s2341_s2 + $0x858] sm:$0xff]  ;;  %v329_v31 = vld [vmem:[%s2341_s2 + $0x8e0] sm:$0xff] }
  0x73   :  { %677 = vmatpush.msrb.mxu2 %v279_v32  ;;  %696 = vmatpush.msrb.mxu3 %v296_v33  ;;  %v344_v32 = vld [vmem:[%s2341_s2 + $0x958] sm:$0xff]  ;;  %v361_v33 = vld [vmem:[%s2341_s2 + $0x9e0] sm:$0xff] }
  0x74   :  { %638 = vmatpush.msrb.mxu0 %v246_v34  ;;  %657 = vmatpush.msrb.mxu1 %v263_v35  ;;  %v311_v34 = vld [vmem:[%s2341_s2 + $0x850] sm:$0xff]  ;;  %v328_v35 = vld [vmem:[%s2341_s2 + $0x8d8] sm:$0xff] }
  0x75   :  { %678 = vmatpush.msrb.mxu2 %v278_v36  ;;  %697 = vmatpush.msrb.mxu3 %v295_v37  ;;  %v343_v36 = vld [vmem:[%s2341_s2 + $0x950] sm:$0xff]  ;;  %v360_v37 = vld [vmem:[%s2341_s2 + $0x9d8] sm:$0xff] }
  0x76   :  { %639 = vmatpush.msrb.mxu0 %v245_v38  ;;  %658 = vmatpush.msrb.mxu1 %v262_v39  ;;  %v310_v38 = vld [vmem:[%s2341_s2 + $0x848] sm:$0xff]  ;;  %v327_v39 = vld [vmem:[%s2341_s2 + $0x8d0] sm:$0xff] }
  0x77   :  { %679 = vmatpush.msrb.mxu2 %v277_v40  ;;  %698 = vmatpush.msrb.mxu3 %v294_v41  ;;  %v342_v40 = vld [vmem:[%s2341_s2 + $0x948] sm:$0xff]  ;;  %v359_v41 = vld [vmem:[%s2341_s2 + $0x9d0] sm:$0xff] }
  0x78   :  { %640 = vmatpush.msrb.mxu0 %v244_v42  ;;  %659 = vmatpush.msrb.mxu1 %v261_v43  ;;  %v309_v42 = vld [vmem:[%s2341_s2 + $0x840] sm:$0xff]  ;;  %v326_v43 = vld [vmem:[%s2341_s2 + $0x8c8] sm:$0xff] }
  0x79   :  { %680 = vmatpush.msrb.mxu2 %v276_v44  ;;  %699 = vmatpush.msrb.mxu3 %v293_v45  ;;  %v341_v44 = vld [vmem:[%s2341_s2 + $0x940] sm:$0xff]  ;;  %v358_v45 = vld [vmem:[%s2341_s2 + $0x9c8] sm:$0xff] }
  0x7a   :  { %641 = vmatpush.msrb.mxu0 %v243_v46  ;;  %660 = vmatpush.msrb.mxu1 %v260_v47  ;;  %v308_v46 = vld [vmem:[%s2341_s2 + $0x838] sm:$0xff]  ;;  %v325_v47 = vld [vmem:[%s2341_s2 + $0x8c0] sm:$0xff] }
  0x7b   :  { %681 = vmatpush.msrb.mxu2 %v275_v48  ;;  %700 = vmatpush.msrb.mxu3 %v292_v49  ;;  %v340_v48 = vld [vmem:[%s2341_s2 + $0x938] sm:$0xff]  ;;  %v357_v49 = vld [vmem:[%s2341_s2 + $0x9c0] sm:$0xff] }
  0x7c   :  { %642 = vmatpush.msrb.mxu0 %v242_v50  ;;  %661 = vmatpush.msrb.mxu1 %v259_v51  ;;  %v307_v50 = vld [vmem:[%s2341_s2 + $0x830] sm:$0xff]  ;;  %v324_v51 = vld [vmem:[%s2341_s2 + $0x8b8] sm:$0xff] }
  0x7d   :  { %682 = vmatpush.msrb.mxu2 %v274_v52  ;;  %701 = vmatpush.msrb.mxu3 %v291_v53  ;;  %v339_v52 = vld [vmem:[%s2341_s2 + $0x930] sm:$0xff]  ;;  %v356_v53 = vld [vmem:[%s2341_s2 + $0x9b8] sm:$0xff] }
  0x7e   :  { %643 = vmatpush.msrb.mxu0 %v241_v54  ;;  %662 = vmatpush.msrb.mxu1 %v258_v55  ;;  %v306_v54 = vld [vmem:[%s2341_s2 + $0x828] sm:$0xff]  ;;  %v323_v55 = vld [vmem:[%s2341_s2 + $0x8b0] sm:$0xff] }
  0x7f   :  { %683 = vmatpush.msrb.mxu2 %v273_v56  ;;  %702 = vmatpush.msrb.mxu3 %v290_v57  ;;  %v338_v56 = vld [vmem:[%s2341_s2 + $0x928] sm:$0xff]  ;;  %v355_v57 = vld [vmem:[%s2341_s2 + $0x9b0] sm:$0xff] }
  0x80   :  { %644 = vmatpush.msrb.mxu0 %v240_v58  ;;  %663 = vmatpush.msrb.mxu1 %v257_v59  ;;  %v305_v58 = vld [vmem:[%s2341_s2 + $0x820] sm:$0xff]  ;;  %v322_v59 = vld [vmem:[%s2341_s2 + $0x8a8] sm:$0xff] }
  0x81   :  { %684 = vmatpush.msrb.mxu2 %v272_v60  ;;  %703 = vmatpush.msrb.mxu3 %v289_v61  ;;  %v337_v60 = vld [vmem:[%s2341_s2 + $0x920] sm:$0xff]  ;;  %v354_v61 = vld [vmem:[%s2341_s2 + $0x9a8] sm:$0xff] }
  0x82   :  { %645 = vmatpush.msrb.mxu0 %v239_v62  ;;  %664 = vmatpush.msrb.mxu1 %v256_v63  ;;  %v304_v62 = vld [vmem:[%s2341_s2 + $0x818] sm:$0xff]  ;;  %v321_v63 = vld [vmem:[%s2341_s2 + $0x8a0] sm:$0xff] }
  0x83   :  { %685 = vmatpush.msrb.mxu2 %v271_v0  ;;  %704 = vmatpush.msrb.mxu3 %v288_v1  ;;  %v336_v0 = vld [vmem:[%s2341_s2 + $0x918] sm:$0xff]  ;;  %v353_v1 = vld [vmem:[%s2341_s2 + $0x9a0] sm:$0xff] }
  0x84   :  { %646 = vmatpush.msrb.mxu0 %v238_v2  ;;  %665 = vmatpush.msrb.mxu1 %v255_v3  ;;  %v303_v2 = vld [vmem:[%s2341_s2 + $0x810] sm:$0xff]  ;;  %v320_v3 = vld [vmem:[%s2341_s2 + $0x898] sm:$0xff] }
  0x85   :  { %686 = vmatpush.msrb.mxu2 %v270_v4  ;;  %705 = vmatpush.msrb.mxu3 %v287_v5  ;;  %v335_v4 = vld [vmem:[%s2341_s2 + $0x910] sm:$0xff]  ;;  %v352_v5 = vld [vmem:[%s2341_s2 + $0x998] sm:$0xff] }
  0x86   :  { %647 = vmatpush.msrb.mxu0 %v237_v6  ;;  %666 = vmatpush.msrb.mxu1 %v254_v7  ;;  %v302_v6 = vld [vmem:[%s2341_s2 + $0x808] sm:$0xff]  ;;  %v319_v7 = vld [vmem:[%s2341_s2 + $0x890] sm:$0xff] }
  0x87   :  { %687 = vmatpush.msrb.mxu2 %v269_v8  ;;  %706 = vmatpush.msrb.mxu3 %v286_v9  ;;  %v334_v8 = vld [vmem:[%s2341_s2 + $0x908] sm:$0xff]  ;;  %v351_v9 = vld [vmem:[%s2341_s2 + $0x990] sm:$0xff] }
  0x88   :  { %648 = vmatmul.f32.vlgmr.msrb.gmra.mxu0 %v35_v10  ;;  %688 = vmatmul.f32.vlgmr.msrb.gmra.mxu2 %v37_v11  ;;  %v301_v10 = vld [vmem:[%s2341_s2 + $0x800] sm:$0xff]  ;;  %v318_v11 = vld [vmem:[%s2341_s2 + $0x888] sm:$0xff] }
  0x89   :  { %712 = vmatpush.msra.mxu0 %v316_v12  ;;  %752 = vmatpush.msra.mxu2 %v348_v13  ;;  %v333_v12 = vld [vmem:[%s2341_s2 + $0x900] sm:$0xff]  ;;  %v350_v13 = vld [vmem:[%s2341_s2 + $0x988] sm:$0xff] }
  0x8a   :  { %667 = vmatpush.msrb.mxu1 %v253_v14  ;;  %707 = vmatpush.msrb.mxu3 %v285_v15  ;;  %v39_v14 = vld [vmem:[%s2342_s0 + $0x80] sm:$0xff]  ;;  %v41_v15 = vld [vmem:[%s2342_s0 + $0x90] sm:$0xff] }
  0x8b   :  { %668 = vmatmul.f32.vlgmr.msrb.gmra.mxu1 %v36_v16  ;;  %708 = vmatmul.f32.vlgmr.msrb.gmra.mxu3 %v38_v17  ;;  %v380_v16 = vld [vmem:[%s2341_s2 + $0xa78] sm:$0xff]  ;;  %v317_v17 = vld [vmem:[%s2341_s2 + $0x880] sm:$0xff] }
  0x8c   :  { %713 = vmatpush.msra.mxu0 %v315_v18  ;;  %732 = vmatpush.msra.mxu1 %v332_v19  ;;  %v349_v18 = vld [vmem:[%s2341_s2 + $0x980] sm:$0xff]  ;;  %v40_v19 = vld [vmem:[%s2342_s0 + $0x88] sm:$0xff] }
  0x8d   :  { %753 = vmatpush.msra.mxu2 %v347_v20  ;;  %772 = vmatpush.msra.mxu3 %v364_v21  ;;  %v42_v20 = vld [vmem:[%s2342_s0 + $0x98] sm:$0xff]  ;;  %v379_v21 = vld [vmem:[%s2341_s2 + $0xa70] sm:$0xff] }
  0x8e   :  { %714 = vmatpush.msra.mxu0 %v314_v22  ;;  %733 = vmatpush.msra.mxu1 %v331_v23  ;;  %v383_v22 = vld [vmem:[%s2341_s2 + $0xa90] sm:$0xff]  ;;  %v378_v23 = vld [vmem:[%s2341_s2 + $0xa68] sm:$0xff] }
  0x8f   :  { %754 = vmatpush.msra.mxu2 %v346_v24  ;;  %773 = vmatpush.msra.mxu3 %v363_v25  ;;  %v382_v24 = vld [vmem:[%s2341_s2 + $0xa88] sm:$0xff]  ;;  %v377_v25 = vld [vmem:[%s2341_s2 + $0xa60] sm:$0xff] }
  0x90   :  { %715 = vmatpush.msra.mxu0 %v313_v26  ;;  %734 = vmatpush.msra.mxu1 %v330_v27  ;;  %v381_v26 = vld [vmem:[%s2341_s2 + $0xa80] sm:$0xff]  ;;  %v376_v27 = vld [vmem:[%s2341_s2 + $0xa58] sm:$0xff] }
  0x91   :  { %755 = vmatpush.msra.mxu2 %v345_v28  ;;  %774 = vmatpush.msra.mxu3 %v362_v29  ;;  %v44_v28 = vld [vmem:[%s2342_s0 + $0xa8] sm:$0xff]  ;;  %v836_v29 = vld [vmem:[%s2344_s1] sm:$0xff] }
  0x92   :  { %716 = vmatpush.msra.mxu0 %v312_v30  ;;  %735 = vmatpush.msra.mxu1 %v329_v31  ;;  %v375_v30 = vld [vmem:[%s2341_s2 + $0xa50] sm:$0xff]  ;;  %v1009_v31 = vmov 0  }
  0x93   :  { %756 = vmatpush.msra.mxu2 %v344_v32  ;;  %775 = vmatpush.msra.mxu3 %v361_v33  ;;  %v374_v32 = vld [vmem:[%s2341_s2 + $0xa48] sm:$0xff]  ;;  %v373_v33 = vld [vmem:[%s2341_s2 + $0xa40] sm:$0xff] }
  0x94   :  { %717 = vmatpush.msra.mxu0 %v311_v34  ;;  %736 = vmatpush.msra.mxu1 %v328_v35  ;;  %v372_v34 = vld [vmem:[%s2341_s2 + $0xa38] sm:$0xff]  ;;  %v371_v35 = vld [vmem:[%s2341_s2 + $0xa30] sm:$0xff] }
  0x95   :  { %757 = vmatpush.msra.mxu2 %v343_v36  ;;  %776 = vmatpush.msra.mxu3 %v360_v37  ;;  %v370_v36 = vld [vmem:[%s2341_s2 + $0xa28] sm:$0xff]  ;;  %v369_v37 = vld [vmem:[%s2341_s2 + $0xa20] sm:$0xff] }
  0x96   :  { %718 = vmatpush.msra.mxu0 %v310_v38  ;;  %737 = vmatpush.msra.mxu1 %v327_v39  ;;  %v368_v38 = vld [vmem:[%s2341_s2 + $0xa18] sm:$0xff]  ;;  %v367_v39 = vld [vmem:[%s2341_s2 + $0xa10] sm:$0xff] }
  0x97   :  { %758 = vmatpush.msra.mxu2 %v342_v40  ;;  %777 = vmatpush.msra.mxu3 %v359_v41  ;;  %v366_v40 = vld [vmem:[%s2341_s2 + $0xa08] sm:$0xff]  ;;  %v365_v41 = vld [vmem:[%s2341_s2 + $0xa00] sm:$0xff] }
  0x98   :  { %719 = vmatpush.msra.mxu0 %v309_v42  ;;  %738 = vmatpush.msra.mxu1 %v326_v43  ;;  %v43_v42 = vld [vmem:[%s2342_s0 + $0xa0] sm:$0xff] }
  0x99   :  { %759 = vmatpush.msra.mxu2 %v341_v44  ;;  %778 = vmatpush.msra.mxu3 %v358_v45  ;;  %v1008_v43 = vld [vmem:[%s2343_s3] ss:$0 sm:$0xff] }
  0x9a   :  { %720 = vmatpush.msra.mxu0 %v308_v46  ;;  %739 = vmatpush.msra.mxu1 %v325_v47 }
  0x9b   :  { %760 = vmatpush.msra.mxu2 %v340_v48  ;;  %779 = vmatpush.msra.mxu3 %v357_v49 }
  0x9c   :  { %721 = vmatpush.msra.mxu0 %v307_v50  ;;  %740 = vmatpush.msra.mxu1 %v324_v51  ;;  %v903_v51 = vld [vmem:[%s2345_s4 + $0x1e0] sm:$0xff] }
  0x9d   :  { %761 = vmatpush.msra.mxu2 %v339_v52  ;;  %780 = vmatpush.msra.mxu3 %v356_v53  ;;  %v904_v52 = vld [vmem:[%s2345_s4 + $0x1e8] sm:$0xff]  ;;  %v905_v53 = vld [vmem:[%s2345_s4 + $0x1f0] sm:$0xff] }
  0x9e   :  { %722 = vmatpush.msra.mxu0 %v306_v54  ;;  %741 = vmatpush.msra.mxu1 %v323_v55  ;;  %v906_v54 = vld [vmem:[%s2345_s4 + $0x1f8] sm:$0xff]  ;;  %v899_v55 = vld [vmem:[%s2345_s4 + $0x1c0] sm:$0xff] }
  0x9f   :  { %762 = vmatpush.msra.mxu2 %v338_v56  ;;  %781 = vmatpush.msra.mxu3 %v355_v57  ;;  %v900_v56 = vld [vmem:[%s2345_s4 + $0x1c8] sm:$0xff]  ;;  %v901_v57 = vld [vmem:[%s2345_s4 + $0x1d0] sm:$0xff] }
  0xa0   :  { %723 = vmatpush.msra.mxu0 %v305_v58  ;;  %742 = vmatpush.msra.mxu1 %v322_v59  ;;  %v902_v59 = vld [vmem:[%s2345_s4 + $0x1d8] sm:$0xff] }
  0xa1   :  { %763 = vmatpush.msra.mxu2 %v337_v60  ;;  %782 = vmatpush.msra.mxu3 %v354_v61  ;;  %v895_v60 = vld [vmem:[%s2345_s4 + $0x1a0] sm:$0xff]  ;;  %v896_v61 = vld [vmem:[%s2345_s4 + $0x1a8] sm:$0xff] }
  0xa2   :  { %724 = vmatpush.msra.mxu0 %v304_v62  ;;  %743 = vmatpush.msra.mxu1 %v321_v63  ;;  %v897_v63 = vld [vmem:[%s2345_s4 + $0x1b0] sm:$0xff] }
  0xa3   :  { %764 = vmatpush.msra.mxu2 %v336_v0  ;;  %783 = vmatpush.msra.mxu3 %v353_v1  ;;  %v898_v0 = vld [vmem:[%s2345_s4 + $0x1b8] sm:$0xff]  ;;  %v891_v1 = vld [vmem:[%s2345_s4 + $0x180] sm:$0xff] }
  0xa4   :  { %725 = vmatpush.msra.mxu0 %v303_v2  ;;  %744 = vmatpush.msra.mxu1 %v320_v3  ;;  %v892_v2 = vld [vmem:[%s2345_s4 + $0x188] sm:$0xff]  ;;  %v893_v3 = vld [vmem:[%s2345_s4 + $0x190] sm:$0xff] }
  0xa5   :  { %765 = vmatpush.msra.mxu2 %v335_v4  ;;  %784 = vmatpush.msra.mxu3 %v352_v5  ;;  %v894_v4 = vld [vmem:[%s2345_s4 + $0x198] sm:$0xff]  ;;  %v887_v5 = vld [vmem:[%s2345_s4 + $0x160] sm:$0xff] }
  0xa6   :  { %726 = vmatpush.msra.mxu0 %v302_v6  ;;  %745 = vmatpush.msra.mxu1 %v319_v7  ;;  %v888_v6 = vld [vmem:[%s2345_s4 + $0x168] sm:$0xff] }
  0xa7   :  { %766 = vmatpush.msra.mxu2 %v334_v8  ;;  %785 = vmatpush.msra.mxu3 %v351_v9  ;;  %v889_v8 = vld [vmem:[%s2345_s4 + $0x170] sm:$0xff]  ;;  %v890_v9 = vld [vmem:[%s2345_s4 + $0x178] sm:$0xff] }
  0xa8   :  { %727 = vmatpush.msra.mxu0 %v301_v10  ;;  %746 = vmatpush.msra.mxu1 %v318_v11  ;;  %v883_v11 = vld [vmem:[%s2345_s4 + $0x140] sm:$0xff] }
  0xa9   :  { %767 = vmatpush.msra.mxu2 %v333_v12  ;;  %786 = vmatpush.msra.mxu3 %v350_v13  ;;  %v884_v12 = vld [vmem:[%s2345_s4 + $0x148] sm:$0xff]  ;;  %v885_v13 = vld [vmem:[%s2345_s4 + $0x150] sm:$0xff] }
  0xaa   :  { %728 = vmatmul.f32.vlgmr.msra.gmra.mxu0 %v39_v14  ;;  %768 = vmatmul.f32.vlgmr.msra.gmra.mxu2 %v41_v15  ;;  %v886_v14 = vld [vmem:[%s2345_s4 + $0x158] sm:$0xff]  ;;  %v879_v15 = vld [vmem:[%s2345_s4 + $0x120] sm:$0xff] }
  0xab   :  { %792 = vmatpush.msrb.mxu0 %v380_v16  ;;  %747 = vmatpush.msra.mxu1 %v317_v17  ;;  %v880_v16 = vld [vmem:[%s2345_s4 + $0x128] sm:$0xff] }
  0xac   :  { %787 = vmatpush.msra.mxu3 %v349_v18  ;;  %748 = vmatmul.f32.vlgmr.msra.gmra.mxu1 %v40_v19  ;;  %v881_v18 = vld [vmem:[%s2345_s4 + $0x130] sm:$0xff]  ;;  %v882_v19 = vld [vmem:[%s2345_s4 + $0x138] sm:$0xff] }
  0xad   :  { %788 = vmatmul.f32.vlgmr.msra.gmra.mxu3 %v42_v20  ;;  %793 = vmatpush.msrb.mxu0 %v379_v21  ;;  %v875_v21 = vld [vmem:[%s2345_s4 + $0x100] sm:$0xff] }
  0xae   :  { %825 = vmatpush.msrb.mxu1 %v383_v22  ;;  %1007 = vset.pattern.permute.xlu0 %v1009_v31  ;;  %v876_v22 = vld [vmem:[%s2345_s4 + $0x108] sm:$0xff]  ;;  %v867_v31 = vld [vmem:[%s2345_s4 + $0xc0] sm:$0xff] }
  0xaf   :  { %794 = vmatpush.msrb.mxu0 %v378_v23  ;;  %839 = vperm.xlu0 %1007, %v836_v29   ;;  %v877_v23 = vld [vmem:[%s2345_s4 + $0x110] sm:$0xff]  ;;  %v874_v29 = vld [vmem:[%s2345_s4 + $0xf8] sm:$0xff] }
  0xb0   :  { %826 = vmatpush.msrb.mxu1 %v382_v24  ;;  %917 = vmatpush.msrb.mxu2 %v903_v51  ;;  %v878_v24 = vld [vmem:[%s2345_s4 + $0x118] sm:$0xff] }
  0xb1   :  { %795 = vmatpush.msrb.mxu0 %v377_v25  ;;  %937 = vmatpush.msrb.mxu3 %v904_v52  ;;  %v871_v25 = vld [vmem:[%s2345_s4 + $0xe0] sm:$0xff]  ;;  %v858_v52 = vld [vmem:[%s2345_s4 + $0x78] sm:$0xff] }
  0xb2   :  { %827 = vmatpush.msrb.mxu1 %v381_v26  ;;  %918 = vmatpush.msrb.mxu2 %v899_v55  ;;  %v872_v26 = vld [vmem:[%s2345_s4 + $0xe8] sm:$0xff]  ;;  %v853_v55 = vld [vmem:[%s2345_s4 + $0x50] sm:$0xff] }
  0xb3   :  { %796 = vmatpush.msrb.mxu0 %v376_v27  ;;  %938 = vmatpush.msrb.mxu3 %v900_v56 }
  0xb4   :  { %1005 = vmatmul.msk.f32.vlgmr.msrb.gmra.mxu1 %vm388_vm0, %v44_v28  ;;  %919 = vmatpush.msrb.mxu2 %v895_v60  ;;  %v873_v28 = vld [vmem:[%s2345_s4 + $0xf0] sm:$0xff]  ;;  %v848_v60 = vld [vmem:[%s2345_s4 + $0x28] sm:$0xff] }
  0xb5   :  { %797 = vmatpush.msrb.mxu0 %v375_v30  ;;  %957 = vmatpush.msra.mxu1 %v905_v53  ;;  %v851_v53 = vld [vmem:[%s2345_s4 + $0x40] sm:$0xff] }
  0xb6   :  { %939 = vmatpush.msrb.mxu3 %v896_v61  ;;  %920 = vmatpush.msrb.mxu2 %v891_v1  ;;  %v849_v61 = vld [vmem:[%s2345_s4 + $0x30] sm:$0xff]  ;;  %v844_v1 = vld [vmem:[%s2345_s4 + $0x8] sm:$0xff] }
  0xb7   :  { %798 = vmatpush.msrb.mxu0 %v374_v32  ;;  %958 = vmatpush.msra.mxu1 %v901_v57  ;;  %v868_v32 = vld [vmem:[%s2345_s4 + $0xc8] sm:$0xff]  ;;  %v854_v57 = vld [vmem:[%s2345_s4 + $0x58] sm:$0xff] }
  0xb8   :  { %940 = vmatpush.msrb.mxu3 %v892_v2  ;;  %921 = vmatpush.msrb.mxu2 %v887_v5  ;;  %v845_v2 = vld [vmem:[%s2345_s4 + $0x10] sm:$0xff] }
  0xb9   :  { %799 = vmatpush.msrb.mxu0 %v373_v33  ;;  %959 = vmatpush.msra.mxu1 %v897_v63  ;;  %v869_v33 = vld [vmem:[%s2345_s4 + $0xd0] sm:$0xff] }
  0xba   :  { %941 = vmatpush.msrb.mxu3 %v888_v6  ;;  %922 = vmatpush.msrb.mxu2 %v883_v11 }
  0xbb   :  { %800 = vmatpush.msrb.mxu0 %v372_v34  ;;  %960 = vmatpush.msra.mxu1 %v893_v3  ;;  %v870_v34 = vld [vmem:[%s2345_s4 + $0xd8] sm:$0xff] }
  0xbc   :  { %942 = vmatpush.msrb.mxu3 %v884_v12  ;;  %923 = vmatpush.msrb.mxu2 %v879_v15 }
  0xbd   :  { %801 = vmatpush.msrb.mxu0 %v371_v35  ;;  %961 = vmatpush.msra.mxu1 %v889_v8 }
  0xbe   :  { %943 = vmatpush.msrb.mxu3 %v880_v16  ;;  %924 = vmatpush.msrb.mxu2 %v875_v21 }
  0xbf   :  { %802 = vmatpush.msrb.mxu0 %v370_v36  ;;  %v409_v44 = vpop.f32.mrf.mxu0  ;;  %962 = vmatpush.msra.mxu1 %v885_v13  ;;  %v863_v36 = vld [vmem:[%s2345_s4 + $0xa0] sm:$0xff] }
  0xc0   :  { %v410_v45 = vadd.f32 %v1008_v43, %v409_v44  ;;  %944 = vmatpush.msrb.mxu3 %v876_v22  ;;  %925 = vmatpush.msrb.mxu2 %v871_v25  ;;  %v861_v44 = vld [vmem:[%s2345_s4 + $0x90] sm:$0xff] }
  0xc1   :  { %803 = vmatpush.msrb.mxu0 %v369_v37  ;;  %963 = vmatpush.msra.mxu1 %v881_v18  ;;  %v864_v37 = vld [vmem:[%s2345_s4 + $0xa8] sm:$0xff] }
  0xc2   :  { %v429_v46 = vpop.f32.mrf.mxu1  ;;  %945 = vmatpush.msrb.mxu3 %v872_v26  ;;  %926 = vmatpush.msrb.mxu2 %v867_v31 }
  0xc3   :  { %804 = vmatpush.msrb.mxu0 %v368_v38  ;;  %v430_v47 = vadd.f32 %v429_v46, %v410_v45  ;;  %v449_v48 = vpop.f32.mrf.mxu2  ;;  %964 = vmatpush.msra.mxu1 %v877_v23  ;;  %v862_v45 = vld [vmem:[%s2345_s4 + $0x98] sm:$0xff] }
  0xc4   :  { %946 = vmatpush.msrb.mxu3 %v868_v32  ;;  %927 = vmatpush.msrb.mxu2 %v863_v36 }
  0xc5   :  { %805 = vmatpush.msrb.mxu0 %v367_v39  ;;  %v450_v49 = vadd.f32 %v449_v48, %v430_v47  ;;  %965 = vmatpush.msra.mxu1 %v873_v28  ;;  %v865_v39 = vld [vmem:[%s2345_s4 + $0xb0] sm:$0xff]  ;;  %v855_v48 = vld [vmem:[%s2345_s4 + $0x60] sm:$0xff] }
  0xc6   :  { %v469_v50 = vpop.f32.mrf.mxu3  ;;  %947 = vmatpush.msrb.mxu3 %v864_v37 }
  0xc7   :  { %806 = vmatpush.msrb.mxu0 %v366_v40  ;;  %v470_v58 = vadd.f32 %v469_v50, %v450_v49  ;;  %v866_v40 = vld [vmem:[%s2345_s4 + $0xb8] sm:$0xff]  ;;  %966 = vmatpush.msra.mxu1 %v869_v33  ;;  %v856_v49 = vld [vmem:[%s2345_s4 + $0x68] sm:$0xff]  ;;  %v857_v50 = vld [vmem:[%s2345_s4 + $0x70] sm:$0xff] }
  0xc9   :  { %807 = vmatpush.msrb.mxu0 %v365_v41  ;;  %v489_v62 = vpop.f32.mrf.mxu0  ;;  %v859_v41 = vld [vmem:[%s2345_s4 + $0x80] sm:$0xff]  ;;  %967 = vmatpush.msra.mxu1 %v865_v39 }
  0xca   :  { %808 = vmatmul.f32.vlgmr.msrb.gmra.mxu0 %v43_v42  ;;  %v490_v7 = vadd.f32 %v489_v62, %v470_v58  ;;  %v860_v42 = vld [vmem:[%s2345_s4 + $0x88] sm:$0xff]  ;;  %928 = vmatpush.msrb.mxu2 %v859_v41  ;;  %v850_v62 = vld [vmem:[%s2345_s4 + $0x38] sm:$0xff] }
  0xcb   :  { %977 = vmatpush.msra.mxu0 %v906_v54  ;;  %948 = vmatpush.msrb.mxu3 %v860_v42  ;;  %v852_v54 = vld [vmem:[%s2345_s4 + $0x48] sm:$0xff] }
  0xcc   :  { %v509_v10 = vpop.f32.mrf.mxu1  ;;  %968 = vmatpush.msra.mxu1 %v861_v44  ;;  %929 = vmatpush.msrb.mxu2 %v855_v48 }
  0xcd   :  { %978 = vmatpush.msra.mxu0 %v902_v59  ;;  %v510_v17 = vadd.f32 %v509_v10, %v490_v7  ;;  %v529_v20 = vpop.f32.mrf.mxu2  ;;  %949 = vmatpush.msrb.mxu3 %v856_v49  ;;  %v847_v59 = vld [vmem:[%s2345_s4 + $0x20] sm:$0xff] }
  0xce   :  { %969 = vmatpush.msra.mxu1 %v857_v50  ;;  %930 = vmatpush.msrb.mxu2 %v851_v53 }
  0xcf   :  { %979 = vmatpush.msra.mxu0 %v898_v0  ;;  %v530_v27 = vadd.f32 %v529_v20, %v510_v17  ;;  %950 = vmatpush.msrb.mxu3 %v852_v54  ;;  %v843_v0 = vld [vmem:[%s2345_s4] sm:$0xff] }
  0xd0   :  { %v549_v30 = vpop.f32.mrf.mxu3  ;;  %970 = vmatpush.msra.mxu1 %v853_v55  ;;  %931 = vmatpush.msrb.mxu2 %v847_v59 }
  0xd1   :  { %980 = vmatpush.msra.mxu0 %v894_v4  ;;  %v550_v38 = vadd.f32 %v549_v30, %v530_v27  ;;  %951 = vmatpush.msrb.mxu3 %v848_v60  ;;  %v846_v4 = vld [vmem:[%s2345_s4 + $0x18] sm:$0xff] }
  0xd2   :  { %971 = vmatpush.msra.mxu1 %v849_v61  ;;  %932 = vmatpush.msrb.mxu2 %v843_v0 }
  0xd3   :  { %981 = vmatpush.msra.mxu0 %v890_v9  ;;  %952 = vmatpush.msrb.mxu3 %v844_v1 }
  0xd4   :  { %972 = vmatpush.msra.mxu1 %v845_v2 }
  0xd5   :  { %982 = vmatpush.msra.mxu0 %v886_v14 }
  0xd7   :  { %983 = vmatpush.msra.mxu0 %v882_v19  ;;  %v833_v19 = vlaneseq }
  0xd9   :  { %984 = vmatpush.msra.mxu0 %v878_v24  ;;  %v834_v23 = vand.u32 127, %v833_v19 }
  0xdb   :  { %985 = vmatpush.msra.mxu0 %v874_v29  ;;  %vm835_vm1 = vcmp.eq.s32.totalorder %v834_v23, 96  ;;  %v907_v29 = vld [vmem:[%s2346_s5] sm:$0xf] }
  0xdc   :  { %v911_v30 = vperm.slane %v907_v29, 2  ;;  %v912_v31 = vperm.slane %v907_v29, 3  ;;  %v909_v36 = vperm.slane %v907_v29, 0  ;;  %v910_v37 = vperm.slane %v907_v29, 1 }
  0xdd   :  { %986 = vmatpush.msra.mxu0 %v870_v34 }
  0xdf   :  { %987 = vmatpush.msra.mxu0 %v866_v40 }
  0xe1   :  { %988 = vmatpush.msra.mxu0 %v862_v45 }
  0xe3   :  { %v569_v35 = vpop.f32.mrf.mxu0  ;;  %989 = vmatpush.msra.mxu0 %v858_v52 }
  0xe4   :  { %v570_v43 = vadd.f32 %v569_v35, %v550_v38 }
  0xe5   :  { %990 = vmatpush.msra.mxu0 %v854_v57 }
  0xe6   :  { %v589_v46 = vpop.f32.mrf.mxu1 }
  0xe7   :  { %v590_v51 = vadd.f32 %v589_v46, %v570_v43  ;;  %991 = vmatpush.msra.mxu0 %v850_v62 }
  0xe9   :  { %v609_v47 = vpop.f32.mrf.mxu2  ;;  %992 = vmatpush.msra.mxu0 %v846_v4 }
  0xea   :  { %v610_v56 = vadd.f32 %v609_v47, %v590_v51 }
  0xec   :  { %v629_v58 = vpop.f32.mrf.mxu3 }
  0xed   :  { %v630_v3 = vadd.f32 %v629_v58, %v610_v56 }
 0x105   :  { %v649_v63 = vpop.f32.mrf.mxu0 }
 0x106   :  { %v650_v5 = vadd.f32 %v649_v63, %v630_v3 }
 0x108   :  { %v669_v6 = vpop.f32.mrf.mxu1 }
 0x109   :  { %v670_v8 = vadd.f32 %v669_v6, %v650_v5 }
 0x10b   :  { %v689_v7 = vpop.f32.mrf.mxu2 }
 0x10c   :  { %v690_v9 = vadd.f32 %v689_v7, %v670_v8 }
 0x10e   :  { %v709_v10 = vpop.f32.mrf.mxu3 }
 0x10f   :  { %v710_v12 = vadd.f32 %v709_v10, %v690_v9 }
 0x121   :  { %v840_v26 = vpop.permute.xlu0 %839 }
 0x127   :  { %v729_v11 = vpop.f32.mrf.mxu0 }
 0x128   :  { %v730_v13 = vadd.f32 %v729_v11, %v710_v12 }
 0x129   :  { %v749_v14 = vpop.f32.mrf.mxu1 }
 0x12a   :  { %v750_v16 = vadd.f32 %v749_v14, %v730_v13 }
 0x12d   :  { %v769_v15 = vpop.f32.mrf.mxu2 }
 0x12e   :  { %v770_v17 = vadd.f32 %v769_v15, %v750_v16 }
 0x130   :  { %v789_v18 = vpop.f32.mrf.mxu3 }
 0x131   :  { %v790_v20 = vadd.f32 %v789_v18, %v770_v17  ;;  %v829_v22 = vpop.f32.mrf.mxu1 }
 0x147   :  { %v809_v21 = vpop.f32.mrf.mxu0 }
 0x148   :  { %v810_v24 = vadd.f32 %v809_v21, %v790_v20 }
 0x14a   :  { %v830_v25 = vadd.f32 %v829_v22, %v810_v24 }
 0x14c   :  { %v832_v27 = vmax.f32 %v830_v25, 0.0 }
 0x14e   :  { %v842_v28 = vsel %vm835_vm1, %v840_v26, %v832_v27 }
 0x14f   :  { %933 = vmatmul.f32.vlgmr.msrb.gmra.mxu2 %v842_v28  ;;  %953 = vmatmul.f32.vlgmr.msrb.gmra.mxu3 %v842_v28 }
 0x150   :  { %973 = vmatmul.f32.vlgmr.msra.gmra.mxu1 %v842_v28  ;;  %993 = vmatmul.f32.vlgmr.msra.gmra.mxu0 %v842_v28 }
 0x1cd   :  { %v974_v32 = vpop.f32.mrf.mxu1  ;;  %v994_v33 = vpop.f32.mrf.mxu0 }
 0x1ce   :  { %v975_v34 = vadd.f32 %v974_v32, %v911_v30  ;;  %v995_v35 = vadd.f32 %v994_v33, %v912_v31 }
 0x1d0   :  { %999 = vst [vmem:[%s2347_s6 + $0x10] sm:$0xff] %v975_v34 }
 0x1d1   :  { %1000 = vst [vmem:[%s2347_s6 + $0x18] sm:$0xff] %v995_v35 }
 0x1d2   :  { %v934_v38 = vpop.f32.mrf.mxu2  ;;  %v954_v39 = vpop.f32.mrf.mxu3 }
 0x1d3   :  { %v935_v40 = vadd.f32 %v934_v38, %v909_v36  ;;  %v955_v41 = vadd.f32 %v954_v39, %v910_v37 }
 0x1d5   :  { %997 = vst [vmem:[%s2347_s6] sm:$0xff] %v935_v40 }
 0x1d6   :  { %998 = vst [vmem:[%s2347_s6 + $0x8] sm:$0xff] %v955_v41 }

</bundles_post_ra>
